<compile_context>
chip_gen: v6e
topology: v6e:2x2x1
jax: 0.10.0
libtpu: 0.0.40
codegen_flags: <defaults>
</compile_context>

<pallas_src>
import jax
import jax.numpy as jnp
from jax.experimental import pallas as pl
from jax.experimental.pallas import tpu as pltpu


def _round_up(x, m):
    return ((x + m - 1) // m) * m


def _row_tile(m, cap=256, align=8):
    return min(cap, _round_up(m, align))


# ----------------------------------------------------------------------------- kernels
def _make_matmul_kernel(act_in, act_out):
    """o = act_out(act_in(A) @ B + bias), accumulated over the K grid axis."""

    def kernel(a_ref, b_ref, bias_ref, o_ref, acc_ref):
        @pl.when(pl.program_id(2) == 0)
        def _():
            acc_ref[...] = jnp.zeros_like(acc_ref)

        a = a_ref[...]
        if act_in == "leaky":          # LeakyReLU(0.2) fused onto the A operand
            a = jnp.where(a >= 0, a, 0.2 * a)
        elif act_in == "relu":
            a = jnp.maximum(a, jnp.zeros_like(a))

        acc_ref[...] += jnp.dot(a, b_ref[...], preferred_element_type=jnp.float32)

        @pl.when(pl.program_id(2) == pl.num_programs(2) - 1)
        def _():
            r = acc_ref[...] + bias_ref[...]
            if act_out == "sigmoid":   # outermost Sigmoid fused into the epilogue
                r = 1.0 / (1.0 + jnp.exp(-r))
            o_ref[...] = r

    return kernel


def _stats_kernel(x_ref, sum_ref, sq_ref):
    # grid-accumulated per-channel sum / sum-of-squares (reduction over the M tiles)
    @pl.when(pl.program_id(0) == 0)
    def _():
        sum_ref[...] = jnp.zeros_like(sum_ref)
        sq_ref[...] = jnp.zeros_like(sq_ref)

    x = x_ref[...]
    sum_ref[...] += jnp.sum(x, axis=0, keepdims=True)
    sq_ref[...] += jnp.sum(x * x, axis=0, keepdims=True)


def _affine_kernel(x_ref, scale_ref, shift_ref, o_ref):
    o_ref[...] = x_ref[...] * scale_ref[...] + shift_ref[...]


# ----------------------------------------------------------------------------- fused matmul
def fused_matmul(a, b, bias=None, act_in=None, act_out=None):
    """act_out(act_in(a) @ b + bias): a [M,K] f32, b [K,N] f32, bias [N]|None -> [M,N] f32."""
    M, K = a.shape
    N = b.shape[1]
    Kp = _round_up(K, 128)
    Np = _round_up(N, 128)
    tm = _row_tile(M, cap=256, align=16)
    Mp = _round_up(M, tm)
    tn = 128
    tk = next(t for t in (512, 256, 128) if Kp % t == 0)

    a_p = jnp.pad(a, ((0, Mp - M), (0, Kp - K))).astype(jnp.bfloat16)
    b_p = jnp.pad(b, ((0, Kp - K), (0, Np - N))).astype(jnp.bfloat16)
    if bias is None:
        bias_p = jnp.zeros((1, Np), jnp.float32)
    else:
        bias_p = jnp.pad(bias.astype(jnp.float32).reshape(1, N), ((0, 0), (0, Np - N)))

    out = pl.pallas_call(
        _make_matmul_kernel(act_in, act_out),
        out_shape=jax.ShapeDtypeStruct((Mp, Np), jnp.float32),
        grid=(Mp // tm, Np // tn, Kp // tk),
        in_specs=[
            pl.BlockSpec((tm, tk), lambda i, j, k: (i, k)),
            pl.BlockSpec((tk, tn), lambda i, j, k: (k, j)),
            pl.BlockSpec((1, tn), lambda i, j, k: (0, j)),
        ],
        out_specs=pl.BlockSpec((tm, tn), lambda i, j, k: (i, j)),
        scratch_shapes=[pltpu.VMEM((tm, tn), jnp.float32)],
        compiler_params=pltpu.CompilerParams(
            dimension_semantics=("parallel", "parallel", "arbitrary"),
            vmem_limit_bytes=32 * 1024 * 1024,
        ),
    )(a_p, b_p, bias_p)
    return out[:M, :N]


# ----------------------------------------------------------------------------- batch norm
def pallas_batchnorm(x_nhwc, gamma, beta, eps=1e-5):
    """Training-mode BatchNorm2d: batch statistics over N*H*W, biased variance."""
    N, H, W, C = x_nhwc.shape
    M = N * H * W
    tm = _row_tile(M, cap=256, align=8)
    Mp = _round_up(M, tm)
    f = jnp.pad(x_nhwc.reshape(M, C), ((0, Mp - M), (0, 0)))

    s, ss = pl.pallas_call(
        _stats_kernel,
        out_shape=(jax.ShapeDtypeStruct((1, C), jnp.float32),
                   jax.ShapeDtypeStruct((1, C), jnp.float32)),
        grid=(Mp // tm,),
        in_specs=[pl.BlockSpec((tm, C), lambda i: (i, 0))],
        out_specs=(pl.BlockSpec((1, C), lambda i: (0, 0)),
                   pl.BlockSpec((1, C), lambda i: (0, 0))),
        compiler_params=pltpu.CompilerParams(dimension_semantics=("arbitrary",)),
    )(f)

    mean = s / M                                       # padded rows are zero -> true count M
    var = jnp.maximum(ss / M - mean * mean, 0.0)
    scale = gamma.reshape(1, C) * jax.lax.rsqrt(var + eps)
    shift = beta.reshape(1, C) - mean * scale

    out = pl.pallas_call(
        _affine_kernel,
        out_shape=jax.ShapeDtypeStruct((Mp, C), jnp.float32),
        grid=(Mp // tm,),
        in_specs=[pl.BlockSpec((tm, C), lambda i: (i, 0)),
                  pl.BlockSpec((1, C), lambda i: (0, 0)),
                  pl.BlockSpec((1, C), lambda i: (0, 0))],
        out_specs=pl.BlockSpec((tm, C), lambda i: (i, 0)),
        compiler_params=pltpu.CompilerParams(dimension_semantics=("parallel",)),
    )(f, scale, shift)
    return out[:M].reshape(N, H, W, C)


# ----------------------------------------------------------------------------- conv lowerings
def conv_down(x, w, act_in=None):
    """Conv2d(k=4, s=2, p=1, bias=False); x NHWC; w PyTorch layout [Cout, Cin, 4, 4].
    The preceding LeakyReLU (if any) is fused into the matmul A-operand (act(0)=0, so
    applying it after zero-padding is exact)."""
    N, H, W, Cin = x.shape
    Cout = w.shape[0]
    Ho, Wo = H // 2, W // 2
    xp = jnp.pad(x, ((0, 0), (1, 1), (1, 1), (0, 0)))
    taps = [xp[:, ky:ky + 2 * Ho - 1:2, kx:kx + 2 * Wo - 1:2, :]
            for ky in range(4) for kx in range(4)]
    patches = jnp.stack(taps, axis=3).reshape(N * Ho * Wo, 16 * Cin)
    wm = jnp.transpose(w, (2, 3, 1, 0)).reshape(16 * Cin, Cout)
    out = fused_matmul(patches, wm, None, act_in=act_in)
    return out.reshape(N, Ho, Wo, Cout)


# per output sub-pixel phase: (row/col offset into the 1-padded input, kernel tap index)
_PHASE_TAPS = {0: ((0, 3), (1, 1)), 1: ((1, 2), (2, 0))}


def conv_up(x, w, bias=None, act_in=None, act_out=None):
    """ConvTranspose2d(k=4, s=2, p=1) via sub-pixel phase decomposition: 4 stride-1
    2x2-tap convs on the un-dilated input, interleaved into the 2x-upsampled output.
    x NHWC; w PyTorch layout [Cin, Cout, 4, 4]."""
    N, H, W, Cin = x.shape
    Cout = w.shape[1]
    xp = jnp.pad(x, ((0, 0), (1, 1), (1, 1), (0, 0)))
    phase_outs = []
    for r in (0, 1):
        for s in (0, 1):
            taps, wcols = [], []
            for dy, ky in _PHASE_TAPS[r]:
                for dx, kx in _PHASE_TAPS[s]:
                    taps.append(xp[:, dy:dy + H, dx:dx + W, :])
                    wcols.append(w[:, :, ky, kx])            # (Cin, Cout)
            patches = jnp.stack(taps, axis=3).reshape(N * H * W, 4 * Cin)
            wm = jnp.stack(wcols, axis=0).reshape(4 * Cin, Cout)
            ph = fused_matmul(patches, wm, bias, act_in=act_in, act_out=act_out)
            phase_outs.append(ph.reshape(N, H, W, Cout))
    out = jnp.stack(phase_outs, axis=0).reshape(2, 2, N, H, W, Cout)
    out = out.transpose(2, 3, 0, 4, 1, 5).reshape(N, 2 * H, 2 * W, Cout)
    return out


# ----------------------------------------------------------------------------- parameters
def _randn(key, shape, scale=0.05):
    return scale * jax.random.normal(key, shape, dtype=jnp.float32)


def build_unet_params(key, input_nc, output_nc, num_downs, ngf):
    keys = iter(jax.random.split(key, 4 * num_downs + 8))
    nxt = lambda: next(keys)

    blk = {  # innermost: down has no norm; upconv bias=False (BatchNorm norm layer)
        "kind": "inner",
        "dW": _randn(nxt(), (ngf * 8, ngf * 8, 4, 4)),
        "uW": _randn(nxt(), (ngf * 8, ngf * 8, 4, 4)),
        "up_gamma": jnp.ones((ngf * 8,), jnp.float32),
        "up_beta": jnp.zeros((ngf * 8,), jnp.float32),
        "sub": None,
    }
    for _ in range(num_downs - 5):  # ngf*8 <-> ngf*8 middle blocks (use_dropout=False)
        blk = {
            "kind": "mid",
            "dW": _randn(nxt(), (ngf * 8, ngf * 8, 4, 4)),
            "dn_gamma": jnp.ones((ngf * 8,), jnp.float32),
            "dn_beta": jnp.zeros((ngf * 8,), jnp.float32),
            "uW": _randn(nxt(), (ngf * 16, ngf * 8, 4, 4)),
            "up_gamma": jnp.ones((ngf * 8,), jnp.float32),
            "up_beta": jnp.zeros((ngf * 8,), jnp.float32),
            "sub": blk,
        }
    for mo, mi in [(4, 8), (2, 4), (1, 2)]:
        o, i_ = ngf * mo, ngf * mi
        blk = {
            "kind": "mid",
            "dW": _randn(nxt(), (i_, o, 4, 4)),
            "dn_gamma": jnp.ones((i_,), jnp.float32),
            "dn_beta": jnp.zeros((i_,), jnp.float32),
            "uW": _randn(nxt(), (2 * i_, o, 4, 4)),
            "up_gamma": jnp.ones((o,), jnp.float32),
            "up_beta": jnp.zeros((o,), jnp.float32),
            "sub": blk,
        }
    blk = {  # outermost: downconv(input_nc->ngf, no bias); upconv(2*ngf->output_nc, bias=True)
        "kind": "outer",
        "dW": _randn(nxt(), (ngf, input_nc, 4, 4)),
        "uW": _randn(nxt(), (2 * ngf, output_nc, 4, 4)),
        "ub": jnp.zeros((output_nc,), jnp.float32),
        "sub": blk,
    }
    return blk


# ----------------------------------------------------------------------------- forward
def unet_block_forward(p, x):
    kind = p["kind"]
    if kind == "outer":
        h = conv_down(x, p["dW"])                                   # downconv (no bias: BN)
        h = unet_block_forward(p["sub"], h)                         # submodule
        h = conv_up(h, p["uW"], p["ub"],
                    act_in="relu", act_out="sigmoid")               # uprelu+upconv+Sigmoid
        return h                                                    # no skip at outermost
    elif kind == "mid":
        h = conv_down(x, p["dW"], act_in="leaky")                   # downrelu+downconv
        h = pallas_batchnorm(h, p["dn_gamma"], p["dn_beta"])        # downnorm
        h = unet_block_forward(p["sub"], h)
        h = conv_up(h, p["uW"], act_in="relu")                      # uprelu+upconv
        h = pallas_batchnorm(h, p["up_gamma"], p["up_beta"])        # upnorm
        return jnp.concatenate([x, h], axis=-1)                     # skip connection
    else:  # innermost
        h = conv_down(x, p["dW"], act_in="leaky")
        h = conv_up(h, p["uW"], act_in="relu")
        h = pallas_batchnorm(h, p["up_gamma"], p["up_beta"])
        return jnp.concatenate([x, h], axis=-1)


def unet_generator(params, x_nchw):
    x = jnp.transpose(x_nchw, (0, 2, 3, 1)).astype(jnp.float32)     # NCHW -> NHWC
    y = unet_block_forward(params, x)
    return jnp.transpose(y, (0, 3, 1, 2))                           # back to NCHW


# ----------------------------------------------------------------------------- main
if __name__ == "__main__":
    # UnetGenerator(input_nc=3, output_nc=2, num_downs=5, ngf=8), input 2x3x32x32
    input_nc, output_nc, num_downs, ngf = 3, 2, 5, 8
    key = jax.random.PRNGKey(0)
    kx, kp = jax.random.split(key)
    x = jax.random.normal(kx, (2, input_nc, 32, 32), dtype=jnp.float32)
    params = build_unet_params(kp, input_nc, output_nc, num_downs, ngf)

    fwd = jax.jit(lambda inp: unet_generator(params, inp))
    y = fwd(x)
    jax.block_until_ready(y)
    assert y.shape == (2, output_nc, 32, 32), y.shape
    assert bool(jnp.all(jnp.isfinite(y)))
    assert bool(jnp.all((y >= 0.0) & (y <= 1.0)))  # sigmoid output range
    print("KERNEL_OK")
</pallas_src>

<mosaic_0001>
module attributes {stable_mosaic.version = 11 : i64} {
  func.func @kernel(%arg0: i32, %arg1: i32, %arg2: i32, %arg3: memref<256x128xbf16, #tpu.memory_space<vmem>>, %arg4: memref<128x128xbf16, #tpu.memory_space<vmem>>, %arg5: memref<1x128xf32, #tpu.memory_space<vmem>>, %arg6: memref<256x128xf32, #tpu.memory_space<vmem>>, %arg7: memref<256x128xf32, #tpu.memory_space<vmem>>) attributes {dimension_semantics = [#tpu.dimension_semantics<parallel>, #tpu.dimension_semantics<parallel>, #tpu.dimension_semantics<arbitrary>], iteration_bounds = array<i64: 2, 1, 1>, scalar_prefetch = 0 : i64, scratch_operands = 1 : i64, tpu.core_type = #tpu.core_type<tc>, window_params = [{transform_indices = @transform_0, window_bounds = array<i64: 256, 128>}, {transform_indices = @transform_1, window_bounds = array<i64: 128, 128>}, {transform_indices = @transform_2, window_bounds = array<i64: 1, 128>}, {transform_indices = @transform_3, window_bounds = array<i64: 256, 128>}]} {
    %c0_i32 = arith.constant 0 : i32
    %0 = arith.cmpi eq, %arg2, %c0_i32 : i32
    %1 = arith.extui %0 : i1 to i32
    %c0_i32_0 = arith.constant 0 : i32
    %2 = arith.cmpi ne, %1, %c0_i32_0 : i32
    scf.if %2 {
      %cst_10 = arith.constant 0.000000e+00 : f32
      %12 = vector.broadcast %cst_10 : f32 to vector<256x128xf32>
      %c0_11 = arith.constant 0 : index
      %c0_12 = arith.constant 0 : index
      %13 = vector.load %arg7[%c0_11, %c0_12] : memref<256x128xf32, #tpu.memory_space<vmem>>, vector<256x128xf32>
      tpu.vector_store %arg7[%c0_11, %c0_12], %12 {strides = array<i32>} : memref<256x128xf32, #tpu.memory_space<vmem>>, vector<256x128xf32>,
    } else {
    }
    %c0 = arith.constant 0 : index
    %c0_1 = arith.constant 0 : index
    %3 = vector.load %arg3[%c0, %c0_1] : memref<256x128xbf16, #tpu.memory_space<vmem>>, vector<256x128xbf16>
    %c0_2 = arith.constant 0 : index
    %c0_3 = arith.constant 0 : index
    %4 = vector.load %arg7[%c0_2, %c0_3] : memref<256x128xf32, #tpu.memory_space<vmem>>, vector<256x128xf32>
    %c0_4 = arith.constant 0 : index
    %c0_5 = arith.constant 0 : index
    %5 = vector.load %arg4[%c0_4, %c0_5] : memref<128x128xbf16, #tpu.memory_space<vmem>>, vector<128x128xbf16>
    %cst = arith.constant dense<0.000000e+00> : vector<256x128xf32>
    %6 = tpu.matmul %3, %5, %cst {dimension_numbers = #tpu.dot_dimension_numbers<[1], [0], [0], [1], [0, 0, 1, 1], [], []>} : vector<256x128xbf16>, vector<128x128xbf16>, vector<256x128xf32> -> vector<256x128xf32>
    %7 = arith.addf %4, %6 : vector<256x128xf32>
    %c0_6 = arith.constant 0 : index
    %c0_7 = arith.constant 0 : index
    %8 = vector.load %arg7[%c0_6, %c0_7] : memref<256x128xf32, #tpu.memory_space<vmem>>, vector<256x128xf32>
    tpu.vector_store %arg7[%c0_6, %c0_7], %7 {strides = array<i32>} : memref<256x128xf32, #tpu.memory_space<vmem>>, vector<256x128xf32>,
    %c0_i32_8 = arith.constant 0 : i32
    %9 = arith.cmpi eq, %arg2, %c0_i32_8 : i32
    %10 = arith.extui %9 : i1 to i32
    %c0_i32_9 = arith.constant 0 : i32
    %11 = arith.cmpi ne, %10, %c0_i32_9 : i32
    scf.if %11 {
      %c0_10 = arith.constant 0 : index
      %c0_11 = arith.constant 0 : index
      %12 = vector.load %arg7[%c0_10, %c0_11] : memref<256x128xf32, #tpu.memory_space<vmem>>, vector<256x128xf32>
      %c0_12 = arith.constant 0 : index
      %c0_13 = arith.constant 0 : index
      %13 = vector.load %arg5[%c0_12, %c0_13] : memref<1x128xf32, #tpu.memory_space<vmem>>, vector<1x128xf32>
      %14 = vector.broadcast %13 : vector<1x128xf32> to vector<256x128xf32>
      %15 = arith.addf %12, %14 : vector<256x128xf32>
      %c0_14 = arith.constant 0 : index
      %c0_15 = arith.constant 0 : index
      %16 = vector.load %arg6[%c0_14, %c0_15] : memref<256x128xf32, #tpu.memory_space<vmem>>, vector<256x128xf32>
      tpu.vector_store %arg6[%c0_14, %c0_15], %15 {strides = array<i32>} : memref<256x128xf32, #tpu.memory_space<vmem>>, vector<256x128xf32>,
    } else {
    }
    return
  }
  func.func @transform_0(%arg0: i32, %arg1: i32, %arg2: i32) -> (i32, i32) {
    %c0_i32 = arith.constant 0 : i32
    return %arg0, %arg2 : i32, i32
  }
  func.func @transform_1(%arg0: i32, %arg1: i32, %arg2: i32) -> (i32, i32) {
    %c0_i32 = arith.constant 0 : i32
    return %arg2, %arg1 : i32, i32
  }
  func.func @transform_2(%arg0: i32, %arg1: i32, %arg2: i32) -> (i32, i32) {
    %c0_i32 = arith.constant 0 : i32
    %c0_i32_0 = arith.constant 0 : i32
    return %c0_i32, %arg1 : i32, i32
  }
  func.func @transform_3(%arg0: i32, %arg1: i32, %arg2: i32) -> (i32, i32) {
    %c0_i32 = arith.constant 0 : i32
    return %arg0, %arg1 : i32, i32
  }
}

module attributes {stable_mosaic.version = 11 : i64} {
  func.func @kernel(%arg0: i32, %arg1: i32, %arg2: i32, %arg3: memref<128x128xbf16, #tpu.memory_space<vmem>>, %arg4: memref<128x128xbf16, #tpu.memory_space<vmem>>, %arg5: memref<1x128xf32, #tpu.memory_space<vmem>>, %arg6: memref<128x128xf32, #tpu.memory_space<vmem>>, %arg7: memref<128x128xf32, #tpu.memory_space<vmem>>) attributes {dimension_semantics = [#tpu.dimension_semantics<parallel>, #tpu.dimension_semantics<parallel>, #tpu.dimension_semantics<arbitrary>], iteration_bounds = array<i64: 1, 1, 1>, scalar_prefetch = 0 : i64, scratch_operands = 1 : i64, tpu.core_type = #tpu.core_type<tc>, window_params = [{transform_indices = @transform_0, window_bounds = array<i64: 128, 128>}, {transform_indices = @transform_1, window_bounds = array<i64: 128, 128>}, {transform_indices = @transform_2, window_bounds = array<i64: 1, 128>}, {transform_indices = @transform_3, window_bounds = array<i64: 128, 128>}]} {
    %c0_i32 = arith.constant 0 : i32
    %0 = arith.cmpi eq, %arg2, %c0_i32 : i32
    %1 = arith.extui %0 : i1 to i32
    %c0_i32_0 = arith.constant 0 : i32
    %2 = arith.cmpi ne, %1, %c0_i32_0 : i32
    scf.if %2 {
      %cst_12 = arith.constant 0.000000e+00 : f32
      %17 = vector.broadcast %cst_12 : f32 to vector<128x128xf32>
      %c0_13 = arith.constant 0 : index
      %c0_14 = arith.constant 0 : index
      %18 = vector.load %arg7[%c0_13, %c0_14] : memref<128x128xf32, #tpu.memory_space<vmem>>, vector<128x128xf32>
      tpu.vector_store %arg7[%c0_13, %c0_14], %17 {strides = array<i32>} : memref<128x128xf32, #tpu.memory_space<vmem>>, vector<128x128xf32>,
    } else {
    }
    %c0 = arith.constant 0 : index
    %c0_1 = arith.constant 0 : index
    %3 = vector.load %arg3[%c0, %c0_1] : memref<128x128xbf16, #tpu.memory_space<vmem>>, vector<128x128xbf16>
    %cst = arith.constant 0.000000e+00 : bf16
    %4 = vector.broadcast %cst : bf16 to vector<128x128xbf16>
    %5 = arith.cmpf oge, %3, %4 : vector<128x128xbf16>
    %cst_2 = arith.constant 2.001950e-01 : bf16
    %6 = vector.broadcast %cst_2 : bf16 to vector<128x128xbf16>
    %7 = arith.mulf %6, %3 : vector<128x128xbf16>
    %8 = arith.select %5, %3, %7 : vector<128x128xi1>, vector<128x128xbf16>
    %c0_3 = arith.constant 0 : index
    %c0_4 = arith.constant 0 : index
    %9 = vector.load %arg7[%c0_3, %c0_4] : memref<128x128xf32, #tpu.memory_space<vmem>>, vector<128x128xf32>
    %c0_5 = arith.constant 0 : index
    %c0_6 = arith.constant 0 : index
    %10 = vector.load %arg4[%c0_5, %c0_6] : memref<128x128xbf16, #tpu.memory_space<vmem>>, vector<128x128xbf16>
    %cst_7 = arith.constant dense<0.000000e+00> : vector<128x128xf32>
    %11 = tpu.matmul %8, %10, %cst_7 {dimension_numbers = #tpu.dot_dimension_numbers<[1], [0], [0], [1], [0, 0, 1, 1], [], []>} : vector<128x128xbf16>, vector<128x128xbf16>, vector<128x128xf32> -> vector<128x128xf32>
    %12 = arith.addf %9, %11 : vector<128x128xf32>
    %c0_8 = arith.constant 0 : index
    %c0_9 = arith.constant 0 : index
    %13 = vector.load %arg7[%c0_8, %c0_9] : memref<128x128xf32, #tpu.memory_space<vmem>>, vector<128x128xf32>
    tpu.vector_store %arg7[%c0_8, %c0_9], %12 {strides = array<i32>} : memref<128x128xf32, #tpu.memory_space<vmem>>, vector<128x128xf32>,
    %c0_i32_10 = arith.constant 0 : i32
    %14 = arith.cmpi eq, %arg2, %c0_i32_10 : i32
    %15 = arith.extui %14 : i1 to i32
    %c0_i32_11 = arith.constant 0 : i32
    %16 = arith.cmpi ne, %15, %c0_i32_11 : i32
    scf.if %16 {
      %c0_12 = arith.constant 0 : index
      %c0_13 = arith.constant 0 : index
      %17 = vector.load %arg7[%c0_12, %c0_13] : memref<128x128xf32, #tpu.memory_space<vmem>>, vector<128x128xf32>
      %c0_14 = arith.constant 0 : index
      %c0_15 = arith.constant 0 : index
      %18 = vector.load %arg5[%c0_14, %c0_15] : memref<1x128xf32, #tpu.memory_space<vmem>>, vector<1x128xf32>
      %19 = vector.broadcast %18 : vector<1x128xf32> to vector<128x128xf32>
      %20 = arith.addf %17, %19 : vector<128x128xf32>
      %c0_16 = arith.constant 0 : index
      %c0_17 = arith.constant 0 : index
      %21 = vector.load %arg6[%c0_16, %c0_17] : memref<128x128xf32, #tpu.memory_space<vmem>>, vector<128x128xf32>
      tpu.vector_store %arg6[%c0_16, %c0_17], %20 {strides = array<i32>} : memref<128x128xf32, #tpu.memory_space<vmem>>, vector<128x128xf32>,
    } else {
    }
    return
  }
  func.func @transform_0(%arg0: i32, %arg1: i32, %arg2: i32) -> (i32, i32) {
    %c0_i32 = arith.constant 0 : i32
    return %arg0, %arg2 : i32, i32
  }
  func.func @transform_1(%arg0: i32, %arg1: i32, %arg2: i32) -> (i32, i32) {
    %c0_i32 = arith.constant 0 : i32
    return %arg2, %arg1 : i32, i32
  }
  func.func @transform_2(%arg0: i32, %arg1: i32, %arg2: i32) -> (i32, i32) {
    %c0_i32 = arith.constant 0 : i32
    %c0_i32_0 = arith.constant 0 : i32
    return %c0_i32, %arg1 : i32, i32
  }
  func.func @transform_3(%arg0: i32, %arg1: i32, %arg2: i32) -> (i32, i32) {
    %c0_i32 = arith.constant 0 : i32
    return %arg0, %arg1 : i32, i32
  }
}

module attributes {stable_mosaic.version = 11 : i64} {
  func.func @_stats_kernel(%arg0: i32, %arg1: memref<128x16xf32, #tpu.memory_space<vmem>>, %arg2: memref<1x16xf32, #tpu.memory_space<vmem>>, %arg3: memref<1x16xf32, #tpu.memory_space<vmem>>) attributes {dimension_semantics = [#tpu.dimension_semantics<arbitrary>], iteration_bounds = array<i64: 1>, scalar_prefetch = 0 : i64, scratch_operands = 0 : i64, tpu.core_type = #tpu.core_type<tc>, window_params = [{transform_indices = @transform_0, window_bounds = array<i64: 128, 16>}, {pipeline_mode = #tpu.pipeline_mode<synchronous>, transform_indices = @transform_1, window_bounds = array<i64: 1, 16>}, {pipeline_mode = #tpu.pipeline_mode<synchronous>, transform_indices = @transform_2, window_bounds = array<i64: 1, 16>}]} {
    %c0_i32 = arith.constant 0 : i32
    %0 = arith.cmpi eq, %arg0, %c0_i32 : i32
    %1 = arith.extui %0 : i1 to i32
    %c0_i32_0 = arith.constant 0 : i32
    %2 = arith.cmpi ne, %1, %c0_i32_0 : i32
    scf.if %2 {
      %cst_11 = arith.constant 0.000000e+00 : f32
      %15 = vector.broadcast %cst_11 : f32 to vector<1x16xf32>
      %c0_12 = arith.constant 0 : index
      %c0_13 = arith.constant 0 : index
      %16 = vector.load %arg2[%c0_12, %c0_13] : memref<1x16xf32, #tpu.memory_space<vmem>>, vector<1x16xf32>
      tpu.vector_store %arg2[%c0_12, %c0_13], %15 {strides = array<i32>} : memref<1x16xf32, #tpu.memory_space<vmem>>, vector<1x16xf32>,
      %cst_14 = arith.constant 0.000000e+00 : f32
      %17 = vector.broadcast %cst_14 : f32 to vector<1x16xf32>
      %c0_15 = arith.constant 0 : index
      %c0_16 = arith.constant 0 : index
      %18 = vector.load %arg3[%c0_15, %c0_16] : memref<1x16xf32, #tpu.memory_space<vmem>>, vector<1x16xf32>
      tpu.vector_store %arg3[%c0_15, %c0_16], %17 {strides = array<i32>} : memref<1x16xf32, #tpu.memory_space<vmem>>, vector<1x16xf32>,
    } else {
    }
    %c0 = arith.constant 0 : index
    %c0_1 = arith.constant 0 : index
    %3 = vector.load %arg1[%c0, %c0_1] : memref<128x16xf32, #tpu.memory_space<vmem>>, vector<128x16xf32>
    %c0_2 = arith.constant 0 : index
    %c0_3 = arith.constant 0 : index
    %4 = vector.load %arg2[%c0_2, %c0_3] : memref<1x16xf32, #tpu.memory_space<vmem>>, vector<1x16xf32>
    %cst = arith.constant dense<0.000000e+00> : vector<16xf32>
    %5 = vector.multi_reduction <add>, %3, %cst [0] : vector<128x16xf32> to vector<16xf32>
    %6 = vector.shape_cast %5 : vector<16xf32> to vector<1x16xf32>
    %7 = arith.addf %4, %6 : vector<1x16xf32>
    %c0_4 = arith.constant 0 : index
    %c0_5 = arith.constant 0 : index
    %8 = vector.load %arg2[%c0_4, %c0_5] : memref<1x16xf32, #tpu.memory_space<vmem>>, vector<1x16xf32>
    tpu.vector_store %arg2[%c0_4, %c0_5], %7 {strides = array<i32>} : memref<1x16xf32, #tpu.memory_space<vmem>>, vector<1x16xf32>,
    %c0_6 = arith.constant 0 : index
    %c0_7 = arith.constant 0 : index
    %9 = vector.load %arg3[%c0_6, %c0_7] : memref<1x16xf32, #tpu.memory_space<vmem>>, vector<1x16xf32>
    %10 = arith.mulf %3, %3 : vector<128x16xf32>
    %cst_8 = arith.constant dense<0.000000e+00> : vector<16xf32>
    %11 = vector.multi_reduction <add>, %10, %cst_8 [0] : vector<128x16xf32> to vector<16xf32>
    %12 = vector.shape_cast %11 : vector<16xf32> to vector<1x16xf32>
    %13 = arith.addf %9, %12 : vector<1x16xf32>
    %c0_9 = arith.constant 0 : index
    %c0_10 = arith.constant 0 : index
    %14 = vector.load %arg3[%c0_9, %c0_10] : memref<1x16xf32, #tpu.memory_space<vmem>>, vector<1x16xf32>
    tpu.vector_store %arg3[%c0_9, %c0_10], %13 {strides = array<i32>} : memref<1x16xf32, #tpu.memory_space<vmem>>, vector<1x16xf32>,
    return
  }
  func.func @transform_0(%arg0: i32) -> (i32, i32) {
    %c0_i32 = arith.constant 0 : i32
    %c0_i32_0 = arith.constant 0 : i32
    return %arg0, %c0_i32 : i32, i32
  }
  func.func @transform_1(%arg0: i32) -> (i32, i32) {
    %c0_i32 = arith.constant 0 : i32
    %c0_i32_0 = arith.constant 0 : i32
    %c0_i32_1 = arith.constant 0 : i32
    return %c0_i32, %c0_i32_0 : i32, i32
  }
  func.func @transform_2(%arg0: i32) -> (i32, i32) {
    %c0_i32 = arith.constant 0 : i32
    %c0_i32_0 = arith.constant 0 : i32
    %c0_i32_1 = arith.constant 0 : i32
    return %c0_i32, %c0_i32_0 : i32, i32
  }
}

module attributes {stable_mosaic.version = 11 : i64} {
  func.func @_affine_kernel(%arg0: i32, %arg1: memref<128x16xf32, #tpu.memory_space<vmem>>, %arg2: memref<1x16xf32, #tpu.memory_space<vmem>>, %arg3: memref<1x16xf32, #tpu.memory_space<vmem>>, %arg4: memref<128x16xf32, #tpu.memory_space<vmem>>) attributes {dimension_semantics = [#tpu.dimension_semantics<parallel>], iteration_bounds = array<i64: 1>, scalar_prefetch = 0 : i64, scratch_operands = 0 : i64, tpu.core_type = #tpu.core_type<tc>, window_params = [{transform_indices = @transform_0, window_bounds = array<i64: 128, 16>}, {pipeline_mode = #tpu.pipeline_mode<synchronous>, transform_indices = @transform_1, window_bounds = array<i64: 1, 16>}, {pipeline_mode = #tpu.pipeline_mode<synchronous>, transform_indices = @transform_2, window_bounds = array<i64: 1, 16>}, {transform_indices = @transform_3, window_bounds = array<i64: 128, 16>}]} {
    %c0 = arith.constant 0 : index
    %c0_0 = arith.constant 0 : index
    %0 = vector.load %arg1[%c0, %c0_0] : memref<128x16xf32, #tpu.memory_space<vmem>>, vector<128x16xf32>
    %c0_1 = arith.constant 0 : index
    %c0_2 = arith.constant 0 : index
    %1 = vector.load %arg2[%c0_1, %c0_2] : memref<1x16xf32, #tpu.memory_space<vmem>>, vector<1x16xf32>
    %2 = vector.broadcast %1 : vector<1x16xf32> to vector<128x16xf32>
    %3 = arith.mulf %0, %2 : vector<128x16xf32>
    %c0_3 = arith.constant 0 : index
    %c0_4 = arith.constant 0 : index
    %4 = vector.load %arg3[%c0_3, %c0_4] : memref<1x16xf32, #tpu.memory_space<vmem>>, vector<1x16xf32>
    %5 = vector.broadcast %4 : vector<1x16xf32> to vector<128x16xf32>
    %6 = arith.addf %3, %5 : vector<128x16xf32>
    %c0_5 = arith.constant 0 : index
    %c0_6 = arith.constant 0 : index
    %7 = vector.load %arg4[%c0_5, %c0_6] : memref<128x16xf32, #tpu.memory_space<vmem>>, vector<128x16xf32>
    tpu.vector_store %arg4[%c0_5, %c0_6], %6 {strides = array<i32>} : memref<128x16xf32, #tpu.memory_space<vmem>>, vector<128x16xf32>,
    return
  }
  func.func @transform_0(%arg0: i32) -> (i32, i32) {
    %c0_i32 = arith.constant 0 : i32
    %c0_i32_0 = arith.constant 0 : i32
    return %arg0, %c0_i32 : i32, i32
  }
  func.func @transform_1(%arg0: i32) -> (i32, i32) {
    %c0_i32 = arith.constant 0 : i32
    %c0_i32_0 = arith.constant 0 : i32
    %c0_i32_1 = arith.constant 0 : i32
    return %c0_i32, %c0_i32_0 : i32, i32
  }
  func.func @transform_2(%arg0: i32) -> (i32, i32) {
    %c0_i32 = arith.constant 0 : i32
    %c0_i32_0 = arith.constant 0 : i32
    %c0_i32_1 = arith.constant 0 : i32
    return %c0_i32, %c0_i32_0 : i32, i32
  }
  func.func @transform_3(%arg0: i32) -> (i32, i32) {
    %c0_i32 = arith.constant 0 : i32
    %c0_i32_0 = arith.constant 0 : i32
    return %arg0, %c0_i32 : i32, i32
  }
}

module attributes {stable_mosaic.version = 11 : i64} {
  func.func @kernel(%arg0: i32, %arg1: i32, %arg2: i32, %arg3: memref<32x256xbf16, #tpu.memory_space<vmem>>, %arg4: memref<256x128xbf16, #tpu.memory_space<vmem>>, %arg5: memref<1x128xf32, #tpu.memory_space<vmem>>, %arg6: memref<32x128xf32, #tpu.memory_space<vmem>>, %arg7: memref<32x128xf32, #tpu.memory_space<vmem>>) attributes {dimension_semantics = [#tpu.dimension_semantics<parallel>, #tpu.dimension_semantics<parallel>, #tpu.dimension_semantics<arbitrary>], iteration_bounds = array<i64: 1, 1, 1>, scalar_prefetch = 0 : i64, scratch_operands = 1 : i64, tpu.core_type = #tpu.core_type<tc>, window_params = [{transform_indices = @transform_0, window_bounds = array<i64: 32, 256>}, {transform_indices = @transform_1, window_bounds = array<i64: 256, 128>}, {transform_indices = @transform_2, window_bounds = array<i64: 1, 128>}, {transform_indices = @transform_3, window_bounds = array<i64: 32, 128>}]} {
    %c0_i32 = arith.constant 0 : i32
    %0 = arith.cmpi eq, %arg2, %c0_i32 : i32
    %1 = arith.extui %0 : i1 to i32
    %c0_i32_0 = arith.constant 0 : i32
    %2 = arith.cmpi ne, %1, %c0_i32_0 : i32
    scf.if %2 {
      %cst_12 = arith.constant 0.000000e+00 : f32
      %17 = vector.broadcast %cst_12 : f32 to vector<32x128xf32>
      %c0_13 = arith.constant 0 : index
      %c0_14 = arith.constant 0 : index
      %18 = vector.load %arg7[%c0_13, %c0_14] : memref<32x128xf32, #tpu.memory_space<vmem>>, vector<32x128xf32>
      tpu.vector_store %arg7[%c0_13, %c0_14], %17 {strides = array<i32>} : memref<32x128xf32, #tpu.memory_space<vmem>>, vector<32x128xf32>,
    } else {
    }
    %c0 = arith.constant 0 : index
    %c0_1 = arith.constant 0 : index
    %3 = vector.load %arg3[%c0, %c0_1] : memref<32x256xbf16, #tpu.memory_space<vmem>>, vector<32x256xbf16>
    %cst = arith.constant 0.000000e+00 : bf16
    %4 = vector.broadcast %cst : bf16 to vector<32x256xbf16>
    %5 = arith.cmpf oge, %3, %4 : vector<32x256xbf16>
    %cst_2 = arith.constant 2.001950e-01 : bf16
    %6 = vector.broadcast %cst_2 : bf16 to vector<32x256xbf16>
    %7 = arith.mulf %6, %3 : vector<32x256xbf16>
    %8 = arith.select %5, %3, %7 : vector<32x256xi1>, vector<32x256xbf16>
    %c0_3 = arith.constant 0 : index
    %c0_4 = arith.constant 0 : index
    %9 = vector.load %arg7[%c0_3, %c0_4] : memref<32x128xf32, #tpu.memory_space<vmem>>, vector<32x128xf32>
    %c0_5 = arith.constant 0 : index
    %c0_6 = arith.constant 0 : index
    %10 = vector.load %arg4[%c0_5, %c0_6] : memref<256x128xbf16, #tpu.memory_space<vmem>>, vector<256x128xbf16>
    %cst_7 = arith.constant dense<0.000000e+00> : vector<32x128xf32>
    %11 = tpu.matmul %8, %10, %cst_7 {dimension_numbers = #tpu.dot_dimension_numbers<[1], [0], [0], [1], [0, 0, 1, 1], [], []>} : vector<32x256xbf16>, vector<256x128xbf16>, vector<32x128xf32> -> vector<32x128xf32>
    %12 = arith.addf %9, %11 : vector<32x128xf32>
    %c0_8 = arith.constant 0 : index
    %c0_9 = arith.constant 0 : index
    %13 = vector.load %arg7[%c0_8, %c0_9] : memref<32x128xf32, #tpu.memory_space<vmem>>, vector<32x128xf32>
    tpu.vector_store %arg7[%c0_8, %c0_9], %12 {strides = array<i32>} : memref<32x128xf32, #tpu.memory_space<vmem>>, vector<32x128xf32>,
    %c0_i32_10 = arith.constant 0 : i32
    %14 = arith.cmpi eq, %arg2, %c0_i32_10 : i32
    %15 = arith.extui %14 : i1 to i32
    %c0_i32_11 = arith.constant 0 : i32
    %16 = arith.cmpi ne, %15, %c0_i32_11 : i32
    scf.if %16 {
      %c0_12 = arith.constant 0 : index
      %c0_13 = arith.constant 0 : index
      %17 = vector.load %arg7[%c0_12, %c0_13] : memref<32x128xf32, #tpu.memory_space<vmem>>, vector<32x128xf32>
      %c0_14 = arith.constant 0 : index
      %c0_15 = arith.constant 0 : index
      %18 = vector.load %arg5[%c0_14, %c0_15] : memref<1x128xf32, #tpu.memory_space<vmem>>, vector<1x128xf32>
      %19 = vector.broadcast %18 : vector<1x128xf32> to vector<32x128xf32>
      %20 = arith.addf %17, %19 : vector<32x128xf32>
      %c0_16 = arith.constant 0 : index
      %c0_17 = arith.constant 0 : index
      %21 = vector.load %arg6[%c0_16, %c0_17] : memref<32x128xf32, #tpu.memory_space<vmem>>, vector<32x128xf32>
      tpu.vector_store %arg6[%c0_16, %c0_17], %20 {strides = array<i32>} : memref<32x128xf32, #tpu.memory_space<vmem>>, vector<32x128xf32>,
    } else {
    }
    return
  }
  func.func @transform_0(%arg0: i32, %arg1: i32, %arg2: i32) -> (i32, i32) {
    %c0_i32 = arith.constant 0 : i32
    return %arg0, %arg2 : i32, i32
  }
  func.func @transform_1(%arg0: i32, %arg1: i32, %arg2: i32) -> (i32, i32) {
    %c0_i32 = arith.constant 0 : i32
    return %arg2, %arg1 : i32, i32
  }
  func.func @transform_2(%arg0: i32, %arg1: i32, %arg2: i32) -> (i32, i32) {
    %c0_i32 = arith.constant 0 : i32
    %c0_i32_0 = arith.constant 0 : i32
    return %c0_i32, %arg1 : i32, i32
  }
  func.func @transform_3(%arg0: i32, %arg1: i32, %arg2: i32) -> (i32, i32) {
    %c0_i32 = arith.constant 0 : i32
    return %arg0, %arg1 : i32, i32
  }
}

module attributes {stable_mosaic.version = 11 : i64} {
  func.func @_stats_kernel(%arg0: i32, %arg1: memref<32x32xf32, #tpu.memory_space<vmem>>, %arg2: memref<1x32xf32, #tpu.memory_space<vmem>>, %arg3: memref<1x32xf32, #tpu.memory_space<vmem>>) attributes {dimension_semantics = [#tpu.dimension_semantics<arbitrary>], iteration_bounds = array<i64: 1>, scalar_prefetch = 0 : i64, scratch_operands = 0 : i64, tpu.core_type = #tpu.core_type<tc>, window_params = [{transform_indices = @transform_0, window_bounds = array<i64: 32, 32>}, {pipeline_mode = #tpu.pipeline_mode<synchronous>, transform_indices = @transform_1, window_bounds = array<i64: 1, 32>}, {pipeline_mode = #tpu.pipeline_mode<synchronous>, transform_indices = @transform_2, window_bounds = array<i64: 1, 32>}]} {
    %c0_i32 = arith.constant 0 : i32
    %0 = arith.cmpi eq, %arg0, %c0_i32 : i32
    %1 = arith.extui %0 : i1 to i32
    %c0_i32_0 = arith.constant 0 : i32
    %2 = arith.cmpi ne, %1, %c0_i32_0 : i32
    scf.if %2 {
      %cst_11 = arith.constant 0.000000e+00 : f32
      %15 = vector.broadcast %cst_11 : f32 to vector<1x32xf32>
      %c0_12 = arith.constant 0 : index
      %c0_13 = arith.constant 0 : index
      %16 = vector.load %arg2[%c0_12, %c0_13] : memref<1x32xf32, #tpu.memory_space<vmem>>, vector<1x32xf32>
      tpu.vector_store %arg2[%c0_12, %c0_13], %15 {strides = array<i32>} : memref<1x32xf32, #tpu.memory_space<vmem>>, vector<1x32xf32>,
      %cst_14 = arith.constant 0.000000e+00 : f32
      %17 = vector.broadcast %cst_14 : f32 to vector<1x32xf32>
      %c0_15 = arith.constant 0 : index
      %c0_16 = arith.constant 0 : index
      %18 = vector.load %arg3[%c0_15, %c0_16] : memref<1x32xf32, #tpu.memory_space<vmem>>, vector<1x32xf32>
      tpu.vector_store %arg3[%c0_15, %c0_16], %17 {strides = array<i32>} : memref<1x32xf32, #tpu.memory_space<vmem>>, vector<1x32xf32>,
    } else {
    }
    %c0 = arith.constant 0 : index
    %c0_1 = arith.constant 0 : index
    %3 = vector.load %arg1[%c0, %c0_1] : memref<32x32xf32, #tpu.memory_space<vmem>>, vector<32x32xf32>
    %c0_2 = arith.constant 0 : index
    %c0_3 = arith.constant 0 : index
    %4 = vector.load %arg2[%c0_2, %c0_3] : memref<1x32xf32, #tpu.memory_space<vmem>>, vector<1x32xf32>
    %cst = arith.constant dense<0.000000e+00> : vector<32xf32>
    %5 = vector.multi_reduction <add>, %3, %cst [0] : vector<32x32xf32> to vector<32xf32>
    %6 = vector.shape_cast %5 : vector<32xf32> to vector<1x32xf32>
    %7 = arith.addf %4, %6 : vector<1x32xf32>
    %c0_4 = arith.constant 0 : index
    %c0_5 = arith.constant 0 : index
    %8 = vector.load %arg2[%c0_4, %c0_5] : memref<1x32xf32, #tpu.memory_space<vmem>>, vector<1x32xf32>
    tpu.vector_store %arg2[%c0_4, %c0_5], %7 {strides = array<i32>} : memref<1x32xf32, #tpu.memory_space<vmem>>, vector<1x32xf32>,
    %c0_6 = arith.constant 0 : index
    %c0_7 = arith.constant 0 : index
    %9 = vector.load %arg3[%c0_6, %c0_7] : memref<1x32xf32, #tpu.memory_space<vmem>>, vector<1x32xf32>
    %10 = arith.mulf %3, %3 : vector<32x32xf32>
    %cst_8 = arith.constant dense<0.000000e+00> : vector<32xf32>
    %11 = vector.multi_reduction <add>, %10, %cst_8 [0] : vector<32x32xf32> to vector<32xf32>
    %12 = vector.shape_cast %11 : vector<32xf32> to vector<1x32xf32>
    %13 = arith.addf %9, %12 : vector<1x32xf32>
    %c0_9 = arith.constant 0 : index
    %c0_10 = arith.constant 0 : index
    %14 = vector.load %arg3[%c0_9, %c0_10] : memref<1x32xf32, #tpu.memory_space<vmem>>, vector<1x32xf32>
    tpu.vector_store %arg3[%c0_9, %c0_10], %13 {strides = array<i32>} : memref<1x32xf32, #tpu.memory_space<vmem>>, vector<1x32xf32>,
    return
  }
  func.func @transform_0(%arg0: i32) -> (i32, i32) {
    %c0_i32 = arith.constant 0 : i32
    %c0_i32_0 = arith.constant 0 : i32
    return %arg0, %c0_i32 : i32, i32
  }
  func.func @transform_1(%arg0: i32) -> (i32, i32) {
    %c0_i32 = arith.constant 0 : i32
    %c0_i32_0 = arith.constant 0 : i32
    %c0_i32_1 = arith.constant 0 : i32
    return %c0_i32, %c0_i32_0 : i32, i32
  }
  func.func @transform_2(%arg0: i32) -> (i32, i32) {
    %c0_i32 = arith.constant 0 : i32
    %c0_i32_0 = arith.constant 0 : i32
    %c0_i32_1 = arith.constant 0 : i32
    return %c0_i32, %c0_i32_0 : i32, i32
  }
}

module attributes {stable_mosaic.version = 11 : i64} {
  func.func @_affine_kernel(%arg0: i32, %arg1: memref<32x32xf32, #tpu.memory_space<vmem>>, %arg2: memref<1x32xf32, #tpu.memory_space<vmem>>, %arg3: memref<1x32xf32, #tpu.memory_space<vmem>>, %arg4: memref<32x32xf32, #tpu.memory_space<vmem>>) attributes {dimension_semantics = [#tpu.dimension_semantics<parallel>], iteration_bounds = array<i64: 1>, scalar_prefetch = 0 : i64, scratch_operands = 0 : i64, tpu.core_type = #tpu.core_type<tc>, window_params = [{transform_indices = @transform_0, window_bounds = array<i64: 32, 32>}, {pipeline_mode = #tpu.pipeline_mode<synchronous>, transform_indices = @transform_1, window_bounds = array<i64: 1, 32>}, {pipeline_mode = #tpu.pipeline_mode<synchronous>, transform_indices = @transform_2, window_bounds = array<i64: 1, 32>}, {transform_indices = @transform_3, window_bounds = array<i64: 32, 32>}]} {
    %c0 = arith.constant 0 : index
    %c0_0 = arith.constant 0 : index
    %0 = vector.load %arg1[%c0, %c0_0] : memref<32x32xf32, #tpu.memory_space<vmem>>, vector<32x32xf32>
    %c0_1 = arith.constant 0 : index
    %c0_2 = arith.constant 0 : index
    %1 = vector.load %arg2[%c0_1, %c0_2] : memref<1x32xf32, #tpu.memory_space<vmem>>, vector<1x32xf32>
    %2 = vector.broadcast %1 : vector<1x32xf32> to vector<32x32xf32>
    %3 = arith.mulf %0, %2 : vector<32x32xf32>
    %c0_3 = arith.constant 0 : index
    %c0_4 = arith.constant 0 : index
    %4 = vector.load %arg3[%c0_3, %c0_4] : memref<1x32xf32, #tpu.memory_space<vmem>>, vector<1x32xf32>
    %5 = vector.broadcast %4 : vector<1x32xf32> to vector<32x32xf32>
    %6 = arith.addf %3, %5 : vector<32x32xf32>
    %c0_5 = arith.constant 0 : index
    %c0_6 = arith.constant 0 : index
    %7 = vector.load %arg4[%c0_5, %c0_6] : memref<32x32xf32, #tpu.memory_space<vmem>>, vector<32x32xf32>
    tpu.vector_store %arg4[%c0_5, %c0_6], %6 {strides = array<i32>} : memref<32x32xf32, #tpu.memory_space<vmem>>, vector<32x32xf32>,
    return
  }
  func.func @transform_0(%arg0: i32) -> (i32, i32) {
    %c0_i32 = arith.constant 0 : i32
    %c0_i32_0 = arith.constant 0 : i32
    return %arg0, %c0_i32 : i32, i32
  }
  func.func @transform_1(%arg0: i32) -> (i32, i32) {
    %c0_i32 = arith.constant 0 : i32
    %c0_i32_0 = arith.constant 0 : i32
    %c0_i32_1 = arith.constant 0 : i32
    return %c0_i32, %c0_i32_0 : i32, i32
  }
  func.func @transform_2(%arg0: i32) -> (i32, i32) {
    %c0_i32 = arith.constant 0 : i32
    %c0_i32_0 = arith.constant 0 : i32
    %c0_i32_1 = arith.constant 0 : i32
    return %c0_i32, %c0_i32_0 : i32, i32
  }
  func.func @transform_3(%arg0: i32) -> (i32, i32) {
    %c0_i32 = arith.constant 0 : i32
    %c0_i32_0 = arith.constant 0 : i32
    return %arg0, %c0_i32 : i32, i32
  }
}

module attributes {stable_mosaic.version = 11 : i64} {
  func.func @kernel(%arg0: i32, %arg1: i32, %arg2: i32, %arg3: memref<16x512xbf16, #tpu.memory_space<vmem>>, %arg4: memref<512x128xbf16, #tpu.memory_space<vmem>>, %arg5: memref<1x128xf32, #tpu.memory_space<vmem>>, %arg6: memref<16x128xf32, #tpu.memory_space<vmem>>, %arg7: memref<16x128xf32, #tpu.memory_space<vmem>>) attributes {dimension_semantics = [#tpu.dimension_semantics<parallel>, #tpu.dimension_semantics<parallel>, #tpu.dimension_semantics<arbitrary>], iteration_bounds = array<i64: 1, 1, 1>, scalar_prefetch = 0 : i64, scratch_operands = 1 : i64, tpu.core_type = #tpu.core_type<tc>, window_params = [{transform_indices = @transform_0, window_bounds = array<i64: 16, 512>}, {transform_indices = @transform_1, window_bounds = array<i64: 512, 128>}, {transform_indices = @transform_2, window_bounds = array<i64: 1, 128>}, {transform_indices = @transform_3, window_bounds = array<i64: 16, 128>}]} {
    %c0_i32 = arith.constant 0 : i32
    %0 = arith.cmpi eq, %arg2, %c0_i32 : i32
    %1 = arith.extui %0 : i1 to i32
    %c0_i32_0 = arith.constant 0 : i32
    %2 = arith.cmpi ne, %1, %c0_i32_0 : i32
    scf.if %2 {
      %cst_12 = arith.constant 0.000000e+00 : f32
      %17 = vector.broadcast %cst_12 : f32 to vector<16x128xf32>
      %c0_13 = arith.constant 0 : index
      %c0_14 = arith.constant 0 : index
      %18 = vector.load %arg7[%c0_13, %c0_14] : memref<16x128xf32, #tpu.memory_space<vmem>>, vector<16x128xf32>
      tpu.vector_store %arg7[%c0_13, %c0_14], %17 {strides = array<i32>} : memref<16x128xf32, #tpu.memory_space<vmem>>, vector<16x128xf32>,
    } else {
    }
    %c0 = arith.constant 0 : index
    %c0_1 = arith.constant 0 : index
    %3 = vector.load %arg3[%c0, %c0_1] : memref<16x512xbf16, #tpu.memory_space<vmem>>, vector<16x512xbf16>
    %cst = arith.constant 0.000000e+00 : bf16
    %4 = vector.broadcast %cst : bf16 to vector<16x512xbf16>
    %5 = arith.cmpf oge, %3, %4 : vector<16x512xbf16>
    %cst_2 = arith.constant 2.001950e-01 : bf16
    %6 = vector.broadcast %cst_2 : bf16 to vector<16x512xbf16>
    %7 = arith.mulf %6, %3 : vector<16x512xbf16>
    %8 = arith.select %5, %3, %7 : vector<16x512xi1>, vector<16x512xbf16>
    %c0_3 = arith.constant 0 : index
    %c0_4 = arith.constant 0 : index
    %9 = vector.load %arg7[%c0_3, %c0_4] : memref<16x128xf32, #tpu.memory_space<vmem>>, vector<16x128xf32>
    %c0_5 = arith.constant 0 : index
    %c0_6 = arith.constant 0 : index
    %10 = vector.load %arg4[%c0_5, %c0_6] : memref<512x128xbf16, #tpu.memory_space<vmem>>, vector<512x128xbf16>
    %cst_7 = arith.constant dense<0.000000e+00> : vector<16x128xf32>
    %11 = tpu.matmul %8, %10, %cst_7 {dimension_numbers = #tpu.dot_dimension_numbers<[1], [0], [0], [1], [0, 0, 1, 1], [], []>} : vector<16x512xbf16>, vector<512x128xbf16>, vector<16x128xf32> -> vector<16x128xf32>
    %12 = arith.addf %9, %11 : vector<16x128xf32>
    %c0_8 = arith.constant 0 : index
    %c0_9 = arith.constant 0 : index
    %13 = vector.load %arg7[%c0_8, %c0_9] : memref<16x128xf32, #tpu.memory_space<vmem>>, vector<16x128xf32>
    tpu.vector_store %arg7[%c0_8, %c0_9], %12 {strides = array<i32>} : memref<16x128xf32, #tpu.memory_space<vmem>>, vector<16x128xf32>,
    %c0_i32_10 = arith.constant 0 : i32
    %14 = arith.cmpi eq, %arg2, %c0_i32_10 : i32
    %15 = arith.extui %14 : i1 to i32
    %c0_i32_11 = arith.constant 0 : i32
    %16 = arith.cmpi ne, %15, %c0_i32_11 : i32
    scf.if %16 {
      %c0_12 = arith.constant 0 : index
      %c0_13 = arith.constant 0 : index
      %17 = vector.load %arg7[%c0_12, %c0_13] : memref<16x128xf32, #tpu.memory_space<vmem>>, vector<16x128xf32>
      %c0_14 = arith.constant 0 : index
      %c0_15 = arith.constant 0 : index
      %18 = vector.load %arg5[%c0_14, %c0_15] : memref<1x128xf32, #tpu.memory_space<vmem>>, vector<1x128xf32>
      %19 = vector.broadcast %18 : vector<1x128xf32> to vector<16x128xf32>
      %20 = arith.addf %17, %19 : vector<16x128xf32>
      %c0_16 = arith.constant 0 : index
      %c0_17 = arith.constant 0 : index
      %21 = vector.load %arg6[%c0_16, %c0_17] : memref<16x128xf32, #tpu.memory_space<vmem>>, vector<16x128xf32>
      tpu.vector_store %arg6[%c0_16, %c0_17], %20 {strides = array<i32>} : memref<16x128xf32, #tpu.memory_space<vmem>>, vector<16x128xf32>,
    } else {
    }
    return
  }
  func.func @transform_0(%arg0: i32, %arg1: i32, %arg2: i32) -> (i32, i32) {
    %c0_i32 = arith.constant 0 : i32
    return %arg0, %arg2 : i32, i32
  }
  func.func @transform_1(%arg0: i32, %arg1: i32, %arg2: i32) -> (i32, i32) {
    %c0_i32 = arith.constant 0 : i32
    return %arg2, %arg1 : i32, i32
  }
  func.func @transform_2(%arg0: i32, %arg1: i32, %arg2: i32) -> (i32, i32) {
    %c0_i32 = arith.constant 0 : i32
    %c0_i32_0 = arith.constant 0 : i32
    return %c0_i32, %arg1 : i32, i32
  }
  func.func @transform_3(%arg0: i32, %arg1: i32, %arg2: i32) -> (i32, i32) {
    %c0_i32 = arith.constant 0 : i32
    return %arg0, %arg1 : i32, i32
  }
}

module attributes {stable_mosaic.version = 11 : i64} {
  func.func @_affine_kernel(%arg0: i32, %arg1: memref<8x64xf32, #tpu.memory_space<vmem>>, %arg2: memref<1x64xf32, #tpu.memory_space<vmem>>, %arg3: memref<1x64xf32, #tpu.memory_space<vmem>>, %arg4: memref<8x64xf32, #tpu.memory_space<vmem>>) attributes {dimension_semantics = [#tpu.dimension_semantics<parallel>], iteration_bounds = array<i64: 1>, scalar_prefetch = 0 : i64, scratch_operands = 0 : i64, tpu.core_type = #tpu.core_type<tc>, window_params = [{transform_indices = @transform_0, window_bounds = array<i64: 8, 64>}, {pipeline_mode = #tpu.pipeline_mode<synchronous>, transform_indices = @transform_1, window_bounds = array<i64: 1, 64>}, {pipeline_mode = #tpu.pipeline_mode<synchronous>, transform_indices = @transform_2, window_bounds = array<i64: 1, 64>}, {transform_indices = @transform_3, window_bounds = array<i64: 8, 64>}]} {
    %c0 = arith.constant 0 : index
    %c0_0 = arith.constant 0 : index
    %0 = vector.load %arg1[%c0, %c0_0] : memref<8x64xf32, #tpu.memory_space<vmem>>, vector<8x64xf32>
    %c0_1 = arith.constant 0 : index
    %c0_2 = arith.constant 0 : index
    %1 = vector.load %arg2[%c0_1, %c0_2] : memref<1x64xf32, #tpu.memory_space<vmem>>, vector<1x64xf32>
    %2 = vector.broadcast %1 : vector<1x64xf32> to vector<8x64xf32>
    %3 = arith.mulf %0, %2 : vector<8x64xf32>
    %c0_3 = arith.constant 0 : index
    %c0_4 = arith.constant 0 : index
    %4 = vector.load %arg3[%c0_3, %c0_4] : memref<1x64xf32, #tpu.memory_space<vmem>>, vector<1x64xf32>
    %5 = vector.broadcast %4 : vector<1x64xf32> to vector<8x64xf32>
    %6 = arith.addf %3, %5 : vector<8x64xf32>
    %c0_5 = arith.constant 0 : index
    %c0_6 = arith.constant 0 : index
    %7 = vector.load %arg4[%c0_5, %c0_6] : memref<8x64xf32, #tpu.memory_space<vmem>>, vector<8x64xf32>
    tpu.vector_store %arg4[%c0_5, %c0_6], %6 {strides = array<i32>} : memref<8x64xf32, #tpu.memory_space<vmem>>, vector<8x64xf32>,
    return
  }
  func.func @transform_0(%arg0: i32) -> (i32, i32) {
    %c0_i32 = arith.constant 0 : i32
    %c0_i32_0 = arith.constant 0 : i32
    return %arg0, %c0_i32 : i32, i32
  }
  func.func @transform_1(%arg0: i32) -> (i32, i32) {
    %c0_i32 = arith.constant 0 : i32
    %c0_i32_0 = arith.constant 0 : i32
    %c0_i32_1 = arith.constant 0 : i32
    return %c0_i32, %c0_i32_0 : i32, i32
  }
  func.func @transform_2(%arg0: i32) -> (i32, i32) {
    %c0_i32 = arith.constant 0 : i32
    %c0_i32_0 = arith.constant 0 : i32
    %c0_i32_1 = arith.constant 0 : i32
    return %c0_i32, %c0_i32_0 : i32, i32
  }
  func.func @transform_3(%arg0: i32) -> (i32, i32) {
    %c0_i32 = arith.constant 0 : i32
    %c0_i32_0 = arith.constant 0 : i32
    return %arg0, %c0_i32 : i32, i32
  }
}

module attributes {stable_mosaic.version = 11 : i64} {
  func.func @_stats_kernel(%arg0: i32, %arg1: memref<8x64xf32, #tpu.memory_space<vmem>>, %arg2: memref<1x64xf32, #tpu.memory_space<vmem>>, %arg3: memref<1x64xf32, #tpu.memory_space<vmem>>) attributes {dimension_semantics = [#tpu.dimension_semantics<arbitrary>], iteration_bounds = array<i64: 1>, scalar_prefetch = 0 : i64, scratch_operands = 0 : i64, tpu.core_type = #tpu.core_type<tc>, window_params = [{transform_indices = @transform_0, window_bounds = array<i64: 8, 64>}, {pipeline_mode = #tpu.pipeline_mode<synchronous>, transform_indices = @transform_1, window_bounds = array<i64: 1, 64>}, {pipeline_mode = #tpu.pipeline_mode<synchronous>, transform_indices = @transform_2, window_bounds = array<i64: 1, 64>}]} {
    %c0_i32 = arith.constant 0 : i32
    %0 = arith.cmpi eq, %arg0, %c0_i32 : i32
    %1 = arith.extui %0 : i1 to i32
    %c0_i32_0 = arith.constant 0 : i32
    %2 = arith.cmpi ne, %1, %c0_i32_0 : i32
    scf.if %2 {
      %cst_11 = arith.constant 0.000000e+00 : f32
      %15 = vector.broadcast %cst_11 : f32 to vector<1x64xf32>
      %c0_12 = arith.constant 0 : index
      %c0_13 = arith.constant 0 : index
      %16 = vector.load %arg2[%c0_12, %c0_13] : memref<1x64xf32, #tpu.memory_space<vmem>>, vector<1x64xf32>
      tpu.vector_store %arg2[%c0_12, %c0_13], %15 {strides = array<i32>} : memref<1x64xf32, #tpu.memory_space<vmem>>, vector<1x64xf32>,
      %cst_14 = arith.constant 0.000000e+00 : f32
      %17 = vector.broadcast %cst_14 : f32 to vector<1x64xf32>
      %c0_15 = arith.constant 0 : index
      %c0_16 = arith.constant 0 : index
      %18 = vector.load %arg3[%c0_15, %c0_16] : memref<1x64xf32, #tpu.memory_space<vmem>>, vector<1x64xf32>
      tpu.vector_store %arg3[%c0_15, %c0_16], %17 {strides = array<i32>} : memref<1x64xf32, #tpu.memory_space<vmem>>, vector<1x64xf32>,
    } else {
    }
    %c0 = arith.constant 0 : index
    %c0_1 = arith.constant 0 : index
    %3 = vector.load %arg1[%c0, %c0_1] : memref<8x64xf32, #tpu.memory_space<vmem>>, vector<8x64xf32>
    %c0_2 = arith.constant 0 : index
    %c0_3 = arith.constant 0 : index
    %4 = vector.load %arg2[%c0_2, %c0_3] : memref<1x64xf32, #tpu.memory_space<vmem>>, vector<1x64xf32>
    %cst = arith.constant dense<0.000000e+00> : vector<64xf32>
    %5 = vector.multi_reduction <add>, %3, %cst [0] : vector<8x64xf32> to vector<64xf32>
    %6 = vector.shape_cast %5 : vector<64xf32> to vector<1x64xf32>
    %7 = arith.addf %4, %6 : vector<1x64xf32>
    %c0_4 = arith.constant 0 : index
    %c0_5 = arith.constant 0 : index
    %8 = vector.load %arg2[%c0_4, %c0_5] : memref<1x64xf32, #tpu.memory_space<vmem>>, vector<1x64xf32>
    tpu.vector_store %arg2[%c0_4, %c0_5], %7 {strides = array<i32>} : memref<1x64xf32, #tpu.memory_space<vmem>>, vector<1x64xf32>,
    %c0_6 = arith.constant 0 : index
    %c0_7 = arith.constant 0 : index
    %9 = vector.load %arg3[%c0_6, %c0_7] : memref<1x64xf32, #tpu.memory_space<vmem>>, vector<1x64xf32>
    %10 = arith.mulf %3, %3 : vector<8x64xf32>
    %cst_8 = arith.constant dense<0.000000e+00> : vector<64xf32>
    %11 = vector.multi_reduction <add>, %10, %cst_8 [0] : vector<8x64xf32> to vector<64xf32>
    %12 = vector.shape_cast %11 : vector<64xf32> to vector<1x64xf32>
    %13 = arith.addf %9, %12 : vector<1x64xf32>
    %c0_9 = arith.constant 0 : index
    %c0_10 = arith.constant 0 : index
    %14 = vector.load %arg3[%c0_9, %c0_10] : memref<1x64xf32, #tpu.memory_space<vmem>>, vector<1x64xf32>
    tpu.vector_store %arg3[%c0_9, %c0_10], %13 {strides = array<i32>} : memref<1x64xf32, #tpu.memory_space<vmem>>, vector<1x64xf32>,
    return
  }
  func.func @transform_0(%arg0: i32) -> (i32, i32) {
    %c0_i32 = arith.constant 0 : i32
    %c0_i32_0 = arith.constant 0 : i32
    return %arg0, %c0_i32 : i32, i32
  }
  func.func @transform_1(%arg0: i32) -> (i32, i32) {
    %c0_i32 = arith.constant 0 : i32
    %c0_i32_0 = arith.constant 0 : i32
    %c0_i32_1 = arith.constant 0 : i32
    return %c0_i32, %c0_i32_0 : i32, i32
  }
  func.func @transform_2(%arg0: i32) -> (i32, i32) {
    %c0_i32 = arith.constant 0 : i32
    %c0_i32_0 = arith.constant 0 : i32
    %c0_i32_1 = arith.constant 0 : i32
    return %c0_i32, %c0_i32_0 : i32, i32
  }
}

module attributes {stable_mosaic.version = 11 : i64} {
  func.func @kernel(%arg0: i32, %arg1: i32, %arg2: i32, %arg3: memref<16x512xbf16, #tpu.memory_space<vmem>>, %arg4: memref<512x128xbf16, #tpu.memory_space<vmem>>, %arg5: memref<1x128xf32, #tpu.memory_space<vmem>>, %arg6: memref<16x128xf32, #tpu.memory_space<vmem>>, %arg7: memref<16x128xf32, #tpu.memory_space<vmem>>) attributes {dimension_semantics = [#tpu.dimension_semantics<parallel>, #tpu.dimension_semantics<parallel>, #tpu.dimension_semantics<arbitrary>], iteration_bounds = array<i64: 1, 1, 2>, scalar_prefetch = 0 : i64, scratch_operands = 1 : i64, tpu.core_type = #tpu.core_type<tc>, window_params = [{transform_indices = @transform_0, window_bounds = array<i64: 16, 512>}, {transform_indices = @transform_1, window_bounds = array<i64: 512, 128>}, {transform_indices = @transform_2, window_bounds = array<i64: 1, 128>}, {transform_indices = @transform_3, window_bounds = array<i64: 16, 128>}]} {
    %c0_i32 = arith.constant 0 : i32
    %0 = arith.cmpi eq, %arg2, %c0_i32 : i32
    %1 = arith.extui %0 : i1 to i32
    %c0_i32_0 = arith.constant 0 : i32
    %2 = arith.cmpi ne, %1, %c0_i32_0 : i32
    scf.if %2 {
      %cst_11 = arith.constant 0.000000e+00 : f32
      %17 = vector.broadcast %cst_11 : f32 to vector<16x128xf32>
      %c0_12 = arith.constant 0 : index
      %c0_13 = arith.constant 0 : index
      %18 = vector.load %arg7[%c0_12, %c0_13] : memref<16x128xf32, #tpu.memory_space<vmem>>, vector<16x128xf32>
      tpu.vector_store %arg7[%c0_12, %c0_13], %17 {strides = array<i32>} : memref<16x128xf32, #tpu.memory_space<vmem>>, vector<16x128xf32>,
    } else {
    }
    %c0 = arith.constant 0 : index
    %c0_1 = arith.constant 0 : index
    %3 = vector.load %arg3[%c0, %c0_1] : memref<16x512xbf16, #tpu.memory_space<vmem>>, vector<16x512xbf16>
    %cst = arith.constant 0.000000e+00 : bf16
    %4 = vector.broadcast %cst : bf16 to vector<16x512xbf16>
    %5 = arith.cmpf oge, %3, %4 : vector<16x512xbf16>
    %cst_2 = arith.constant 2.001950e-01 : bf16
    %6 = vector.broadcast %cst_2 : bf16 to vector<16x512xbf16>
    %7 = arith.mulf %6, %3 : vector<16x512xbf16>
    %8 = arith.select %5, %3, %7 : vector<16x512xi1>, vector<16x512xbf16>
    %c0_3 = arith.constant 0 : index
    %c0_4 = arith.constant 0 : index
    %9 = vector.load %arg7[%c0_3, %c0_4] : memref<16x128xf32, #tpu.memory_space<vmem>>, vector<16x128xf32>
    %c0_5 = arith.constant 0 : index
    %c0_6 = arith.constant 0 : index
    %10 = vector.load %arg4[%c0_5, %c0_6] : memref<512x128xbf16, #tpu.memory_space<vmem>>, vector<512x128xbf16>
    %cst_7 = arith.constant dense<0.000000e+00> : vector<16x128xf32>
    %11 = tpu.matmul %8, %10, %cst_7 {dimension_numbers = #tpu.dot_dimension_numbers<[1], [0], [0], [1], [0, 0, 1, 1], [], []>} : vector<16x512xbf16>, vector<512x128xbf16>, vector<16x128xf32> -> vector<16x128xf32>
    %12 = arith.addf %9, %11 : vector<16x128xf32>
    %c0_8 = arith.constant 0 : index
    %c0_9 = arith.constant 0 : index
    %13 = vector.load %arg7[%c0_8, %c0_9] : memref<16x128xf32, #tpu.memory_space<vmem>>, vector<16x128xf32>
    tpu.vector_store %arg7[%c0_8, %c0_9], %12 {strides = array<i32>} : memref<16x128xf32, #tpu.memory_space<vmem>>, vector<16x128xf32>,
    %c1_i32 = arith.constant 1 : i32
    %14 = arith.cmpi eq, %arg2, %c1_i32 : i32
    %15 = arith.extui %14 : i1 to i32
    %c0_i32_10 = arith.constant 0 : i32
    %16 = arith.cmpi ne, %15, %c0_i32_10 : i32
    scf.if %16 {
      %c0_11 = arith.constant 0 : index
      %c0_12 = arith.constant 0 : index
      %17 = vector.load %arg7[%c0_11, %c0_12] : memref<16x128xf32, #tpu.memory_space<vmem>>, vector<16x128xf32>
      %c0_13 = arith.constant 0 : index
      %c0_14 = arith.constant 0 : index
      %18 = vector.load %arg5[%c0_13, %c0_14] : memref<1x128xf32, #tpu.memory_space<vmem>>, vector<1x128xf32>
      %19 = vector.broadcast %18 : vector<1x128xf32> to vector<16x128xf32>
      %20 = arith.addf %17, %19 : vector<16x128xf32>
      %c0_15 = arith.constant 0 : index
      %c0_16 = arith.constant 0 : index
      %21 = vector.load %arg6[%c0_15, %c0_16] : memref<16x128xf32, #tpu.memory_space<vmem>>, vector<16x128xf32>
      tpu.vector_store %arg6[%c0_15, %c0_16], %20 {strides = array<i32>} : memref<16x128xf32, #tpu.memory_space<vmem>>, vector<16x128xf32>,
    } else {
    }
    return
  }
  func.func @transform_0(%arg0: i32, %arg1: i32, %arg2: i32) -> (i32, i32) {
    %c0_i32 = arith.constant 0 : i32
    return %arg0, %arg2 : i32, i32
  }
  func.func @transform_1(%arg0: i32, %arg1: i32, %arg2: i32) -> (i32, i32) {
    %c0_i32 = arith.constant 0 : i32
    return %arg2, %arg1 : i32, i32
  }
  func.func @transform_2(%arg0: i32, %arg1: i32, %arg2: i32) -> (i32, i32) {
    %c0_i32 = arith.constant 0 : i32
    %c0_i32_0 = arith.constant 0 : i32
    return %c0_i32, %arg1 : i32, i32
  }
  func.func @transform_3(%arg0: i32, %arg1: i32, %arg2: i32) -> (i32, i32) {
    %c0_i32 = arith.constant 0 : i32
    return %arg0, %arg1 : i32, i32
  }
}

module attributes {stable_mosaic.version = 11 : i64} {
  func.func @kernel(%arg0: i32, %arg1: i32, %arg2: i32, %arg3: memref<16x256xbf16, #tpu.memory_space<vmem>>, %arg4: memref<256x128xbf16, #tpu.memory_space<vmem>>, %arg5: memref<1x128xf32, #tpu.memory_space<vmem>>, %arg6: memref<16x128xf32, #tpu.memory_space<vmem>>, %arg7: memref<16x128xf32, #tpu.memory_space<vmem>>) attributes {dimension_semantics = [#tpu.dimension_semantics<parallel>, #tpu.dimension_semantics<parallel>, #tpu.dimension_semantics<arbitrary>], iteration_bounds = array<i64: 1, 1, 1>, scalar_prefetch = 0 : i64, scratch_operands = 1 : i64, tpu.core_type = #tpu.core_type<tc>, window_params = [{transform_indices = @transform_0, window_bounds = array<i64: 16, 256>}, {transform_indices = @transform_1, window_bounds = array<i64: 256, 128>}, {transform_indices = @transform_2, window_bounds = array<i64: 1, 128>}, {transform_indices = @transform_3, window_bounds = array<i64: 16, 128>}]} {
    %c0_i32 = arith.constant 0 : i32
    %0 = arith.cmpi eq, %arg2, %c0_i32 : i32
    %1 = arith.extui %0 : i1 to i32
    %c0_i32_0 = arith.constant 0 : i32
    %2 = arith.cmpi ne, %1, %c0_i32_0 : i32
    scf.if %2 {
      %cst_11 = arith.constant 0.000000e+00 : f32
      %14 = vector.broadcast %cst_11 : f32 to vector<16x128xf32>
      %c0_12 = arith.constant 0 : index
      %c0_13 = arith.constant 0 : index
      %15 = vector.load %arg7[%c0_12, %c0_13] : memref<16x128xf32, #tpu.memory_space<vmem>>, vector<16x128xf32>
      tpu.vector_store %arg7[%c0_12, %c0_13], %14 {strides = array<i32>} : memref<16x128xf32, #tpu.memory_space<vmem>>, vector<16x128xf32>,
    } else {
    }
    %c0 = arith.constant 0 : index
    %c0_1 = arith.constant 0 : index
    %3 = vector.load %arg3[%c0, %c0_1] : memref<16x256xbf16, #tpu.memory_space<vmem>>, vector<16x256xbf16>
    %cst = arith.constant 0.000000e+00 : bf16
    %4 = vector.broadcast %cst : bf16 to vector<16x256xbf16>
    %5 = arith.maximumf %3, %4 : vector<16x256xbf16>
    %c0_2 = arith.constant 0 : index
    %c0_3 = arith.constant 0 : index
    %6 = vector.load %arg7[%c0_2, %c0_3] : memref<16x128xf32, #tpu.memory_space<vmem>>, vector<16x128xf32>
    %c0_4 = arith.constant 0 : index
    %c0_5 = arith.constant 0 : index
    %7 = vector.load %arg4[%c0_4, %c0_5] : memref<256x128xbf16, #tpu.memory_space<vmem>>, vector<256x128xbf16>
    %cst_6 = arith.constant dense<0.000000e+00> : vector<16x128xf32>
    %8 = tpu.matmul %5, %7, %cst_6 {dimension_numbers = #tpu.dot_dimension_numbers<[1], [0], [0], [1], [0, 0, 1, 1], [], []>} : vector<16x256xbf16>, vector<256x128xbf16>, vector<16x128xf32> -> vector<16x128xf32>
    %9 = arith.addf %6, %8 : vector<16x128xf32>
    %c0_7 = arith.constant 0 : index
    %c0_8 = arith.constant 0 : index
    %10 = vector.load %arg7[%c0_7, %c0_8] : memref<16x128xf32, #tpu.memory_space<vmem>>, vector<16x128xf32>
    tpu.vector_store %arg7[%c0_7, %c0_8], %9 {strides = array<i32>} : memref<16x128xf32, #tpu.memory_space<vmem>>, vector<16x128xf32>,
    %c0_i32_9 = arith.constant 0 : i32
    %11 = arith.cmpi eq, %arg2, %c0_i32_9 : i32
    %12 = arith.extui %11 : i1 to i32
    %c0_i32_10 = arith.constant 0 : i32
    %13 = arith.cmpi ne, %12, %c0_i32_10 : i32
    scf.if %13 {
      %c0_11 = arith.constant 0 : index
      %c0_12 = arith.constant 0 : index
      %14 = vector.load %arg7[%c0_11, %c0_12] : memref<16x128xf32, #tpu.memory_space<vmem>>, vector<16x128xf32>
      %c0_13 = arith.constant 0 : index
      %c0_14 = arith.constant 0 : index
      %15 = vector.load %arg5[%c0_13, %c0_14] : memref<1x128xf32, #tpu.memory_space<vmem>>, vector<1x128xf32>
      %16 = vector.broadcast %15 : vector<1x128xf32> to vector<16x128xf32>
      %17 = arith.addf %14, %16 : vector<16x128xf32>
      %c0_15 = arith.constant 0 : index
      %c0_16 = arith.constant 0 : index
      %18 = vector.load %arg6[%c0_15, %c0_16] : memref<16x128xf32, #tpu.memory_space<vmem>>, vector<16x128xf32>
      tpu.vector_store %arg6[%c0_15, %c0_16], %17 {strides = array<i32>} : memref<16x128xf32, #tpu.memory_space<vmem>>, vector<16x128xf32>,
    } else {
    }
    return
  }
  func.func @transform_0(%arg0: i32, %arg1: i32, %arg2: i32) -> (i32, i32) {
    %c0_i32 = arith.constant 0 : i32
    return %arg0, %arg2 : i32, i32
  }
  func.func @transform_1(%arg0: i32, %arg1: i32, %arg2: i32) -> (i32, i32) {
    %c0_i32 = arith.constant 0 : i32
    return %arg2, %arg1 : i32, i32
  }
  func.func @transform_2(%arg0: i32, %arg1: i32, %arg2: i32) -> (i32, i32) {
    %c0_i32 = arith.constant 0 : i32
    %c0_i32_0 = arith.constant 0 : i32
    return %c0_i32, %arg1 : i32, i32
  }
  func.func @transform_3(%arg0: i32, %arg1: i32, %arg2: i32) -> (i32, i32) {
    %c0_i32 = arith.constant 0 : i32
    return %arg0, %arg1 : i32, i32
  }
}

module attributes {stable_mosaic.version = 11 : i64} {
  func.func @kernel(%arg0: i32, %arg1: i32, %arg2: i32, %arg3: memref<16x512xbf16, #tpu.memory_space<vmem>>, %arg4: memref<512x128xbf16, #tpu.memory_space<vmem>>, %arg5: memref<1x128xf32, #tpu.memory_space<vmem>>, %arg6: memref<16x128xf32, #tpu.memory_space<vmem>>, %arg7: memref<16x128xf32, #tpu.memory_space<vmem>>) attributes {dimension_semantics = [#tpu.dimension_semantics<parallel>, #tpu.dimension_semantics<parallel>, #tpu.dimension_semantics<arbitrary>], iteration_bounds = array<i64: 1, 1, 1>, scalar_prefetch = 0 : i64, scratch_operands = 1 : i64, tpu.core_type = #tpu.core_type<tc>, window_params = [{transform_indices = @transform_0, window_bounds = array<i64: 16, 512>}, {transform_indices = @transform_1, window_bounds = array<i64: 512, 128>}, {transform_indices = @transform_2, window_bounds = array<i64: 1, 128>}, {transform_indices = @transform_3, window_bounds = array<i64: 16, 128>}]} {
    %c0_i32 = arith.constant 0 : i32
    %0 = arith.cmpi eq, %arg2, %c0_i32 : i32
    %1 = arith.extui %0 : i1 to i32
    %c0_i32_0 = arith.constant 0 : i32
    %2 = arith.cmpi ne, %1, %c0_i32_0 : i32
    scf.if %2 {
      %cst_11 = arith.constant 0.000000e+00 : f32
      %14 = vector.broadcast %cst_11 : f32 to vector<16x128xf32>
      %c0_12 = arith.constant 0 : index
      %c0_13 = arith.constant 0 : index
      %15 = vector.load %arg7[%c0_12, %c0_13] : memref<16x128xf32, #tpu.memory_space<vmem>>, vector<16x128xf32>
      tpu.vector_store %arg7[%c0_12, %c0_13], %14 {strides = array<i32>} : memref<16x128xf32, #tpu.memory_space<vmem>>, vector<16x128xf32>,
    } else {
    }
    %c0 = arith.constant 0 : index
    %c0_1 = arith.constant 0 : index
    %3 = vector.load %arg3[%c0, %c0_1] : memref<16x512xbf16, #tpu.memory_space<vmem>>, vector<16x512xbf16>
    %cst = arith.constant 0.000000e+00 : bf16
    %4 = vector.broadcast %cst : bf16 to vector<16x512xbf16>
    %5 = arith.maximumf %3, %4 : vector<16x512xbf16>
    %c0_2 = arith.constant 0 : index
    %c0_3 = arith.constant 0 : index
    %6 = vector.load %arg7[%c0_2, %c0_3] : memref<16x128xf32, #tpu.memory_space<vmem>>, vector<16x128xf32>
    %c0_4 = arith.constant 0 : index
    %c0_5 = arith.constant 0 : index
    %7 = vector.load %arg4[%c0_4, %c0_5] : memref<512x128xbf16, #tpu.memory_space<vmem>>, vector<512x128xbf16>
    %cst_6 = arith.constant dense<0.000000e+00> : vector<16x128xf32>
    %8 = tpu.matmul %5, %7, %cst_6 {dimension_numbers = #tpu.dot_dimension_numbers<[1], [0], [0], [1], [0, 0, 1, 1], [], []>} : vector<16x512xbf16>, vector<512x128xbf16>, vector<16x128xf32> -> vector<16x128xf32>
    %9 = arith.addf %6, %8 : vector<16x128xf32>
    %c0_7 = arith.constant 0 : index
    %c0_8 = arith.constant 0 : index
    %10 = vector.load %arg7[%c0_7, %c0_8] : memref<16x128xf32, #tpu.memory_space<vmem>>, vector<16x128xf32>
    tpu.vector_store %arg7[%c0_7, %c0_8], %9 {strides = array<i32>} : memref<16x128xf32, #tpu.memory_space<vmem>>, vector<16x128xf32>,
    %c0_i32_9 = arith.constant 0 : i32
    %11 = arith.cmpi eq, %arg2, %c0_i32_9 : i32
    %12 = arith.extui %11 : i1 to i32
    %c0_i32_10 = arith.constant 0 : i32
    %13 = arith.cmpi ne, %12, %c0_i32_10 : i32
    scf.if %13 {
      %c0_11 = arith.constant 0 : index
      %c0_12 = arith.constant 0 : index
      %14 = vector.load %arg7[%c0_11, %c0_12] : memref<16x128xf32, #tpu.memory_space<vmem>>, vector<16x128xf32>
      %c0_13 = arith.constant 0 : index
      %c0_14 = arith.constant 0 : index
      %15 = vector.load %arg5[%c0_13, %c0_14] : memref<1x128xf32, #tpu.memory_space<vmem>>, vector<1x128xf32>
      %16 = vector.broadcast %15 : vector<1x128xf32> to vector<16x128xf32>
      %17 = arith.addf %14, %16 : vector<16x128xf32>
      %c0_15 = arith.constant 0 : index
      %c0_16 = arith.constant 0 : index
      %18 = vector.load %arg6[%c0_15, %c0_16] : memref<16x128xf32, #tpu.memory_space<vmem>>, vector<16x128xf32>
      tpu.vector_store %arg6[%c0_15, %c0_16], %17 {strides = array<i32>} : memref<16x128xf32, #tpu.memory_space<vmem>>, vector<16x128xf32>,
    } else {
    }
    return
  }
  func.func @transform_0(%arg0: i32, %arg1: i32, %arg2: i32) -> (i32, i32) {
    %c0_i32 = arith.constant 0 : i32
    return %arg0, %arg2 : i32, i32
  }
  func.func @transform_1(%arg0: i32, %arg1: i32, %arg2: i32) -> (i32, i32) {
    %c0_i32 = arith.constant 0 : i32
    return %arg2, %arg1 : i32, i32
  }
  func.func @transform_2(%arg0: i32, %arg1: i32, %arg2: i32) -> (i32, i32) {
    %c0_i32 = arith.constant 0 : i32
    %c0_i32_0 = arith.constant 0 : i32
    return %c0_i32, %arg1 : i32, i32
  }
  func.func @transform_3(%arg0: i32, %arg1: i32, %arg2: i32) -> (i32, i32) {
    %c0_i32 = arith.constant 0 : i32
    return %arg0, %arg1 : i32, i32
  }
}

module attributes {stable_mosaic.version = 11 : i64} {
  func.func @kernel(%arg0: i32, %arg1: i32, %arg2: i32, %arg3: memref<32x256xbf16, #tpu.memory_space<vmem>>, %arg4: memref<256x128xbf16, #tpu.memory_space<vmem>>, %arg5: memref<1x128xf32, #tpu.memory_space<vmem>>, %arg6: memref<32x128xf32, #tpu.memory_space<vmem>>, %arg7: memref<32x128xf32, #tpu.memory_space<vmem>>) attributes {dimension_semantics = [#tpu.dimension_semantics<parallel>, #tpu.dimension_semantics<parallel>, #tpu.dimension_semantics<arbitrary>], iteration_bounds = array<i64: 1, 1, 1>, scalar_prefetch = 0 : i64, scratch_operands = 1 : i64, tpu.core_type = #tpu.core_type<tc>, window_params = [{transform_indices = @transform_0, window_bounds = array<i64: 32, 256>}, {transform_indices = @transform_1, window_bounds = array<i64: 256, 128>}, {transform_indices = @transform_2, window_bounds = array<i64: 1, 128>}, {transform_indices = @transform_3, window_bounds = array<i64: 32, 128>}]} {
    %c0_i32 = arith.constant 0 : i32
    %0 = arith.cmpi eq, %arg2, %c0_i32 : i32
    %1 = arith.extui %0 : i1 to i32
    %c0_i32_0 = arith.constant 0 : i32
    %2 = arith.cmpi ne, %1, %c0_i32_0 : i32
    scf.if %2 {
      %cst_11 = arith.constant 0.000000e+00 : f32
      %14 = vector.broadcast %cst_11 : f32 to vector<32x128xf32>
      %c0_12 = arith.constant 0 : index
      %c0_13 = arith.constant 0 : index
      %15 = vector.load %arg7[%c0_12, %c0_13] : memref<32x128xf32, #tpu.memory_space<vmem>>, vector<32x128xf32>
      tpu.vector_store %arg7[%c0_12, %c0_13], %14 {strides = array<i32>} : memref<32x128xf32, #tpu.memory_space<vmem>>, vector<32x128xf32>,
    } else {
    }
    %c0 = arith.constant 0 : index
    %c0_1 = arith.constant 0 : index
    %3 = vector.load %arg3[%c0, %c0_1] : memref<32x256xbf16, #tpu.memory_space<vmem>>, vector<32x256xbf16>
    %cst = arith.constant 0.000000e+00 : bf16
    %4 = vector.broadcast %cst : bf16 to vector<32x256xbf16>
    %5 = arith.maximumf %3, %4 : vector<32x256xbf16>
    %c0_2 = arith.constant 0 : index
    %c0_3 = arith.constant 0 : index
    %6 = vector.load %arg7[%c0_2, %c0_3] : memref<32x128xf32, #tpu.memory_space<vmem>>, vector<32x128xf32>
    %c0_4 = arith.constant 0 : index
    %c0_5 = arith.constant 0 : index
    %7 = vector.load %arg4[%c0_4, %c0_5] : memref<256x128xbf16, #tpu.memory_space<vmem>>, vector<256x128xbf16>
    %cst_6 = arith.constant dense<0.000000e+00> : vector<32x128xf32>
    %8 = tpu.matmul %5, %7, %cst_6 {dimension_numbers = #tpu.dot_dimension_numbers<[1], [0], [0], [1], [0, 0, 1, 1], [], []>} : vector<32x256xbf16>, vector<256x128xbf16>, vector<32x128xf32> -> vector<32x128xf32>
    %9 = arith.addf %6, %8 : vector<32x128xf32>
    %c0_7 = arith.constant 0 : index
    %c0_8 = arith.constant 0 : index
    %10 = vector.load %arg7[%c0_7, %c0_8] : memref<32x128xf32, #tpu.memory_space<vmem>>, vector<32x128xf32>
    tpu.vector_store %arg7[%c0_7, %c0_8], %9 {strides = array<i32>} : memref<32x128xf32, #tpu.memory_space<vmem>>, vector<32x128xf32>,
    %c0_i32_9 = arith.constant 0 : i32
    %11 = arith.cmpi eq, %arg2, %c0_i32_9 : i32
    %12 = arith.extui %11 : i1 to i32
    %c0_i32_10 = arith.constant 0 : i32
    %13 = arith.cmpi ne, %12, %c0_i32_10 : i32
    scf.if %13 {
      %c0_11 = arith.constant 0 : index
      %c0_12 = arith.constant 0 : index
      %14 = vector.load %arg7[%c0_11, %c0_12] : memref<32x128xf32, #tpu.memory_space<vmem>>, vector<32x128xf32>
      %c0_13 = arith.constant 0 : index
      %c0_14 = arith.constant 0 : index
      %15 = vector.load %arg5[%c0_13, %c0_14] : memref<1x128xf32, #tpu.memory_space<vmem>>, vector<1x128xf32>
      %16 = vector.broadcast %15 : vector<1x128xf32> to vector<32x128xf32>
      %17 = arith.addf %14, %16 : vector<32x128xf32>
      %c0_15 = arith.constant 0 : index
      %c0_16 = arith.constant 0 : index
      %18 = vector.load %arg6[%c0_15, %c0_16] : memref<32x128xf32, #tpu.memory_space<vmem>>, vector<32x128xf32>
      tpu.vector_store %arg6[%c0_15, %c0_16], %17 {strides = array<i32>} : memref<32x128xf32, #tpu.memory_space<vmem>>, vector<32x128xf32>,
    } else {
    }
    return
  }
  func.func @transform_0(%arg0: i32, %arg1: i32, %arg2: i32) -> (i32, i32) {
    %c0_i32 = arith.constant 0 : i32
    return %arg0, %arg2 : i32, i32
  }
  func.func @transform_1(%arg0: i32, %arg1: i32, %arg2: i32) -> (i32, i32) {
    %c0_i32 = arith.constant 0 : i32
    return %arg2, %arg1 : i32, i32
  }
  func.func @transform_2(%arg0: i32, %arg1: i32, %arg2: i32) -> (i32, i32) {
    %c0_i32 = arith.constant 0 : i32
    %c0_i32_0 = arith.constant 0 : i32
    return %c0_i32, %arg1 : i32, i32
  }
  func.func @transform_3(%arg0: i32, %arg1: i32, %arg2: i32) -> (i32, i32) {
    %c0_i32 = arith.constant 0 : i32
    return %arg0, %arg1 : i32, i32
  }
}

module attributes {stable_mosaic.version = 11 : i64} {
  func.func @kernel(%arg0: i32, %arg1: i32, %arg2: i32, %arg3: memref<128x128xbf16, #tpu.memory_space<vmem>>, %arg4: memref<128x128xbf16, #tpu.memory_space<vmem>>, %arg5: memref<1x128xf32, #tpu.memory_space<vmem>>, %arg6: memref<128x128xf32, #tpu.memory_space<vmem>>, %arg7: memref<128x128xf32, #tpu.memory_space<vmem>>) attributes {dimension_semantics = [#tpu.dimension_semantics<parallel>, #tpu.dimension_semantics<parallel>, #tpu.dimension_semantics<arbitrary>], iteration_bounds = array<i64: 1, 1, 1>, scalar_prefetch = 0 : i64, scratch_operands = 1 : i64, tpu.core_type = #tpu.core_type<tc>, window_params = [{transform_indices = @transform_0, window_bounds = array<i64: 128, 128>}, {transform_indices = @transform_1, window_bounds = array<i64: 128, 128>}, {transform_indices = @transform_2, window_bounds = array<i64: 1, 128>}, {transform_indices = @transform_3, window_bounds = array<i64: 128, 128>}]} {
    %c0_i32 = arith.constant 0 : i32
    %0 = arith.cmpi eq, %arg2, %c0_i32 : i32
    %1 = arith.extui %0 : i1 to i32
    %c0_i32_0 = arith.constant 0 : i32
    %2 = arith.cmpi ne, %1, %c0_i32_0 : i32
    scf.if %2 {
      %cst_11 = arith.constant 0.000000e+00 : f32
      %14 = vector.broadcast %cst_11 : f32 to vector<128x128xf32>
      %c0_12 = arith.constant 0 : index
      %c0_13 = arith.constant 0 : index
      %15 = vector.load %arg7[%c0_12, %c0_13] : memref<128x128xf32, #tpu.memory_space<vmem>>, vector<128x128xf32>
      tpu.vector_store %arg7[%c0_12, %c0_13], %14 {strides = array<i32>} : memref<128x128xf32, #tpu.memory_space<vmem>>, vector<128x128xf32>,
    } else {
    }
    %c0 = arith.constant 0 : index
    %c0_1 = arith.constant 0 : index
    %3 = vector.load %arg3[%c0, %c0_1] : memref<128x128xbf16, #tpu.memory_space<vmem>>, vector<128x128xbf16>
    %cst = arith.constant 0.000000e+00 : bf16
    %4 = vector.broadcast %cst : bf16 to vector<128x128xbf16>
    %5 = arith.maximumf %3, %4 : vector<128x128xbf16>
    %c0_2 = arith.constant 0 : index
    %c0_3 = arith.constant 0 : index
    %6 = vector.load %arg7[%c0_2, %c0_3] : memref<128x128xf32, #tpu.memory_space<vmem>>, vector<128x128xf32>
    %c0_4 = arith.constant 0 : index
    %c0_5 = arith.constant 0 : index
    %7 = vector.load %arg4[%c0_4, %c0_5] : memref<128x128xbf16, #tpu.memory_space<vmem>>, vector<128x128xbf16>
    %cst_6 = arith.constant dense<0.000000e+00> : vector<128x128xf32>
    %8 = tpu.matmul %5, %7, %cst_6 {dimension_numbers = #tpu.dot_dimension_numbers<[1], [0], [0], [1], [0, 0, 1, 1], [], []>} : vector<128x128xbf16>, vector<128x128xbf16>, vector<128x128xf32> -> vector<128x128xf32>
    %9 = arith.addf %6, %8 : vector<128x128xf32>
    %c0_7 = arith.constant 0 : index
    %c0_8 = arith.constant 0 : index
    %10 = vector.load %arg7[%c0_7, %c0_8] : memref<128x128xf32, #tpu.memory_space<vmem>>, vector<128x128xf32>
    tpu.vector_store %arg7[%c0_7, %c0_8], %9 {strides = array<i32>} : memref<128x128xf32, #tpu.memory_space<vmem>>, vector<128x128xf32>,
    %c0_i32_9 = arith.constant 0 : i32
    %11 = arith.cmpi eq, %arg2, %c0_i32_9 : i32
    %12 = arith.extui %11 : i1 to i32
    %c0_i32_10 = arith.constant 0 : i32
    %13 = arith.cmpi ne, %12, %c0_i32_10 : i32
    scf.if %13 {
      %c0_11 = arith.constant 0 : index
      %c0_12 = arith.constant 0 : index
      %14 = vector.load %arg7[%c0_11, %c0_12] : memref<128x128xf32, #tpu.memory_space<vmem>>, vector<128x128xf32>
      %c0_13 = arith.constant 0 : index
      %c0_14 = arith.constant 0 : index
      %15 = vector.load %arg5[%c0_13, %c0_14] : memref<1x128xf32, #tpu.memory_space<vmem>>, vector<1x128xf32>
      %16 = vector.broadcast %15 : vector<1x128xf32> to vector<128x128xf32>
      %17 = arith.addf %14, %16 : vector<128x128xf32>
      %c0_15 = arith.constant 0 : index
      %c0_16 = arith.constant 0 : index
      %18 = vector.load %arg6[%c0_15, %c0_16] : memref<128x128xf32, #tpu.memory_space<vmem>>, vector<128x128xf32>
      tpu.vector_store %arg6[%c0_15, %c0_16], %17 {strides = array<i32>} : memref<128x128xf32, #tpu.memory_space<vmem>>, vector<128x128xf32>,
    } else {
    }
    return
  }
  func.func @transform_0(%arg0: i32, %arg1: i32, %arg2: i32) -> (i32, i32) {
    %c0_i32 = arith.constant 0 : i32
    return %arg0, %arg2 : i32, i32
  }
  func.func @transform_1(%arg0: i32, %arg1: i32, %arg2: i32) -> (i32, i32) {
    %c0_i32 = arith.constant 0 : i32
    return %arg2, %arg1 : i32, i32
  }
  func.func @transform_2(%arg0: i32, %arg1: i32, %arg2: i32) -> (i32, i32) {
    %c0_i32 = arith.constant 0 : i32
    %c0_i32_0 = arith.constant 0 : i32
    return %c0_i32, %arg1 : i32, i32
  }
  func.func @transform_3(%arg0: i32, %arg1: i32, %arg2: i32) -> (i32, i32) {
    %c0_i32 = arith.constant 0 : i32
    return %arg0, %arg1 : i32, i32
  }
}

module attributes {stable_mosaic.version = 11 : i64} {
  func.func @_stats_kernel(%arg0: i32, %arg1: memref<256x8xf32, #tpu.memory_space<vmem>>, %arg2: memref<1x8xf32, #tpu.memory_space<vmem>>, %arg3: memref<1x8xf32, #tpu.memory_space<vmem>>) attributes {dimension_semantics = [#tpu.dimension_semantics<arbitrary>], iteration_bounds = array<i64: 2>, scalar_prefetch = 0 : i64, scratch_operands = 0 : i64, tpu.core_type = #tpu.core_type<tc>, window_params = [{transform_indices = @transform_0, window_bounds = array<i64: 256, 8>}, {pipeline_mode = #tpu.pipeline_mode<synchronous>, transform_indices = @transform_1, window_bounds = array<i64: 1, 8>}, {pipeline_mode = #tpu.pipeline_mode<synchronous>, transform_indices = @transform_2, window_bounds = array<i64: 1, 8>}]} {
    %c0_i32 = arith.constant 0 : i32
    %0 = arith.cmpi eq, %arg0, %c0_i32 : i32
    %1 = arith.extui %0 : i1 to i32
    %c0_i32_0 = arith.constant 0 : i32
    %2 = arith.cmpi ne, %1, %c0_i32_0 : i32
    scf.if %2 {
      %cst_11 = arith.constant 0.000000e+00 : f32
      %15 = vector.broadcast %cst_11 : f32 to vector<1x8xf32>
      %c0_12 = arith.constant 0 : index
      %c0_13 = arith.constant 0 : index
      %16 = vector.load %arg2[%c0_12, %c0_13] : memref<1x8xf32, #tpu.memory_space<vmem>>, vector<1x8xf32>
      tpu.vector_store %arg2[%c0_12, %c0_13], %15 {strides = array<i32>} : memref<1x8xf32, #tpu.memory_space<vmem>>, vector<1x8xf32>,
      %cst_14 = arith.constant 0.000000e+00 : f32
      %17 = vector.broadcast %cst_14 : f32 to vector<1x8xf32>
      %c0_15 = arith.constant 0 : index
      %c0_16 = arith.constant 0 : index
      %18 = vector.load %arg3[%c0_15, %c0_16] : memref<1x8xf32, #tpu.memory_space<vmem>>, vector<1x8xf32>
      tpu.vector_store %arg3[%c0_15, %c0_16], %17 {strides = array<i32>} : memref<1x8xf32, #tpu.memory_space<vmem>>, vector<1x8xf32>,
    } else {
    }
    %c0 = arith.constant 0 : index
    %c0_1 = arith.constant 0 : index
    %3 = vector.load %arg1[%c0, %c0_1] : memref<256x8xf32, #tpu.memory_space<vmem>>, vector<256x8xf32>
    %c0_2 = arith.constant 0 : index
    %c0_3 = arith.constant 0 : index
    %4 = vector.load %arg2[%c0_2, %c0_3] : memref<1x8xf32, #tpu.memory_space<vmem>>, vector<1x8xf32>
    %cst = arith.constant dense<0.000000e+00> : vector<8xf32>
    %5 = vector.multi_reduction <add>, %3, %cst [0] : vector<256x8xf32> to vector<8xf32>
    %6 = vector.shape_cast %5 : vector<8xf32> to vector<1x8xf32>
    %7 = arith.addf %4, %6 : vector<1x8xf32>
    %c0_4 = arith.constant 0 : index
    %c0_5 = arith.constant 0 : index
    %8 = vector.load %arg2[%c0_4, %c0_5] : memref<1x8xf32, #tpu.memory_space<vmem>>, vector<1x8xf32>
    tpu.vector_store %arg2[%c0_4, %c0_5], %7 {strides = array<i32>} : memref<1x8xf32, #tpu.memory_space<vmem>>, vector<1x8xf32>,
    %c0_6 = arith.constant 0 : index
    %c0_7 = arith.constant 0 : index
    %9 = vector.load %arg3[%c0_6, %c0_7] : memref<1x8xf32, #tpu.memory_space<vmem>>, vector<1x8xf32>
    %10 = arith.mulf %3, %3 : vector<256x8xf32>
    %cst_8 = arith.constant dense<0.000000e+00> : vector<8xf32>
    %11 = vector.multi_reduction <add>, %10, %cst_8 [0] : vector<256x8xf32> to vector<8xf32>
    %12 = vector.shape_cast %11 : vector<8xf32> to vector<1x8xf32>
    %13 = arith.addf %9, %12 : vector<1x8xf32>
    %c0_9 = arith.constant 0 : index
    %c0_10 = arith.constant 0 : index
    %14 = vector.load %arg3[%c0_9, %c0_10] : memref<1x8xf32, #tpu.memory_space<vmem>>, vector<1x8xf32>
    tpu.vector_store %arg3[%c0_9, %c0_10], %13 {strides = array<i32>} : memref<1x8xf32, #tpu.memory_space<vmem>>, vector<1x8xf32>,
    return
  }
  func.func @transform_0(%arg0: i32) -> (i32, i32) {
    %c0_i32 = arith.constant 0 : i32
    %c0_i32_0 = arith.constant 0 : i32
    return %arg0, %c0_i32 : i32, i32
  }
  func.func @transform_1(%arg0: i32) -> (i32, i32) {
    %c0_i32 = arith.constant 0 : i32
    %c0_i32_0 = arith.constant 0 : i32
    %c0_i32_1 = arith.constant 0 : i32
    return %c0_i32, %c0_i32_0 : i32, i32
  }
  func.func @transform_2(%arg0: i32) -> (i32, i32) {
    %c0_i32 = arith.constant 0 : i32
    %c0_i32_0 = arith.constant 0 : i32
    %c0_i32_1 = arith.constant 0 : i32
    return %c0_i32, %c0_i32_0 : i32, i32
  }
}

module attributes {stable_mosaic.version = 11 : i64} {
  func.func @_affine_kernel(%arg0: i32, %arg1: memref<256x8xf32, #tpu.memory_space<vmem>>, %arg2: memref<1x8xf32, #tpu.memory_space<vmem>>, %arg3: memref<1x8xf32, #tpu.memory_space<vmem>>, %arg4: memref<256x8xf32, #tpu.memory_space<vmem>>) attributes {dimension_semantics = [#tpu.dimension_semantics<parallel>], iteration_bounds = array<i64: 2>, scalar_prefetch = 0 : i64, scratch_operands = 0 : i64, tpu.core_type = #tpu.core_type<tc>, window_params = [{transform_indices = @transform_0, window_bounds = array<i64: 256, 8>}, {pipeline_mode = #tpu.pipeline_mode<synchronous>, transform_indices = @transform_1, window_bounds = array<i64: 1, 8>}, {pipeline_mode = #tpu.pipeline_mode<synchronous>, transform_indices = @transform_2, window_bounds = array<i64: 1, 8>}, {transform_indices = @transform_3, window_bounds = array<i64: 256, 8>}]} {
    %c0 = arith.constant 0 : index
    %c0_0 = arith.constant 0 : index
    %0 = vector.load %arg1[%c0, %c0_0] : memref<256x8xf32, #tpu.memory_space<vmem>>, vector<256x8xf32>
    %c0_1 = arith.constant 0 : index
    %c0_2 = arith.constant 0 : index
    %1 = vector.load %arg2[%c0_1, %c0_2] : memref<1x8xf32, #tpu.memory_space<vmem>>, vector<1x8xf32>
    %2 = vector.broadcast %1 : vector<1x8xf32> to vector<256x8xf32>
    %3 = arith.mulf %0, %2 : vector<256x8xf32>
    %c0_3 = arith.constant 0 : index
    %c0_4 = arith.constant 0 : index
    %4 = vector.load %arg3[%c0_3, %c0_4] : memref<1x8xf32, #tpu.memory_space<vmem>>, vector<1x8xf32>
    %5 = vector.broadcast %4 : vector<1x8xf32> to vector<256x8xf32>
    %6 = arith.addf %3, %5 : vector<256x8xf32>
    %c0_5 = arith.constant 0 : index
    %c0_6 = arith.constant 0 : index
    %7 = vector.load %arg4[%c0_5, %c0_6] : memref<256x8xf32, #tpu.memory_space<vmem>>, vector<256x8xf32>
    tpu.vector_store %arg4[%c0_5, %c0_6], %6 {strides = array<i32>} : memref<256x8xf32, #tpu.memory_space<vmem>>, vector<256x8xf32>,
    return
  }
  func.func @transform_0(%arg0: i32) -> (i32, i32) {
    %c0_i32 = arith.constant 0 : i32
    %c0_i32_0 = arith.constant 0 : i32
    return %arg0, %c0_i32 : i32, i32
  }
  func.func @transform_1(%arg0: i32) -> (i32, i32) {
    %c0_i32 = arith.constant 0 : i32
    %c0_i32_0 = arith.constant 0 : i32
    %c0_i32_1 = arith.constant 0 : i32
    return %c0_i32, %c0_i32_0 : i32, i32
  }
  func.func @transform_2(%arg0: i32) -> (i32, i32) {
    %c0_i32 = arith.constant 0 : i32
    %c0_i32_0 = arith.constant 0 : i32
    %c0_i32_1 = arith.constant 0 : i32
    return %c0_i32, %c0_i32_0 : i32, i32
  }
  func.func @transform_3(%arg0: i32) -> (i32, i32) {
    %c0_i32 = arith.constant 0 : i32
    %c0_i32_0 = arith.constant 0 : i32
    return %arg0, %c0_i32 : i32, i32
  }
}

module attributes {stable_mosaic.version = 11 : i64} {
  func.func @kernel(%arg0: i32, %arg1: i32, %arg2: i32, %arg3: memref<256x128xbf16, #tpu.memory_space<vmem>>, %arg4: memref<128x128xbf16, #tpu.memory_space<vmem>>, %arg5: memref<1x128xf32, #tpu.memory_space<vmem>>, %arg6: memref<256x128xf32, #tpu.memory_space<vmem>>, %arg7: memref<256x128xf32, #tpu.memory_space<vmem>>) attributes {dimension_semantics = [#tpu.dimension_semantics<parallel>, #tpu.dimension_semantics<parallel>, #tpu.dimension_semantics<arbitrary>], iteration_bounds = array<i64: 2, 1, 1>, scalar_prefetch = 0 : i64, scratch_operands = 1 : i64, tpu.core_type = #tpu.core_type<tc>, window_params = [{transform_indices = @transform_0, window_bounds = array<i64: 256, 128>}, {transform_indices = @transform_1, window_bounds = array<i64: 128, 128>}, {transform_indices = @transform_2, window_bounds = array<i64: 1, 128>}, {transform_indices = @transform_3, window_bounds = array<i64: 256, 128>}]} {
    %c0_i32 = arith.constant 0 : i32
    %0 = arith.cmpi eq, %arg2, %c0_i32 : i32
    %1 = arith.extui %0 : i1 to i32
    %c0_i32_0 = arith.constant 0 : i32
    %2 = arith.cmpi ne, %1, %c0_i32_0 : i32
    scf.if %2 {
      %cst_11 = arith.constant 0.000000e+00 : f32
      %14 = vector.broadcast %cst_11 : f32 to vector<256x128xf32>
      %c0_12 = arith.constant 0 : index
      %c0_13 = arith.constant 0 : index
      %15 = vector.load %arg7[%c0_12, %c0_13] : memref<256x128xf32, #tpu.memory_space<vmem>>, vector<256x128xf32>
      tpu.vector_store %arg7[%c0_12, %c0_13], %14 {strides = array<i32>} : memref<256x128xf32, #tpu.memory_space<vmem>>, vector<256x128xf32>,
    } else {
    }
    %c0 = arith.constant 0 : index
    %c0_1 = arith.constant 0 : index
    %3 = vector.load %arg3[%c0, %c0_1] : memref<256x128xbf16, #tpu.memory_space<vmem>>, vector<256x128xbf16>
    %cst = arith.constant 0.000000e+00 : bf16
    %4 = vector.broadcast %cst : bf16 to vector<256x128xbf16>
    %5 = arith.maximumf %3, %4 : vector<256x128xbf16>
    %c0_2 = arith.constant 0 : index
    %c0_3 = arith.constant 0 : index
    %6 = vector.load %arg7[%c0_2, %c0_3] : memref<256x128xf32, #tpu.memory_space<vmem>>, vector<256x128xf32>
    %c0_4 = arith.constant 0 : index
    %c0_5 = arith.constant 0 : index
    %7 = vector.load %arg4[%c0_4, %c0_5] : memref<128x128xbf16, #tpu.memory_space<vmem>>, vector<128x128xbf16>
    %cst_6 = arith.constant dense<0.000000e+00> : vector<256x128xf32>
    %8 = tpu.matmul %5, %7, %cst_6 {dimension_numbers = #tpu.dot_dimension_numbers<[1], [0], [0], [1], [0, 0, 1, 1], [], []>} : vector<256x128xbf16>, vector<128x128xbf16>, vector<256x128xf32> -> vector<256x128xf32>
    %9 = arith.addf %6, %8 : vector<256x128xf32>
    %c0_7 = arith.constant 0 : index
    %c0_8 = arith.constant 0 : index
    %10 = vector.load %arg7[%c0_7, %c0_8] : memref<256x128xf32, #tpu.memory_space<vmem>>, vector<256x128xf32>
    tpu.vector_store %arg7[%c0_7, %c0_8], %9 {strides = array<i32>} : memref<256x128xf32, #tpu.memory_space<vmem>>, vector<256x128xf32>,
    %c0_i32_9 = arith.constant 0 : i32
    %11 = arith.cmpi eq, %arg2, %c0_i32_9 : i32
    %12 = arith.extui %11 : i1 to i32
    %c0_i32_10 = arith.constant 0 : i32
    %13 = arith.cmpi ne, %12, %c0_i32_10 : i32
    scf.if %13 {
      %c0_11 = arith.constant 0 : index
      %c0_12 = arith.constant 0 : index
      %14 = vector.load %arg7[%c0_11, %c0_12] : memref<256x128xf32, #tpu.memory_space<vmem>>, vector<256x128xf32>
      %c0_13 = arith.constant 0 : index
      %c0_14 = arith.constant 0 : index
      %15 = vector.load %arg5[%c0_13, %c0_14] : memref<1x128xf32, #tpu.memory_space<vmem>>, vector<1x128xf32>
      %16 = vector.broadcast %15 : vector<1x128xf32> to vector<256x128xf32>
      %17 = arith.addf %14, %16 : vector<256x128xf32>
      %cst_15 = arith.constant 0.000000e+00 : f32
      %18 = vector.broadcast %cst_15 : f32 to vector<256x128xf32>
      %19 = arith.subf %18, %17 : vector<256x128xf32>
      %20 = math.exp %19 : vector<256x128xf32>
      %cst_16 = arith.constant 1.000000e+00 : f32
      %21 = vector.broadcast %cst_16 : f32 to vector<256x128xf32>
      %22 = arith.addf %21, %20 : vector<256x128xf32>
      %cst_17 = arith.constant 1.000000e+00 : f32
      %23 = vector.broadcast %cst_17 : f32 to vector<256x128xf32>
      %24 = arith.divf %23, %22 : vector<256x128xf32>
      %c0_18 = arith.constant 0 : index
      %c0_19 = arith.constant 0 : index
      %25 = vector.load %arg6[%c0_18, %c0_19] : memref<256x128xf32, #tpu.memory_space<vmem>>, vector<256x128xf32>
      tpu.vector_store %arg6[%c0_18, %c0_19], %24 {strides = array<i32>} : memref<256x128xf32, #tpu.memory_space<vmem>>, vector<256x128xf32>,
    } else {
    }
    return
  }
  func.func @transform_0(%arg0: i32, %arg1: i32, %arg2: i32) -> (i32, i32) {
    %c0_i32 = arith.constant 0 : i32
    return %arg0, %arg2 : i32, i32
  }
  func.func @transform_1(%arg0: i32, %arg1: i32, %arg2: i32) -> (i32, i32) {
    %c0_i32 = arith.constant 0 : i32
    return %arg2, %arg1 : i32, i32
  }
  func.func @transform_2(%arg0: i32, %arg1: i32, %arg2: i32) -> (i32, i32) {
    %c0_i32 = arith.constant 0 : i32
    %c0_i32_0 = arith.constant 0 : i32
    return %c0_i32, %arg1 : i32, i32
  }
  func.func @transform_3(%arg0: i32, %arg1: i32, %arg2: i32) -> (i32, i32) {
    %c0_i32 = arith.constant 0 : i32
    return %arg0, %arg1 : i32, i32
  }
}

</mosaic_0001>

<bundles_post_ra>
// kernel: _lambda_.39
= control target key start
LH: loop header
LB: loop body
LE: loop exit
PB: predicated region body
PF: predicated region fallthrough
CT: control target
= control target key end

     0   :  { %s1180_s12 = smov 0   ;;  %s1182_s13 = smov 0   ;;  %s1330_s0 = inlined_call_operand.vmem [shape: bf16[512,128], index: 0, kind: input, shape index: {}]   ;;  %s1331_s1 = inlined_call_operand.vmem [shape: bf16[128,128], index: 1, kind: input, shape index: {}]   ;;  %s1332_s2 = inlined_call_operand.vmem [shape: f32[1,128], index: 2, kind: input, shape index: {}]   ;;  %s1333_s3 = inlined_call_operand.vmem [shape: f32[512,128], index: 3, kind: output, shape index: {}]  }
   0x1   :  { %s1184_s14 = smov 0  }
   0x2 LB: > { %s32_s15 = sadd.s32 1, %s1154_s13  ;;  %p968_p0 = scmp.ge.s32.totalorder %s1158_s14, 1  ;;  %s1158_s14 = sphi %s1184_s14, %s13_s14   ;;  %s1154_s13 = sphi %s1182_s13, %s1335_s13   ;;  %s1150_s12 = sphi %s1180_s12, %s1334_s12  }
   0x3   : > { %p34_p1 = scmp.ge.s32.totalorder %s32_s15, 2  ;;  %p188_p2 = scmp.lt.s32.totalorder %s1158_s14, 3 }
   0x5   : > { %s1337_s15 = smov (%p34_p1, %s32_s15), 0  ;;  %p189_p3 = pnand %p968_p0, %p188_p2 }
   0x6   : > { %s969_s18 = sshll.u32 (!%p189_p3), %s1150_s12, 5 }
   0x7   : > { %192 = sbr.rel (%p189_p3) target bundleno = 271 (0x10f), region = 32  ;;  %p230_p4 = scmp.lt.s32.totalorder (!%p189_p3), %s969_s18, 63 }
   0xc   : > { %v1112_v0 = vld [vmem:[%s1331_s1 + $0x38] sm:$0xff]   ;;  %v1113_v1 = vld [vmem:[%s1331_s1 + $0x30] sm:$0xff]   ;;  %s1339_s18 = smov (!%p230_p4, %s969_s18), 63  ;;  %v1114_v2 = vld [vmem:[%s1331_s1 + $0x28] sm:$0xff]  }
   0xd   : > { %1024 = vmatprep.subr.bf16.mxu0 %v1112_v0  ;;  %1072 = vmatprep.subr.bf16.mxu1 %v1112_v0  ;;  %s970_s23 = sshll.u32 %s1339_s18, 2  ;;  %v1115_v3 = vld [vmem:[%s1331_s1 + $0x20] sm:$0xff]   ;;  %v1116_v6 = vld [vmem:[%s1331_s1 + $0x18] sm:$0xff]   ;;  %v1117_v7 = vld [vmem:[%s1331_s1 + $0x10] sm:$0xff]   ;;  %s972_s10 = sshll.u32 %s1339_s18, 3 }
   0xe   : > { %1025 = vmatpush3.bf16.msra.mxu0 %v1112_v0  ;;  %1080 = vmatpush3.bf16.msra.mxu1 %v1112_v0  ;;  %s1213_s26 = scalar_lea.vmem %s1330_s0, %s970_s23  ;;  %v1118_v8 = vld [vmem:[%s1331_s1 + $0x8] sm:$0xff]   ;;  %v1119_v9 = vld [vmem:[%s1331_s1] sm:$0xff]   ;;  %s1255_s19 = scalar_lea.vmem %s1333_s3, %s972_s10 }
   0xf   : > { %1026 = vmatprep.subr.bf16.mxu0 %v1113_v1  ;;  %1073 = vmatprep.subr.bf16.mxu1 %v1113_v1  ;;  %v1120_v4 = vld [vmem:[%s1213_s26] sm:$0xff]   ;;  %v1122_v10 = vld [vmem:[%s1213_s26 + $0x8] sm:$0xff]   ;;  %v1124_v12 = vld [vmem:[%s1213_s26 + $0x10] sm:$0xff]  }
  0x10   : > { %v1121_v5 = vld [vmem:[%s1213_s26 + $0x40] sm:$0xff]   ;;  %1040 = vmatprep.mubr.bf16.mxu0 %v1120_v4  ;;  %v1123_v11 = vld [vmem:[%s1213_s26 + $0x48] sm:$0xff]   ;;  %v1125_v13 = vld [vmem:[%s1213_s26 + $0x50] sm:$0xff]  }
  0x11   : > { %1056 = vmatprep.mubr.bf16.mxu1 %v1121_v5  ;;  %v1126_v14 = vld [vmem:[%s1213_s26 + $0x18] sm:$0xff]   ;;  %v1128_v16 = vld [vmem:[%s1213_s26 + $0x20] sm:$0xff]   ;;  %v1130_v18 = vld [vmem:[%s1213_s26 + $0x28] sm:$0xff]  }
  0x12   : > { %1027 = vmatpush3.bf16.msra.mxu0 %v1113_v1  ;;  %1081 = vmatpush3.bf16.msra.mxu1 %v1113_v1  ;;  %v1127_v15 = vld [vmem:[%s1213_s26 + $0x58] sm:$0xff]   ;;  %v1129_v17 = vld [vmem:[%s1213_s26 + $0x60] sm:$0xff]   ;;  %v1131_v19 = vld [vmem:[%s1213_s26 + $0x68] sm:$0xff]  }
  0x13   : > { %1028 = vmatprep.subr.bf16.mxu0 %v1114_v2  ;;  %1074 = vmatprep.subr.bf16.mxu1 %v1114_v2  ;;  %v1132_v20 = vld [vmem:[%s1213_s26 + $0x30] sm:$0xff]   ;;  %v1134_v22 = vld [vmem:[%s1213_s26 + $0x38] sm:$0xff]   ;;  %v1250_v24 = vld [vmem:[%s1332_s2] ss:$0 sm:$0xff] }
  0x14   : > { %v1133_v21 = vld [vmem:[%s1213_s26 + $0x70] sm:$0xff]   ;;  %v1135_v23 = vld [vmem:[%s1213_s26 + $0x78] sm:$0xff]  }
  0x16   : > { %1029 = vmatpush3.bf16.msra.mxu0 %v1114_v2  ;;  %1082 = vmatpush3.bf16.msra.mxu1 %v1114_v2 }
  0x17   : > { %1030 = vmatprep.subr.bf16.mxu0 %v1115_v3  ;;  %1075 = vmatprep.subr.bf16.mxu1 %v1115_v3 }
  0x1a   : > { %1031 = vmatpush3.bf16.msra.mxu0 %v1115_v3  ;;  %1083 = vmatpush3.bf16.msra.mxu1 %v1115_v3 }
  0x1b   : > { %1032 = vmatprep.subr.bf16.mxu0 %v1116_v6  ;;  %1076 = vmatprep.subr.bf16.mxu1 %v1116_v6 }
  0x1e   : > { %1033 = vmatpush3.bf16.msra.mxu0 %v1116_v6  ;;  %1084 = vmatpush3.bf16.msra.mxu1 %v1116_v6 }
  0x1f   : > { %1034 = vmatprep.subr.bf16.mxu0 %v1117_v7  ;;  %1077 = vmatprep.subr.bf16.mxu1 %v1117_v7 }
  0x22   : > { %1035 = vmatpush3.bf16.msra.mxu0 %v1117_v7  ;;  %1085 = vmatpush3.bf16.msra.mxu1 %v1117_v7 }
  0x23   : > { %1036 = vmatprep.subr.bf16.mxu0 %v1118_v8  ;;  %1078 = vmatprep.subr.bf16.mxu1 %v1118_v8 }
  0x26   : > { %1037 = vmatpush3.bf16.msra.mxu0 %v1118_v8  ;;  %1086 = vmatpush3.bf16.msra.mxu1 %v1118_v8 }
  0x27   : > { %1038 = vmatprep.subr.bf16.mxu0 %v1119_v9  ;;  %1079 = vmatprep.subr.bf16.mxu1 %v1119_v9 }
  0x2a   : > { %1039 = vmatpush3.bf16.msra.mxu0 %v1119_v9  ;;  %1087 = vmatpush3.bf16.msra.mxu1 %v1119_v9 }
  0x2d   : > { %1041 = vmatmul.mubr.bf16.vlgmr.msra.gmra.mxu0 %v1122_v10  ;;  %1057 = vmatmul.mubr.bf16.vlgmr.msra.gmra.mxu1 %v1123_v11 }
  0x2e   : > { %1044 = vmatprep.mubr.bf16.mxu0 %v1124_v12  ;;  %1060 = vmatprep.mubr.bf16.mxu1 %v1125_v13 }
  0x35   : > { %1045 = vmatmul.mubr.bf16.gmra.mxu0 %v1126_v14  ;;  %1061 = vmatmul.mubr.bf16.gmra.mxu1 %v1127_v15 }
  0x36   : > { %1048 = vmatprep.mubr.bf16.mxu0 %v1128_v16  ;;  %1064 = vmatprep.mubr.bf16.mxu1 %v1129_v17 }
  0x3d   : > { %1049 = vmatmul.mubr.bf16.gmra.mxu0 %v1130_v18  ;;  %1065 = vmatmul.mubr.bf16.gmra.mxu1 %v1131_v19 }
  0x3e   : > { %1052 = vmatprep.mubr.bf16.mxu0 %v1132_v20  ;;  %1068 = vmatprep.mubr.bf16.mxu1 %v1133_v21 }
  0x45   : > { %1053 = vmatmul.mubr.bf16.gmra.mxu0 %v1134_v22  ;;  %1069 = vmatmul.mubr.bf16.gmra.mxu1 %v1135_v23 }
  0xed   : > { %v1042_v25 = vpop.f32.mrf.mxu0  ;;  %v1058_v26 = vpop.f32.mrf.mxu1 }
  0xee   : > { %v789_v27 = vadd.f32 %v1042_v25, %v1250_v24  ;;  %v805_v28 = vadd.f32 %v1058_v26, %v1250_v24 }
  0xef   : > { %v554_v29 = vpop.f32.mrf.mxu0  ;;  %v618_v30 = vpop.f32.mrf.mxu1 }
  0xf0   : > { %821 = vst [vmem:[%s1255_s19 + $0x10] sm:$0xff] %v789_v27  ;;  %837 = vst [vmem:[%s1255_s19 + $0x90] sm:$0xff] %v805_v28  ;;  %v787_v31 = vadd.f32 %v1250_v24, %v554_v29  ;;  %v803_v32 = vadd.f32 %v1250_v24, %v618_v30 }
  0xf1   : > { %v1043_v33 = vpop.f32.mrf.mxu0  ;;  %v1059_v34 = vpop.f32.mrf.mxu1 }
  0xf2   : > { %819 = vst [vmem:[%s1255_s19] sm:$0xff] %v787_v31  ;;  %835 = vst [vmem:[%s1255_s19 + $0x80] sm:$0xff] %v803_v32  ;;  %v790_v35 = vadd.f32 %v1043_v33, %v1250_v24  ;;  %v806_v36 = vadd.f32 %v1059_v34, %v1250_v24 }
  0xf3   : > { %v557_v37 = vpop.f32.mrf.mxu0  ;;  %v621_v38 = vpop.f32.mrf.mxu1 }
  0xf4   : > { %822 = vst [vmem:[%s1255_s19 + $0x18] sm:$0xff] %v790_v35  ;;  %838 = vst [vmem:[%s1255_s19 + $0x98] sm:$0xff] %v806_v36  ;;  %v788_v39 = vadd.f32 %v1250_v24, %v557_v37  ;;  %v804_v40 = vadd.f32 %v1250_v24, %v621_v38 }
  0xf5   : > { %v1046_v41 = vpop.f32.mrf.mxu0  ;;  %v1062_v42 = vpop.f32.mrf.mxu1 }
  0xf6   : > { %820 = vst [vmem:[%s1255_s19 + $0x8] sm:$0xff] %v788_v39  ;;  %836 = vst [vmem:[%s1255_s19 + $0x88] sm:$0xff] %v804_v40  ;;  %v793_v43 = vadd.f32 %v1046_v41, %v1250_v24  ;;  %v809_v44 = vadd.f32 %v1062_v42, %v1250_v24 }
  0xf7   : > { %v570_v45 = vpop.f32.mrf.mxu0  ;;  %v634_v46 = vpop.f32.mrf.mxu1 }
  0xf8   : > { %825 = vst [vmem:[%s1255_s19 + $0x30] sm:$0xff] %v793_v43  ;;  %841 = vst [vmem:[%s1255_s19 + $0xb0] sm:$0xff] %v809_v44  ;;  %v791_v47 = vadd.f32 %v1250_v24, %v570_v45  ;;  %v807_v48 = vadd.f32 %v1250_v24, %v634_v46 }
  0xf9   : > { %v1047_v49 = vpop.f32.mrf.mxu0  ;;  %v1063_v50 = vpop.f32.mrf.mxu1 }
  0xfa   : > { %823 = vst [vmem:[%s1255_s19 + $0x20] sm:$0xff] %v791_v47  ;;  %839 = vst [vmem:[%s1255_s19 + $0xa0] sm:$0xff] %v807_v48  ;;  %v794_v51 = vadd.f32 %v1047_v49, %v1250_v24  ;;  %v810_v52 = vadd.f32 %v1063_v50, %v1250_v24 }
  0xfb   : > { %v573_v53 = vpop.f32.mrf.mxu0  ;;  %v637_v54 = vpop.f32.mrf.mxu1 }
  0xfc   : > { %826 = vst [vmem:[%s1255_s19 + $0x38] sm:$0xff] %v794_v51  ;;  %842 = vst [vmem:[%s1255_s19 + $0xb8] sm:$0xff] %v810_v52  ;;  %v792_v55 = vadd.f32 %v1250_v24, %v573_v53  ;;  %v808_v56 = vadd.f32 %v1250_v24, %v637_v54 }
  0xfd   : > { %v1050_v57 = vpop.f32.mrf.mxu0  ;;  %v1066_v58 = vpop.f32.mrf.mxu1 }
  0xfe   : > { %824 = vst [vmem:[%s1255_s19 + $0x28] sm:$0xff] %v792_v55  ;;  %840 = vst [vmem:[%s1255_s19 + $0xa8] sm:$0xff] %v808_v56  ;;  %v797_v59 = vadd.f32 %v1050_v57, %v1250_v24  ;;  %v813_v60 = vadd.f32 %v1066_v58, %v1250_v24 }
  0xff   : > { %v586_v61 = vpop.f32.mrf.mxu0  ;;  %v650_v62 = vpop.f32.mrf.mxu1 }
 0x100   : > { %829 = vst [vmem:[%s1255_s19 + $0x50] sm:$0xff] %v797_v59  ;;  %845 = vst [vmem:[%s1255_s19 + $0xd0] sm:$0xff] %v813_v60  ;;  %v795_v63 = vadd.f32 %v1250_v24, %v586_v61  ;;  %v811_v0 = vadd.f32 %v1250_v24, %v650_v62 }
 0x101   : > { %v1051_v1 = vpop.f32.mrf.mxu0  ;;  %v1067_v2 = vpop.f32.mrf.mxu1 }
 0x102   : > { %827 = vst [vmem:[%s1255_s19 + $0x40] sm:$0xff] %v795_v63  ;;  %843 = vst [vmem:[%s1255_s19 + $0xc0] sm:$0xff] %v811_v0  ;;  %v798_v3 = vadd.f32 %v1051_v1, %v1250_v24  ;;  %v814_v4 = vadd.f32 %v1067_v2, %v1250_v24 }
 0x103   : > { %v589_v5 = vpop.f32.mrf.mxu0  ;;  %v653_v6 = vpop.f32.mrf.mxu1 }
 0x104   : > { %830 = vst [vmem:[%s1255_s19 + $0x58] sm:$0xff] %v798_v3  ;;  %846 = vst [vmem:[%s1255_s19 + $0xd8] sm:$0xff] %v814_v4  ;;  %v796_v7 = vadd.f32 %v1250_v24, %v589_v5  ;;  %v812_v8 = vadd.f32 %v1250_v24, %v653_v6 }
 0x105   : > { %v1054_v9 = vpop.f32.mrf.mxu0  ;;  %v1070_v10 = vpop.f32.mrf.mxu1 }
 0x106   : > { %828 = vst [vmem:[%s1255_s19 + $0x48] sm:$0xff] %v796_v7  ;;  %844 = vst [vmem:[%s1255_s19 + $0xc8] sm:$0xff] %v812_v8  ;;  %v801_v11 = vadd.f32 %v1054_v9, %v1250_v24  ;;  %v817_v12 = vadd.f32 %v1070_v10, %v1250_v24 }
 0x107   : > { %v602_v13 = vpop.f32.mrf.mxu0  ;;  %v666_v14 = vpop.f32.mrf.mxu1 }
 0x108   : > { %833 = vst [vmem:[%s1255_s19 + $0x70] sm:$0xff] %v801_v11  ;;  %849 = vst [vmem:[%s1255_s19 + $0xf0] sm:$0xff] %v817_v12  ;;  %v799_v15 = vadd.f32 %v1250_v24, %v602_v13  ;;  %v815_v16 = vadd.f32 %v1250_v24, %v666_v14 }
 0x109   : > { %v1055_v17 = vpop.f32.mrf.mxu0  ;;  %v1071_v18 = vpop.f32.mrf.mxu1 }
 0x10a   : > { %831 = vst [vmem:[%s1255_s19 + $0x60] sm:$0xff] %v799_v15  ;;  %847 = vst [vmem:[%s1255_s19 + $0xe0] sm:$0xff] %v815_v16  ;;  %v802_v19 = vadd.f32 %v1055_v17, %v1250_v24  ;;  %v818_v20 = vadd.f32 %v1071_v18, %v1250_v24 }
 0x10b   : > { %v605_v21 = vpop.f32.mrf.mxu0  ;;  %v669_v22 = vpop.f32.mrf.mxu1 }
 0x10c   : > { %834 = vst [vmem:[%s1255_s19 + $0x78] sm:$0xff] %v802_v19  ;;  %850 = vst [vmem:[%s1255_s19 + $0xf8] sm:$0xff] %v818_v20  ;;  %v800_v23 = vadd.f32 %v1250_v24, %v605_v21  ;;  %v816_v25 = vadd.f32 %v1250_v24, %v669_v22 }
 0x10e   : > { %832 = vst [vmem:[%s1255_s19 + $0x68] sm:$0xff] %v800_v23  ;;  %848 = vst [vmem:[%s1255_s19 + $0xe8] sm:$0xff] %v816_v25 }
 0x10f PF: > { %s13_s14 = sadd.s32 1, %s1158_s14   ;;  %s1334_s12 = smov %s1154_s13 }
 0x110   : > { %p10_p5 = scmp.ge.s32.totalorder %s13_s14, 4   ;;  %s1335_s13 = smov %s1337_s15 }
 0x112   :  { %12 = sbr.rel (!%p10_p5) target bundleno = 2 (0x2), region = 76 }

// kernel: _lambda_.40
= control target key start
LH: loop header
LB: loop body
LE: loop exit
PB: predicated region body
PF: predicated region fallthrough
CT: control target
= control target key end

     0   :  { %s655_s1 = inlined_call_operand.vmem [shape: bf16[128,128], index: 1, kind: input, shape index: {}]   ;;  %s656_s0 = inlined_call_operand.vmem [shape: bf16[128,128], index: 0, kind: input, shape index: {}]   ;;  %s657_s2 = inlined_call_operand.vmem [shape: f32[1,128], index: 2, kind: input, shape index: {}]   ;;  %s658_s3 = inlined_call_operand.vmem [shape: f32[128,128], index: 3, kind: output, shape index: {}]  }
   0x1   :  { %v500_v0 = vld [vmem:[%s655_s1 + $0x38] sm:$0xff]   ;;  %v501_v1 = vld [vmem:[%s655_s1 + $0x30] sm:$0xff]   ;;  %v502_v2 = vld [vmem:[%s655_s1 + $0x28] sm:$0xff]  }
   0x2   :  { %452 = vmatprep.subr.bf16.mxu0 %v500_v0  ;;  %484 = vmatprep.subr.bf16.mxu1 %v500_v0  ;;  %v503_v3 = vld [vmem:[%s655_s1 + $0x20] sm:$0xff]   ;;  %v504_v14 = vld [vmem:[%s655_s1 + $0x18] sm:$0xff]   ;;  %v505_v19 = vld [vmem:[%s655_s1 + $0x10] sm:$0xff]  }
   0x3   :  { %453 = vmatpush3.bf16.msra.mxu0 %v500_v0  ;;  %492 = vmatpush3.bf16.msra.mxu1 %v500_v0  ;;  %v36_v4 = vld [vmem:[%s656_s0] sm:$0xf]  ;;  %v37_v5 = vld [vmem:[%s656_s0 + $0x4] sm:$0xf]  ;;  %v38_v20 = vld [vmem:[%s656_s0 + $0x8] sm:$0xf] }
   0x4   :  { %454 = vmatprep.subr.bf16.mxu0 %v501_v1  ;;  %485 = vmatprep.subr.bf16.mxu1 %v501_v1  ;;  %v44_v6 = vld [vmem:[%s656_s0 + $0x20] sm:$0xf]  ;;  %vm52_vm0 = vcmp.ge.bf16.partialorder %v36_v4, 0  ;;  %vm53_vm1 = vcmp.ge.bf16.partialorder %v37_v5, 0  ;;  %v68_v7 = vmul.bf16 1045249613, %v36_v4 }
   0x5   :  { %v69_v8 = vmul.bf16 1045249613, %v37_v5  ;;  %v45_v9 = vld [vmem:[%s656_s0 + $0x24] sm:$0xf]  ;;  %vm60_vm2 = vcmp.ge.bf16.partialorder %v44_v6, 0  ;;  %v506_v22 = vld [vmem:[%s655_s1 + $0x8] sm:$0xff]  }
   0x6   :  { %v76_v10 = vmul.bf16 1045249613, %v44_v6  ;;  %v84_v11 = vsel %vm52_vm0, %v36_v4, %v68_v7  ;;  %vm61_vm3 = vcmp.ge.bf16.partialorder %v45_v9, 0  ;;  %v77_v13 = vmul.bf16 1045249613, %v45_v9  ;;  %v507_v30 = vld [vmem:[%s655_s1] sm:$0xff]  }
   0x7   :  { %455 = vmatpush3.bf16.msra.mxu0 %v501_v1  ;;  %493 = vmatpush3.bf16.msra.mxu1 %v501_v1  ;;  %v85_v12 = vsel %vm53_vm1, %v37_v5, %v69_v8  ;;  %v39_v21 = vld [vmem:[%s656_s0 + $0xc] sm:$0xf]  ;;  %v46_v23 = vld [vmem:[%s656_s0 + $0x28] sm:$0xf]  ;;  %v70_v25 = vmul.bf16 1045249613, %v38_v20 }
   0x8   :  { %456 = vmatprep.subr.bf16.mxu0 %v502_v2  ;;  %486 = vmatprep.subr.bf16.mxu1 %v502_v2  ;;  %v419_v15 = vcombine.low %v84_v11, %v85_v12  ;;  %v92_v16 = vsel %vm60_vm2, %v44_v6, %v76_v10  ;;  %v93_v17 = vsel %vm61_vm3, %v45_v9, %v77_v13  ;;  %v47_v24 = vld [vmem:[%s656_s0 + $0x2c] sm:$0xf]  ;;  %v40_v26 = vld [vmem:[%s656_s0 + $0x10] sm:$0xf]  ;;  %v41_v27 = vld [vmem:[%s656_s0 + $0x14] sm:$0xf] }
   0x9   :  { %v423_v18 = vcombine.low %v92_v16, %v93_v17  ;;  %vm54_vm4 = vcmp.ge.bf16.partialorder %v38_v20, 0  ;;  %vm55_vm5 = vcmp.ge.bf16.partialorder %v39_v21, 0  ;;  %v48_v28 = vld [vmem:[%s656_s0 + $0x30] sm:$0xf]  ;;  %v49_v29 = vld [vmem:[%s656_s0 + $0x34] sm:$0xf] }
   0xa   :  { %468 = vmatprep.mubr.bf16.mxu0 %v419_v15  ;;  %v71_v31 = vmul.bf16 1045249613, %v39_v21  ;;  %vm62_vm6 = vcmp.ge.bf16.partialorder %v46_v23, 0  ;;  %vm63_vm7 = vcmp.ge.bf16.partialorder %v47_v24, 0  ;;  %v78_v32 = vmul.bf16 1045249613, %v46_v23 }
   0xb   :  { %457 = vmatpush3.bf16.msra.mxu0 %v502_v2  ;;  %494 = vmatpush3.bf16.msra.mxu1 %v502_v2  ;;  %v79_v33 = vmul.bf16 1045249613, %v47_v24  ;;  %v72_v34 = vmul.bf16 1045249613, %v40_v26  ;;  %v73_v35 = vmul.bf16 1045249613, %v41_v27  ;;  %v86_v38 = vsel %vm54_vm4, %v38_v20, %v70_v25 }
   0xc   :  { %458 = vmatprep.subr.bf16.mxu0 %v503_v3  ;;  %487 = vmatprep.subr.bf16.mxu1 %v503_v3  ;;  %vm56_vm8 = vcmp.ge.bf16.partialorder %v40_v26, 0  ;;  %vm57_vm9 = vcmp.ge.bf16.partialorder %v41_v27, 0  ;;  %v80_v36 = vmul.bf16 1045249613, %v48_v28  ;;  %v81_v37 = vmul.bf16 1045249613, %v49_v29 }
   0xd   :  { %476 = vmatprep.mubr.bf16.mxu1 %v423_v18  ;;  %vm64_vm10 = vcmp.ge.bf16.partialorder %v48_v28, 0  ;;  %vm65_vm11 = vcmp.ge.bf16.partialorder %v49_v29, 0  ;;  %v87_v39 = vsel %vm55_vm5, %v39_v21, %v71_v31  ;;  %v94_v40 = vsel %vm62_vm6, %v46_v23, %v78_v32  ;;  %v42_v44 = vld [vmem:[%s656_s0 + $0x18] sm:$0xf]  ;;  %v43_v47 = vld [vmem:[%s656_s0 + $0x1c] sm:$0xf] }
   0xe   :  { %v95_v41 = vsel %vm63_vm7, %v47_v24, %v79_v33  ;;  %v88_v42 = vsel %vm56_vm8, %v40_v26, %v72_v34  ;;  %v89_v43 = vsel %vm57_vm9, %v41_v27, %v73_v35  ;;  %v96_v45 = vsel %vm64_vm10, %v48_v28, %v80_v36  ;;  %v50_v48 = vld [vmem:[%s656_s0 + $0x38] sm:$0xf]  ;;  %v51_v49 = vld [vmem:[%s656_s0 + $0x3c] sm:$0xf]  ;;  %v435_v0 = vld [vmem:[%s657_s2] ss:$0 sm:$0xff] }
   0xf   :  { %459 = vmatpush3.bf16.msra.mxu0 %v503_v3  ;;  %495 = vmatpush3.bf16.msra.mxu1 %v503_v3  ;;  %v97_v46 = vsel %vm65_vm11, %v49_v29, %v81_v37  ;;  %v420_v50 = vcombine.low %v86_v38, %v87_v39  ;;  %v424_v51 = vcombine.low %v94_v40, %v95_v41  ;;  %vm58_vm12 = vcmp.ge.bf16.partialorder %v42_v44, 0 }
  0x10   :  { %460 = vmatprep.subr.bf16.mxu0 %v504_v14  ;;  %488 = vmatprep.subr.bf16.mxu1 %v504_v14  ;;  %v421_v52 = vcombine.low %v88_v42, %v89_v43  ;;  %v74_v53 = vmul.bf16 1045249613, %v42_v44  ;;  %v425_v54 = vcombine.low %v96_v45, %v97_v46  ;;  %v75_v55 = vmul.bf16 1045249613, %v43_v47 }
  0x11   :  { %v82_v56 = vmul.bf16 1045249613, %v50_v48  ;;  %v83_v57 = vmul.bf16 1045249613, %v51_v49  ;;  %vm59_vm13 = vcmp.ge.bf16.partialorder %v43_v47, 0  ;;  %vm66_vm14 = vcmp.ge.bf16.partialorder %v50_v48, 0 }
  0x12   :  { %vm67_vm15 = vcmp.ge.bf16.partialorder %v51_v49, 0  ;;  %v90_v58 = vsel %vm58_vm12, %v42_v44, %v74_v53  ;;  %v91_v59 = vsel %vm59_vm13, %v43_v47, %v75_v55 }
  0x13   :  { %461 = vmatpush3.bf16.msra.mxu0 %v504_v14  ;;  %496 = vmatpush3.bf16.msra.mxu1 %v504_v14  ;;  %v98_v60 = vsel %vm66_vm14, %v50_v48, %v82_v56  ;;  %v99_v61 = vsel %vm67_vm15, %v51_v49, %v83_v57  ;;  %v422_v62 = vcombine.low %v90_v58, %v91_v59 }
  0x14   :  { %462 = vmatprep.subr.bf16.mxu0 %v505_v19  ;;  %489 = vmatprep.subr.bf16.mxu1 %v505_v19  ;;  %v426_v63 = vcombine.low %v98_v60, %v99_v61 }
  0x17   :  { %463 = vmatpush3.bf16.msra.mxu0 %v505_v19  ;;  %497 = vmatpush3.bf16.msra.mxu1 %v505_v19 }
  0x18   :  { %464 = vmatprep.subr.bf16.mxu0 %v506_v22  ;;  %490 = vmatprep.subr.bf16.mxu1 %v506_v22 }
  0x1b   :  { %465 = vmatpush3.bf16.msra.mxu0 %v506_v22  ;;  %498 = vmatpush3.bf16.msra.mxu1 %v506_v22 }
  0x1c   :  { %466 = vmatprep.subr.bf16.mxu0 %v507_v30  ;;  %491 = vmatprep.subr.bf16.mxu1 %v507_v30 }
  0x1f   :  { %467 = vmatpush3.bf16.msra.mxu0 %v507_v30  ;;  %499 = vmatpush3.bf16.msra.mxu1 %v507_v30 }
  0x22   :  { %469 = vmatmul.mubr.bf16.vlgmr.msra.gmra.mxu0 %v420_v50  ;;  %477 = vmatmul.mubr.bf16.vlgmr.msra.gmra.mxu1 %v424_v51 }
  0x23   :  { %472 = vmatprep.mubr.bf16.mxu0 %v421_v52  ;;  %480 = vmatprep.mubr.bf16.mxu1 %v425_v54 }
  0x2a   :  { %473 = vmatmul.mubr.bf16.gmra.mxu0 %v422_v62  ;;  %481 = vmatmul.mubr.bf16.gmra.mxu1 %v426_v63 }
  0xe2   :  { %v470_v1 = vpop.f32.mrf.mxu0  ;;  %v478_v2 = vpop.f32.mrf.mxu1 }
  0xe3   :  { %v385_v3 = vadd.f32 %v470_v1, %v435_v0  ;;  %v393_v4 = vadd.f32 %v478_v2, %v435_v0 }
  0xe4   :  { %v262_v5 = vpop.f32.mrf.mxu0  ;;  %v294_v6 = vpop.f32.mrf.mxu1 }
  0xe5   :  { %401 = vst [vmem:[%s658_s3 + $0x10] sm:$0xff] %v385_v3  ;;  %409 = vst [vmem:[%s658_s3 + $0x50] sm:$0xff] %v393_v4  ;;  %v383_v7 = vadd.f32 %v435_v0, %v262_v5  ;;  %v391_v8 = vadd.f32 %v435_v0, %v294_v6 }
  0xe6   :  { %v471_v9 = vpop.f32.mrf.mxu0  ;;  %v479_v10 = vpop.f32.mrf.mxu1 }
  0xe7   :  { %399 = vst [vmem:[%s658_s3] sm:$0xff] %v383_v7  ;;  %407 = vst [vmem:[%s658_s3 + $0x40] sm:$0xff] %v391_v8  ;;  %v386_v11 = vadd.f32 %v471_v9, %v435_v0  ;;  %v394_v12 = vadd.f32 %v479_v10, %v435_v0 }
  0xe8   :  { %v265_v13 = vpop.f32.mrf.mxu0  ;;  %v297_v14 = vpop.f32.mrf.mxu1 }
  0xe9   :  { %402 = vst [vmem:[%s658_s3 + $0x18] sm:$0xff] %v386_v11  ;;  %410 = vst [vmem:[%s658_s3 + $0x58] sm:$0xff] %v394_v12  ;;  %v384_v15 = vadd.f32 %v435_v0, %v265_v13  ;;  %v392_v16 = vadd.f32 %v435_v0, %v297_v14 }
  0xea   :  { %v474_v17 = vpop.f32.mrf.mxu0  ;;  %v482_v18 = vpop.f32.mrf.mxu1 }
  0xeb   :  { %400 = vst [vmem:[%s658_s3 + $0x8] sm:$0xff] %v384_v15  ;;  %408 = vst [vmem:[%s658_s3 + $0x48] sm:$0xff] %v392_v16  ;;  %v389_v19 = vadd.f32 %v474_v17, %v435_v0  ;;  %v397_v20 = vadd.f32 %v482_v18, %v435_v0 }
  0xec   :  { %v278_v21 = vpop.f32.mrf.mxu0  ;;  %v310_v22 = vpop.f32.mrf.mxu1 }
  0xed   :  { %405 = vst [vmem:[%s658_s3 + $0x30] sm:$0xff] %v389_v19  ;;  %413 = vst [vmem:[%s658_s3 + $0x70] sm:$0xff] %v397_v20  ;;  %v387_v23 = vadd.f32 %v435_v0, %v278_v21  ;;  %v395_v24 = vadd.f32 %v435_v0, %v310_v22 }
  0xee   :  { %v475_v25 = vpop.f32.mrf.mxu0  ;;  %v483_v26 = vpop.f32.mrf.mxu1 }
  0xef   :  { %403 = vst [vmem:[%s658_s3 + $0x20] sm:$0xff] %v387_v23  ;;  %411 = vst [vmem:[%s658_s3 + $0x60] sm:$0xff] %v395_v24  ;;  %v390_v27 = vadd.f32 %v475_v25, %v435_v0  ;;  %v398_v28 = vadd.f32 %v483_v26, %v435_v0 }
  0xf0   :  { %v281_v29 = vpop.f32.mrf.mxu0  ;;  %v313_v30 = vpop.f32.mrf.mxu1 }
  0xf1   :  { %406 = vst [vmem:[%s658_s3 + $0x38] sm:$0xff] %v390_v27  ;;  %414 = vst [vmem:[%s658_s3 + $0x78] sm:$0xff] %v398_v28  ;;  %v388_v31 = vadd.f32 %v435_v0, %v281_v29  ;;  %v396_v32 = vadd.f32 %v435_v0, %v313_v30 }
  0xf3   :  { %404 = vst [vmem:[%s658_s3 + $0x28] sm:$0xff] %v388_v31  ;;  %412 = vst [vmem:[%s658_s3 + $0x68] sm:$0xff] %v396_v32 }

// kernel: _lambda_.41
= control target key start
LH: loop header
LB: loop body
LE: loop exit
PB: predicated region body
PF: predicated region fallthrough
CT: control target
= control target key end

     0   :  { %vm14_vm0 = vcmask 122880   ;;  %vm34_vm1 = vcmask 130048   ;;  %v140_v0 = vmov 0.0   ;;  %s258_s0 = inlined_call_operand.vmem [shape: f32[128,16], index: 0, kind: input, shape index: {}]   ;;  %s259_s1 = inlined_call_operand.vmem [shape: f32[1,16], index: 1, kind: output, shape index: {0}]   ;;  %s260_s2 = inlined_call_operand.vmem [shape: f32[1,16], index: 2, kind: output, shape index: {1}]  }
   0x1   :  { %15 = vst.msk [vmem:[%s259_s1] sm:$0x1] %vm14_vm0, %v140_v0  ;;  %v17_v1 = vld [vmem:[%s258_s0] sm:$0xff]  ;;  %v18_v2 = vld [vmem:[%s258_s0 + $0x8] sm:$0xff]  ;;  %v19_v3 = vld [vmem:[%s258_s0 + $0x10] sm:$0xff] }
   0x2   :  { %16 = vst.msk [vmem:[%s260_s2] sm:$0x1] %vm14_vm0, %v140_v0  ;;  %v35_v4 = vsel %vm34_vm1, %v17_v1, 0.0  ;;  %v36_v5 = vsel %vm34_vm1, %v18_v2, 0.0  ;;  %v38_v6 = vsel %vm34_vm1, %v19_v3, 0.0  ;;  %v20_v7 = vld [vmem:[%s258_s0 + $0x18] sm:$0xff]  ;;  %v76_v15 = vmul.f32 %v17_v1, %v17_v1 }
   0x3   :  { %v37_v8 = vadd.f32 %v36_v5, %v35_v4  ;;  %v40_v9 = vsel %vm34_vm1, %v20_v7, 0.0  ;;  %v21_v10 = vld [vmem:[%s258_s0 + $0x20] sm:$0xff]  ;;  %v22_v13 = vld [vmem:[%s258_s0 + $0x28] sm:$0xff]  ;;  %v77_v16 = vmul.f32 %v18_v2, %v18_v2  ;;  %v78_v17 = vmul.f32 %v19_v3, %v19_v3  ;;  %v23_v19 = vld [vmem:[%s258_s0 + $0x30] sm:$0xff] }
   0x4   :  { %v42_v12 = vsel %vm34_vm1, %v21_v10, 0.0  ;;  %v44_v18 = vsel %vm34_vm1, %v22_v13, 0.0  ;;  %v79_v21 = vmul.f32 %v20_v7, %v20_v7  ;;  %v46_v22 = vsel %vm34_vm1, %v23_v19, 0.0  ;;  %v24_v24 = vld [vmem:[%s258_s0 + $0x38] sm:$0xff]  ;;  %v25_v31 = vld [vmem:[%s258_s0 + $0x40] sm:$0xff]  ;;  %v26_v37 = vld [vmem:[%s258_s0 + $0x48] sm:$0xff] }
   0x5   :  { %v39_v11 = vadd.f32 %v38_v6, %v37_v8  ;;  %v80_v23 = vmul.f32 %v21_v10, %v21_v10  ;;  %v92_v26 = vsel %vm34_vm1, %v76_v15, 0.0  ;;  %v93_v27 = vsel %vm34_vm1, %v77_v16, 0.0  ;;  %v27_v43 = vld [vmem:[%s258_s0 + $0x50] sm:$0xff]  ;;  %v28_v49 = vld [vmem:[%s258_s0 + $0x58] sm:$0xff]  ;;  %v29_v55 = vld [vmem:[%s258_s0 + $0x60] sm:$0xff] }
   0x6   :  { %v95_v28 = vsel %vm34_vm1, %v78_v17, 0.0  ;;  %v48_v29 = vsel %vm34_vm1, %v24_v24, 0.0  ;;  %v94_v30 = vadd.f32 %v93_v27, %v92_v26  ;;  %v81_v33 = vmul.f32 %v22_v13, %v22_v13  ;;  %v30_v61 = vld [vmem:[%s258_s0 + $0x68] sm:$0xff]  ;;  %v31_v3 = vld [vmem:[%s258_s0 + $0x70] sm:$0xff] }
   0x7   :  { %v41_v14 = vadd.f32 %v40_v9, %v39_v11  ;;  %v97_v34 = vsel %vm34_vm1, %v79_v21, 0.0  ;;  %v50_v35 = vsel %vm34_vm1, %v25_v31, 0.0  ;;  %v82_v39 = vmul.f32 %v23_v19, %v23_v19  ;;  %v32_v9 = vld [vmem:[%s258_s0 + $0x78] sm:$0xff] }
   0x8   :  { %v96_v36 = vadd.f32 %v95_v28, %v94_v30  ;;  %v99_v40 = vsel %vm34_vm1, %v80_v23, 0.0  ;;  %v52_v41 = vsel %vm34_vm1, %v26_v37, 0.0  ;;  %v83_v45 = vmul.f32 %v24_v24, %v24_v24 }
   0x9   :  { %v43_v20 = vadd.f32 %v42_v12, %v41_v14  ;;  %v101_v46 = vsel %vm34_vm1, %v81_v33, 0.0  ;;  %v54_v47 = vsel %vm34_vm1, %v27_v43, 0.0  ;;  %v84_v51 = vmul.f32 %v25_v31, %v25_v31 }
   0xa   :  { %v98_v42 = vadd.f32 %v97_v34, %v96_v36  ;;  %v103_v52 = vsel %vm34_vm1, %v82_v39, 0.0  ;;  %v56_v53 = vsel %vm34_vm1, %v28_v49, 0.0  ;;  %v85_v57 = vmul.f32 %v26_v37, %v26_v37  ;;  %v33_v36 = vld [vmem:[%s259_s1] sm:$0x1] }
   0xb   :  { %v45_v25 = vadd.f32 %v44_v18, %v43_v20  ;;  %v105_v58 = vsel %vm34_vm1, %v83_v45, 0.0  ;;  %v58_v59 = vsel %vm34_vm1, %v29_v55, 0.0  ;;  %v86_v63 = vmul.f32 %v27_v43, %v27_v43 }
   0xc   :  { %v100_v48 = vadd.f32 %v99_v40, %v98_v42  ;;  %v107_v0 = vsel %vm34_vm1, %v84_v51, 0.0  ;;  %v60_v1 = vsel %vm34_vm1, %v30_v61, 0.0  ;;  %v87_v5 = vmul.f32 %v28_v49, %v28_v49 }
   0xd   :  { %v47_v32 = vadd.f32 %v46_v22, %v45_v25  ;;  %v109_v6 = vsel %vm34_vm1, %v85_v57, 0.0  ;;  %v62_v7 = vsel %vm34_vm1, %v31_v3, 0.0  ;;  %v88_v11 = vmul.f32 %v29_v55, %v29_v55 }
   0xe   :  { %v102_v54 = vadd.f32 %v101_v46, %v100_v48  ;;  %v111_v12 = vsel %vm34_vm1, %v86_v63, 0.0  ;;  %v64_v13 = vsel %vm34_vm1, %v32_v9, 0.0  ;;  %v89_v16 = vmul.f32 %v30_v61, %v30_v61 }
   0xf   :  { %v49_v38 = vadd.f32 %v48_v29, %v47_v32  ;;  %v113_v17 = vsel %vm34_vm1, %v87_v5, 0.0  ;;  %v90_v20 = vmul.f32 %v31_v3, %v31_v3  ;;  %v115_v21 = vsel %vm34_vm1, %v88_v11, 0.0 }
  0x10   :  { %v104_v60 = vadd.f32 %v103_v52, %v102_v54  ;;  %v91_v24 = vmul.f32 %v32_v9, %v32_v9  ;;  %v117_v25 = vsel %vm34_vm1, %v89_v16, 0.0 }
  0x11   :  { %v51_v44 = vadd.f32 %v50_v35, %v49_v38  ;;  %v119_v28 = vsel %vm34_vm1, %v90_v20, 0.0 }
  0x12   :  { %v106_v2 = vadd.f32 %v105_v58, %v104_v60  ;;  %v121_v31 = vsel %vm34_vm1, %v91_v24, 0.0 }
  0x13   :  { %v53_v50 = vadd.f32 %v52_v41, %v51_v44  ;;  %v75_v44 = vld [vmem:[%s260_s2] sm:$0x1] }
  0x14   :  { %v108_v8 = vadd.f32 %v107_v0, %v106_v2 }
  0x15   :  { %v55_v56 = vadd.f32 %v54_v47, %v53_v50 }
  0x16   :  { %v110_v14 = vadd.f32 %v109_v6, %v108_v8 }
  0x17   :  { %v57_v62 = vadd.f32 %v56_v53, %v55_v56 }
  0x18   :  { %v112_v18 = vadd.f32 %v111_v12, %v110_v14 }
  0x19   :  { %v59_v4 = vadd.f32 %v58_v59, %v57_v62 }
  0x1a   :  { %v114_v22 = vadd.f32 %v113_v17, %v112_v18 }
  0x1b   :  { %v61_v10 = vadd.f32 %v60_v1, %v59_v4 }
  0x1c   :  { %v116_v26 = vadd.f32 %v115_v21, %v114_v22 }
  0x1d   :  { %v63_v15 = vadd.f32 %v62_v7, %v61_v10 }
  0x1e   :  { %v118_v29 = vadd.f32 %v117_v25, %v116_v26 }
  0x1f   :  { %v65_v19 = vadd.f32 %v64_v13, %v63_v15 }
  0x20   :  { %v120_v32 = vadd.f32 %v119_v28, %v118_v29 }
  0x21   :  { %v66_v23 = vrot.slane %v65_v19, 4 }
  0x22   :  { %v122_v34 = vadd.f32 %v121_v31, %v120_v32 }
  0x23   :  { %v67_v27 = vadd.f32 %v66_v23, %v65_v19 }
  0x24   :  { %v123_v37 = vrot.slane %v122_v34, 4 }
  0x25   :  { %v68_v30 = vrot.slane %v67_v27, 2 }
  0x26   :  { %v124_v39 = vadd.f32 %v123_v37, %v122_v34 }
  0x27   :  { %v69_v33 = vadd.f32 %v68_v30, %v67_v27 }
  0x28   :  { %v125_v41 = vrot.slane %v124_v39, 2 }
  0x29   :  { %v70_v35 = vrot.slane %v69_v33, 1 }
  0x2a   :  { %v126_v42 = vadd.f32 %v125_v41, %v124_v39 }
  0x2b   :  { %v71_v38 = vadd.f32 %v70_v35, %v69_v33 }
  0x2c   :  { %v127_v43 = vrot.slane %v126_v42, 1 }
  0x2d   :  { %v72_v40 = vadd.f32 %v71_v38, %v33_v36 }
  0x2e   :  { %v128_v45 = vadd.f32 %v127_v43, %v126_v42 }
  0x2f   :  { %74 = vst.msk [vmem:[%s259_s1] sm:$0x1] %vm14_vm0, %v72_v40 }
  0x30   :  { %v129_v46 = vadd.f32 %v128_v45, %v75_v44 }
  0x32   :  { %130 = vst.msk [vmem:[%s260_s2] sm:$0x1] %vm14_vm0, %v129_v46 }

// kernel: _lambda_.42
= control target key start
LH: loop header
LB: loop body
LE: loop exit
PB: predicated region body
PF: predicated region fallthrough
CT: control target
= control target key end

     0   :  { %vm76_vm0 = vcmask 130048   ;;  %s237_s0 = inlined_call_operand.vmem [shape: f32[128,16], index: 0, kind: input, shape index: {}]   ;;  %s238_s1 = inlined_call_operand.vmem [shape: f32[1,16], index: 1, kind: input, shape index: {}]   ;;  %s239_s2 = inlined_call_operand.vmem [shape: f32[1,16], index: 2, kind: input, shape index: {}]   ;;  %s240_s3 = inlined_call_operand.vmem [shape: f32[128,16], index: 3, kind: output, shape index: {}]  }
   0x1   :  { %v14_v0 = vld [vmem:[%s237_s0] sm:$0xff]  ;;  %v15_v4 = vld [vmem:[%s237_s0 + $0x8] sm:$0xff]  ;;  %v16_v5 = vld [vmem:[%s237_s0 + $0x10] sm:$0xff] }
   0x2   :  { %v97_v1 = vld [vmem:[%s238_s1] ss:$0 sm:$0xff]  ;;  %v17_v6 = vld [vmem:[%s237_s0 + $0x18] sm:$0xff]  ;;  %v19_v11 = vld [vmem:[%s237_s0 + $0x28] sm:$0xff] }
   0x3   :  { %v98_v2 = vld [vmem:[%s239_s2] ss:$0 sm:$0xff]  ;;  %v37_v3 = vmul.f32 %v97_v1, %v14_v0  ;;  %v38_v7 = vmul.f32 %v97_v1, %v15_v4  ;;  %v39_v8 = vmul.f32 %v97_v1, %v16_v5  ;;  %v40_v9 = vmul.f32 %v97_v1, %v17_v6  ;;  %v20_v12 = vld [vmem:[%s237_s0 + $0x30] sm:$0xff]  ;;  %v21_v17 = vld [vmem:[%s237_s0 + $0x38] sm:$0xff] }
   0x4   :  { %v18_v10 = vld [vmem:[%s237_s0 + $0x20] sm:$0xff]  ;;  %v42_v15 = vmul.f32 %v97_v1, %v19_v11  ;;  %v43_v16 = vmul.f32 %v97_v1, %v20_v12  ;;  %v23_v19 = vld [vmem:[%s237_s0 + $0x48] sm:$0xff]  ;;  %v44_v23 = vmul.f32 %v97_v1, %v21_v17  ;;  %v24_v24 = vld [vmem:[%s237_s0 + $0x50] sm:$0xff] }
   0x5   :  { %v60_v13 = vadd.f32 %v98_v2, %v37_v3  ;;  %v41_v14 = vmul.f32 %v97_v1, %v18_v10  ;;  %v22_v18 = vld [vmem:[%s237_s0 + $0x40] sm:$0xff]  ;;  %v61_v20 = vadd.f32 %v98_v2, %v38_v7  ;;  %v62_v21 = vadd.f32 %v98_v2, %v39_v8  ;;  %v25_v25 = vld [vmem:[%s237_s0 + $0x58] sm:$0xff]  ;;  %v27_v31 = vld [vmem:[%s237_s0 + $0x68] sm:$0xff] }
   0x6   :  { %v63_v22 = vadd.f32 %v98_v2, %v40_v9  ;;  %v26_v26 = vld [vmem:[%s237_s0 + $0x60] sm:$0xff]  ;;  %v65_v28 = vadd.f32 %v98_v2, %v42_v15  ;;  %v66_v29 = vadd.f32 %v98_v2, %v43_v16  ;;  %v45_v30 = vmul.f32 %v97_v1, %v22_v18  ;;  %v28_v32 = vld [vmem:[%s237_s0 + $0x70] sm:$0xff]  ;;  %v29_v33 = vld [vmem:[%s237_s0 + $0x78] sm:$0xff] }
   0x7   :  { %77 = vst.msk [vmem:[%s240_s3] sm:$0xff] %vm76_vm0, %v60_v13  ;;  %v64_v27 = vadd.f32 %v98_v2, %v41_v14  ;;  %78 = vst.msk [vmem:[%s240_s3 + $0x8] sm:$0xff] %vm76_vm0, %v61_v20  ;;  %v67_v34 = vadd.f32 %v98_v2, %v44_v23  ;;  %v46_v35 = vmul.f32 %v97_v1, %v23_v19 }
   0x8   :  { %79 = vst.msk [vmem:[%s240_s3 + $0x10] sm:$0xff] %vm76_vm0, %v62_v21  ;;  %80 = vst.msk [vmem:[%s240_s3 + $0x18] sm:$0xff] %vm76_vm0, %v63_v22  ;;  %v47_v36 = vmul.f32 %v97_v1, %v24_v24  ;;  %v48_v37 = vmul.f32 %v97_v1, %v25_v25  ;;  %v68_v38 = vadd.f32 %v98_v2, %v45_v30 }
   0x9   :  { %81 = vst.msk [vmem:[%s240_s3 + $0x20] sm:$0xff] %vm76_vm0, %v64_v27  ;;  %82 = vst.msk [vmem:[%s240_s3 + $0x28] sm:$0xff] %vm76_vm0, %v65_v28  ;;  %v49_v39 = vmul.f32 %v97_v1, %v26_v26  ;;  %v50_v40 = vmul.f32 %v97_v1, %v27_v31  ;;  %v51_v41 = vmul.f32 %v97_v1, %v28_v32 }
   0xa   :  { %83 = vst.msk [vmem:[%s240_s3 + $0x30] sm:$0xff] %vm76_vm0, %v66_v29  ;;  %84 = vst.msk [vmem:[%s240_s3 + $0x38] sm:$0xff] %vm76_vm0, %v67_v34  ;;  %v69_v42 = vadd.f32 %v98_v2, %v46_v35  ;;  %v70_v43 = vadd.f32 %v98_v2, %v47_v36  ;;  %v71_v44 = vadd.f32 %v98_v2, %v48_v37 }
   0xb   :  { %v52_v45 = vmul.f32 %v97_v1, %v29_v33  ;;  %85 = vst.msk [vmem:[%s240_s3 + $0x40] sm:$0xff] %vm76_vm0, %v68_v38  ;;  %v72_v46 = vadd.f32 %v98_v2, %v49_v39  ;;  %v73_v47 = vadd.f32 %v98_v2, %v50_v40  ;;  %v74_v48 = vadd.f32 %v98_v2, %v51_v41 }
   0xc   :  { %86 = vst.msk [vmem:[%s240_s3 + $0x48] sm:$0xff] %vm76_vm0, %v69_v42  ;;  %87 = vst.msk [vmem:[%s240_s3 + $0x50] sm:$0xff] %vm76_vm0, %v70_v43 }
   0xd   :  { %88 = vst.msk [vmem:[%s240_s3 + $0x58] sm:$0xff] %vm76_vm0, %v71_v44  ;;  %v75_v49 = vadd.f32 %v98_v2, %v52_v45  ;;  %89 = vst.msk [vmem:[%s240_s3 + $0x60] sm:$0xff] %vm76_vm0, %v72_v46 }
   0xe   :  { %90 = vst.msk [vmem:[%s240_s3 + $0x68] sm:$0xff] %vm76_vm0, %v73_v47  ;;  %91 = vst.msk [vmem:[%s240_s3 + $0x70] sm:$0xff] %vm76_vm0, %v74_v48 }
   0xf   :  { %92 = vst.msk [vmem:[%s240_s3 + $0x78] sm:$0xff] %vm76_vm0, %v75_v49 }

// kernel: _lambda_.44
= control target key start
LH: loop header
LB: loop body
LE: loop exit
PB: predicated region body
PF: predicated region fallthrough
CT: control target
= control target key end

     0   :  { %vm14_vm0 = vcmask 253952   ;;  %vm22_vm1 = vcmask 261120   ;;  %v68_v0 = vmov 0.0   ;;  %s126_s0 = inlined_call_operand.vmem [shape: f32[32,32], index: 0, kind: input, shape index: {}]   ;;  %s127_s1 = inlined_call_operand.vmem [shape: f32[1,32], index: 1, kind: output, shape index: {0}]   ;;  %s128_s2 = inlined_call_operand.vmem [shape: f32[1,32], index: 2, kind: output, shape index: {1}]  }
   0x1   :  { %15 = vst.msk [vmem:[%s127_s1] sm:$0x1] %vm14_vm0, %v68_v0  ;;  %v17_v1 = vld [vmem:[%s126_s0] sm:$0xff]  ;;  %v18_v2 = vld [vmem:[%s126_s0 + $0x8] sm:$0xff]  ;;  %v19_v3 = vld [vmem:[%s126_s0 + $0x10] sm:$0xff] }
   0x2   :  { %16 = vst.msk [vmem:[%s128_s2] sm:$0x1] %vm14_vm0, %v68_v0  ;;  %v20_v4 = vld [vmem:[%s126_s0 + $0x18] sm:$0xff]  ;;  %v23_v5 = vsel %vm22_vm1, %v17_v1, 0.0  ;;  %v24_v6 = vsel %vm22_vm1, %v18_v2, 0.0  ;;  %v26_v7 = vsel %vm22_vm1, %v19_v3, 0.0  ;;  %v40_v8 = vmul.f32 %v17_v1, %v17_v1 }
   0x3   :  { %v25_v9 = vadd.f32 %v24_v6, %v23_v5  ;;  %v41_v10 = vmul.f32 %v18_v2, %v18_v2  ;;  %v42_v11 = vmul.f32 %v19_v3, %v19_v3  ;;  %v28_v12 = vsel %vm22_vm1, %v20_v4, 0.0 }
   0x4   :  { %v43_v13 = vmul.f32 %v20_v4, %v20_v4  ;;  %v44_v14 = vsel %vm22_vm1, %v40_v8, 0.0 }
   0x5   :  { %v27_v15 = vadd.f32 %v26_v7, %v25_v9  ;;  %v45_v16 = vsel %vm22_vm1, %v41_v10, 0.0  ;;  %v47_v17 = vsel %vm22_vm1, %v42_v11, 0.0 }
   0x6   :  { %v46_v18 = vadd.f32 %v45_v16, %v44_v14  ;;  %v49_v20 = vsel %vm22_vm1, %v43_v13, 0.0 }
   0x7   :  { %v29_v19 = vadd.f32 %v28_v12, %v27_v15 }
   0x8   :  { %v48_v21 = vadd.f32 %v47_v17, %v46_v18  ;;  %v21_v31 = vld [vmem:[%s127_s1] sm:$0x1] }
   0x9   :  { %v30_v22 = vrot.slane %v29_v19, 4  ;;  %v39_v36 = vld [vmem:[%s128_s2] sm:$0x1] }
   0xa   :  { %v50_v23 = vadd.f32 %v49_v20, %v48_v21 }
   0xb   :  { %v31_v24 = vadd.f32 %v30_v22, %v29_v19 }
   0xc   :  { %v51_v25 = vrot.slane %v50_v23, 4 }
   0xd   :  { %v32_v26 = vrot.slane %v31_v24, 2 }
   0xe   :  { %v52_v27 = vadd.f32 %v51_v25, %v50_v23 }
   0xf   :  { %v33_v28 = vadd.f32 %v32_v26, %v31_v24 }
  0x10   :  { %v53_v29 = vrot.slane %v52_v27, 2 }
  0x11   :  { %v34_v30 = vrot.slane %v33_v28, 1 }
  0x12   :  { %v54_v32 = vadd.f32 %v53_v29, %v52_v27 }
  0x13   :  { %v35_v33 = vadd.f32 %v34_v30, %v33_v28 }
  0x14   :  { %v55_v34 = vrot.slane %v54_v32, 1 }
  0x15   :  { %v36_v35 = vadd.f32 %v35_v33, %v21_v31 }
  0x16   :  { %v56_v37 = vadd.f32 %v55_v34, %v54_v32 }
  0x17   :  { %38 = vst.msk [vmem:[%s127_s1] sm:$0x1] %vm14_vm0, %v36_v35 }
  0x18   :  { %v57_v38 = vadd.f32 %v56_v37, %v39_v36 }
  0x1a   :  { %58 = vst.msk [vmem:[%s128_s2] sm:$0x1] %vm14_vm0, %v57_v38 }

// kernel: _lambda_.43
= control target key start
LH: loop header
LB: loop body
LE: loop exit
PB: predicated region body
PF: predicated region fallthrough
CT: control target
= control target key end

     0   :  { %s451_s1 = inlined_call_operand.vmem [shape: bf16[256,128], index: 1, kind: input, shape index: {}]   ;;  %s452_s0 = inlined_call_operand.vmem [shape: bf16[32,256], index: 0, kind: input, shape index: {}]   ;;  %s453_s2 = inlined_call_operand.vmem [shape: f32[1,128], index: 2, kind: input, shape index: {}]   ;;  %s454_s3 = inlined_call_operand.vmem [shape: f32[32,128], index: 3, kind: output, shape index: {}]  }
   0x1   :  { %v340_v0 = vld [vmem:[%s451_s1 + $0x78] sm:$0xff]   ;;  %v342_v2 = vld [vmem:[%s451_s1 + $0x70] sm:$0xff]   ;;  %v344_v4 = vld [vmem:[%s451_s1 + $0x68] sm:$0xff]  }
   0x2   :  { %v341_v1 = vld [vmem:[%s451_s1 + $0x38] sm:$0xff]   ;;  %296 = vmatprep.subr.bf16.mxu0 %v340_v0  ;;  %324 = vmatprep.subr.bf16.mxu1 %v340_v0  ;;  %v343_v3 = vld [vmem:[%s451_s1 + $0x30] sm:$0xff]   ;;  %v345_v5 = vld [vmem:[%s451_s1 + $0x28] sm:$0xff]  }
   0x3   :  { %297 = vmatpush3.bf16.msra.mxu0 %v341_v1  ;;  %332 = vmatpush3.bf16.msra.mxu1 %v341_v1  ;;  %v346_v6 = vld [vmem:[%s451_s1 + $0x60] sm:$0xff]   ;;  %v348_v8 = vld [vmem:[%s451_s1 + $0x58] sm:$0xff]   ;;  %v350_v10 = vld [vmem:[%s451_s1 + $0x50] sm:$0xff]  }
   0x4   :  { %298 = vmatprep.subr.bf16.mxu0 %v342_v2  ;;  %325 = vmatprep.subr.bf16.mxu1 %v342_v2  ;;  %v347_v7 = vld [vmem:[%s451_s1 + $0x20] sm:$0xff]   ;;  %v349_v9 = vld [vmem:[%s451_s1 + $0x18] sm:$0xff]   ;;  %v25_v12 = vld [vmem:[%s452_s0 + $0x8] sm:$0xff] }
   0x5   :  { %v24_v11 = vld [vmem:[%s452_s0] sm:$0xff]  ;;  %v26_v13 = vld [vmem:[%s452_s0 + $0x10] sm:$0xff]  ;;  %vm29_vm1 = vcmp.ge.bf16.partialorder %v25_v12, 0  ;;  %v33_v15 = vmul.bf16 1045249613, %v25_v12  ;;  %v27_v16 = vld [vmem:[%s452_s0 + $0x18] sm:$0xff] }
   0x6   :  { %vm28_vm0 = vcmp.ge.bf16.partialorder %v24_v11, 0  ;;  %v32_v14 = vmul.bf16 1045249613, %v24_v11  ;;  %vm30_vm2 = vcmp.ge.bf16.partialorder %v26_v13, 0  ;;  %v34_v17 = vmul.bf16 1045249613, %v26_v13 }
   0x7   :  { %299 = vmatpush3.bf16.msra.mxu0 %v343_v3  ;;  %333 = vmatpush3.bf16.msra.mxu1 %v343_v3  ;;  %v351_v18 = vld [vmem:[%s451_s1 + $0x10] sm:$0xff]   ;;  %v37_v20 = vsel %vm29_vm1, %v25_v12, %v33_v15  ;;  %vm31_vm3 = vcmp.ge.bf16.partialorder %v27_v16, 0  ;;  %v35_v21 = vmul.bf16 1045249613, %v27_v16  ;;  %v352_v22 = vld [vmem:[%s451_s1 + $0x48] sm:$0xff]   ;;  %v354_v28 = vld [vmem:[%s451_s1 + $0x40] sm:$0xff]  }
   0x8   :  { %300 = vmatprep.subr.bf16.mxu0 %v344_v4  ;;  %326 = vmatprep.subr.bf16.mxu1 %v344_v4  ;;  %v36_v19 = vsel %vm28_vm0, %v24_v11, %v32_v14  ;;  %v38_v24 = vsel %vm30_vm2, %v26_v13, %v34_v17  ;;  %v353_v27 = vld [vmem:[%s451_s1 + $0x8] sm:$0xff]   ;;  %v355_v29 = vld [vmem:[%s451_s1] sm:$0xff]  }
   0x9   :  { %v276_v23 = vcombine.high %v36_v19, %v37_v20  ;;  %v39_v25 = vsel %vm31_vm3, %v27_v16, %v35_v21  ;;  %v275_v30 = vcombine.low %v36_v19, %v37_v20  ;;  %v295_v35 = vld [vmem:[%s453_s2] ss:$0 sm:$0xff] }
   0xa   :  { %v278_v26 = vcombine.high %v38_v24, %v39_v25  ;;  %v277_v31 = vcombine.low %v38_v24, %v39_v25 }
   0xb   :  { %301 = vmatpush3.bf16.msra.mxu0 %v345_v5  ;;  %334 = vmatpush3.bf16.msra.mxu1 %v345_v5 }
   0xc   :  { %302 = vmatprep.subr.bf16.mxu0 %v346_v6  ;;  %327 = vmatprep.subr.bf16.mxu1 %v346_v6 }
   0xd   :  { %224 = vmatprep.mubr.bf16.mxu0 %v276_v23  ;;  %232 = vmatprep.mubr.bf16.mxu1 %v278_v26 }
   0xf   :  { %303 = vmatpush3.bf16.msra.mxu0 %v347_v7  ;;  %335 = vmatpush3.bf16.msra.mxu1 %v347_v7 }
  0x10   :  { %304 = vmatprep.subr.bf16.mxu0 %v348_v8  ;;  %328 = vmatprep.subr.bf16.mxu1 %v348_v8 }
  0x13   :  { %305 = vmatpush3.bf16.msra.mxu0 %v349_v9  ;;  %336 = vmatpush3.bf16.msra.mxu1 %v349_v9 }
  0x14   :  { %306 = vmatprep.subr.bf16.mxu0 %v350_v10  ;;  %329 = vmatprep.subr.bf16.mxu1 %v350_v10 }
  0x17   :  { %307 = vmatpush3.bf16.msra.mxu0 %v351_v18  ;;  %337 = vmatpush3.bf16.msra.mxu1 %v351_v18 }
  0x18   :  { %308 = vmatprep.subr.bf16.mxu0 %v352_v22  ;;  %330 = vmatprep.subr.bf16.mxu1 %v352_v22 }
  0x1b   :  { %309 = vmatpush3.bf16.msra.mxu0 %v353_v27  ;;  %338 = vmatpush3.bf16.msra.mxu1 %v353_v27 }
  0x1c   :  { %310 = vmatprep.subr.bf16.mxu0 %v354_v28  ;;  %331 = vmatprep.subr.bf16.mxu1 %v354_v28 }
  0x1f   :  { %311 = vmatpush3.bf16.msra.mxu0 %v355_v29  ;;  %339 = vmatpush3.bf16.msra.mxu1 %v355_v29 }
  0x22   :  { %225 = vmatmul.mubr.bf16.vlgmr.msra.gmra.mxu0 %v275_v30  ;;  %233 = vmatmul.mubr.bf16.vlgmr.msra.gmra.mxu1 %v277_v31 }
  0xe2   :  { %v312_v32 = vpop.f32.mrf.mxu0  ;;  %v318_v33 = vpop.f32.mrf.mxu1 }
  0xe4   :  { %v313_v34 = vpop.f32.mrf.mxu0  ;;  %v319_v36 = vpop.f32.mrf.mxu1 }
  0xe5   :  { %v314_v37 = vadd.f32 %v313_v34, %v312_v32  ;;  %v320_v38 = vadd.f32 %v319_v36, %v318_v33 }
  0xe6   :  { %v315_v39 = vpop.f32.mrf.mxu0  ;;  %v321_v40 = vpop.f32.mrf.mxu1 }
  0xe7   :  { %v263_v41 = vadd.f32 %v314_v37, %v295_v35  ;;  %v265_v42 = vadd.f32 %v320_v38, %v295_v35 }
  0xe8   :  { %v316_v43 = vpop.f32.mrf.mxu0  ;;  %v322_v44 = vpop.f32.mrf.mxu1 }
  0xe9   :  { %267 = vst [vmem:[%s454_s3] sm:$0xff] %v263_v41  ;;  %269 = vst [vmem:[%s454_s3 + $0x10] sm:$0xff] %v265_v42  ;;  %v317_v45 = vadd.f32 %v316_v43, %v315_v39  ;;  %v323_v46 = vadd.f32 %v322_v44, %v321_v40 }
  0xeb   :  { %v264_v47 = vadd.f32 %v317_v45, %v295_v35  ;;  %v266_v48 = vadd.f32 %v323_v46, %v295_v35 }
  0xed   :  { %268 = vst [vmem:[%s454_s3 + $0x8] sm:$0xff] %v264_v47  ;;  %270 = vst [vmem:[%s454_s3 + $0x18] sm:$0xff] %v266_v48 }

// kernel: _lambda_.45
= control target key start
LH: loop header
LB: loop body
LE: loop exit
PB: predicated region body
PF: predicated region fallthrough
CT: control target
= control target key end

     0   :  { %vm40_vm0 = vcmask 261120   ;;  %s101_s0 = inlined_call_operand.vmem [shape: f32[32,32], index: 0, kind: input, shape index: {}]   ;;  %s102_s1 = inlined_call_operand.vmem [shape: f32[1,32], index: 1, kind: input, shape index: {}]   ;;  %s103_s2 = inlined_call_operand.vmem [shape: f32[1,32], index: 2, kind: input, shape index: {}]   ;;  %s104_s3 = inlined_call_operand.vmem [shape: f32[32,32], index: 3, kind: output, shape index: {}]  }
   0x1   :  { %v14_v0 = vld [vmem:[%s101_s0] sm:$0xff]  ;;  %v15_v4 = vld [vmem:[%s101_s0 + $0x8] sm:$0xff]  ;;  %v16_v5 = vld [vmem:[%s101_s0 + $0x10] sm:$0xff] }
   0x2   :  { %v49_v1 = vld [vmem:[%s102_s1] ss:$0 sm:$0xff]  ;;  %v17_v6 = vld [vmem:[%s101_s0 + $0x18] sm:$0xff] }
   0x3   :  { %v50_v2 = vld [vmem:[%s103_s2] ss:$0 sm:$0xff]  ;;  %v25_v3 = vmul.f32 %v49_v1, %v14_v0  ;;  %v26_v7 = vmul.f32 %v49_v1, %v15_v4  ;;  %v27_v8 = vmul.f32 %v49_v1, %v16_v5  ;;  %v28_v9 = vmul.f32 %v49_v1, %v17_v6 }
   0x5   :  { %v36_v10 = vadd.f32 %v50_v2, %v25_v3  ;;  %v37_v11 = vadd.f32 %v50_v2, %v26_v7  ;;  %v38_v12 = vadd.f32 %v50_v2, %v27_v8  ;;  %v39_v13 = vadd.f32 %v50_v2, %v28_v9 }
   0x7   :  { %41 = vst.msk [vmem:[%s104_s3] sm:$0xff] %vm40_vm0, %v36_v10  ;;  %42 = vst.msk [vmem:[%s104_s3 + $0x8] sm:$0xff] %vm40_vm0, %v37_v11 }
   0x8   :  { %43 = vst.msk [vmem:[%s104_s3 + $0x10] sm:$0xff] %vm40_vm0, %v38_v12  ;;  %44 = vst.msk [vmem:[%s104_s3 + $0x18] sm:$0xff] %vm40_vm0, %v39_v13 }

// kernel: _lambda_.48
= control target key start
LH: loop header
LB: loop body
LE: loop exit
PB: predicated region body
PF: predicated region fallthrough
CT: control target
= control target key end

     0   :  { %vm31_vm0 = vcmask 523264   ;;  %s71_s0 = inlined_call_operand.vmem [shape: f32[8,64], index: 0, kind: input, shape index: {}]   ;;  %s72_s1 = inlined_call_operand.vmem [shape: f32[1,64], index: 1, kind: input, shape index: {}]   ;;  %s73_s2 = inlined_call_operand.vmem [shape: f32[1,64], index: 2, kind: input, shape index: {}]   ;;  %s74_s3 = inlined_call_operand.vmem [shape: f32[8,64], index: 3, kind: output, shape index: {}]  }
   0x1   :  { %v14_v0 = vld [vmem:[%s71_s0] sm:$0xff] }
   0x2   :  { %v37_v1 = vld [vmem:[%s72_s1] ss:$0 sm:$0xff] }
   0x3   :  { %v38_v2 = vld [vmem:[%s73_s2] ss:$0 sm:$0xff]  ;;  %v22_v3 = vmul.f32 %v37_v1, %v14_v0 }
   0x5   :  { %v30_v4 = vadd.f32 %v38_v2, %v22_v3 }
   0x7   :  { %32 = vst.msk [vmem:[%s74_s3] sm:$0xff] %vm31_vm0, %v30_v4 }

// kernel: _lambda_.46
= control target key start
LH: loop header
LB: loop body
LE: loop exit
PB: predicated region body
PF: predicated region fallthrough
CT: control target
= control target key end

     0   :  { %s672_s1 = inlined_call_operand.vmem [shape: bf16[512,128], index: 1, kind: input, shape index: {}]   ;;  %s673_s0 = inlined_call_operand.vmem [shape: bf16[16,512], index: 0, kind: input, shape index: {}]   ;;  %s674_s2 = inlined_call_operand.vmem [shape: f32[1,128], index: 2, kind: input, shape index: {}]   ;;  %s675_s3 = inlined_call_operand.vmem [shape: f32[16,128], index: 3, kind: output, shape index: {}]  }
   0x1   :  { %v503_v0 = vld [vmem:[%s672_s1 + $0x78] sm:$0xff]   ;;  %v507_v4 = vld [vmem:[%s672_s1 + $0x70] sm:$0xff]   ;;  %v511_v8 = vld [vmem:[%s672_s1 + $0x68] sm:$0xff]  }
   0x2   :  { %v504_v1 = vld [vmem:[%s672_s1 + $0xf8] sm:$0xff]   ;;  %459 = vmatprep.subr.bf16.mxu0 %v503_v0  ;;  %v508_v5 = vld [vmem:[%s672_s1 + $0xf0] sm:$0xff]   ;;  %v512_v9 = vld [vmem:[%s672_s1 + $0xe8] sm:$0xff]  }
   0x3   :  { %v505_v2 = vld [vmem:[%s672_s1 + $0x38] sm:$0xff]   ;;  %481 = vmatprep.subr.bf16.mxu1 %v504_v1  ;;  %v509_v6 = vld [vmem:[%s672_s1 + $0x30] sm:$0xff]   ;;  %v513_v10 = vld [vmem:[%s672_s1 + $0x28] sm:$0xff]  }
   0x4   :  { %v506_v3 = vld [vmem:[%s672_s1 + $0xb8] sm:$0xff]   ;;  %460 = vmatpush3.bf16.msra.mxu0 %v505_v2  ;;  %v510_v7 = vld [vmem:[%s672_s1 + $0xb0] sm:$0xff]   ;;  %v514_v11 = vld [vmem:[%s672_s1 + $0xa8] sm:$0xff]  }
   0x5   :  { %482 = vmatpush3.bf16.msra.mxu1 %v506_v3  ;;  %461 = vmatprep.subr.bf16.mxu0 %v507_v4  ;;  %v515_v12 = vld [vmem:[%s672_s1 + $0x60] sm:$0xff]   ;;  %v519_v16 = vld [vmem:[%s672_s1 + $0x58] sm:$0xff]   ;;  %v523_v20 = vld [vmem:[%s672_s1 + $0x50] sm:$0xff]  }
   0x6   :  { %483 = vmatprep.subr.bf16.mxu1 %v508_v5  ;;  %v516_v13 = vld [vmem:[%s672_s1 + $0xe0] sm:$0xff]   ;;  %v520_v17 = vld [vmem:[%s672_s1 + $0xd8] sm:$0xff]   ;;  %v524_v21 = vld [vmem:[%s672_s1 + $0xd0] sm:$0xff]  }
   0x7   :  { %v517_v14 = vld [vmem:[%s672_s1 + $0x20] sm:$0xff]   ;;  %v521_v18 = vld [vmem:[%s672_s1 + $0x18] sm:$0xff]   ;;  %v525_v22 = vld [vmem:[%s672_s1 + $0x10] sm:$0xff]  }
   0x8   :  { %462 = vmatpush3.bf16.msra.mxu0 %v509_v6  ;;  %v518_v15 = vld [vmem:[%s672_s1 + $0xa0] sm:$0xff]   ;;  %v522_v19 = vld [vmem:[%s672_s1 + $0x98] sm:$0xff]   ;;  %v526_v23 = vld [vmem:[%s672_s1 + $0x90] sm:$0xff]  }
   0x9   :  { %484 = vmatpush3.bf16.msra.mxu1 %v510_v7  ;;  %463 = vmatprep.subr.bf16.mxu0 %v511_v8  ;;  %v527_v24 = vld [vmem:[%s672_s1 + $0x48] sm:$0xff]   ;;  %v531_v28 = vld [vmem:[%s672_s1 + $0x40] sm:$0xff]   ;;  %v24_v33 = vld [vmem:[%s673_s0 + $0x10] sm:$0xff] }
   0xa   :  { %485 = vmatprep.subr.bf16.mxu1 %v512_v9  ;;  %v528_v25 = vld [vmem:[%s672_s1 + $0xc8] sm:$0xff]   ;;  %v532_v29 = vld [vmem:[%s672_s1 + $0xc0] sm:$0xff]   ;;  %vm28_vm1 = vcmp.ge.bf16.partialorder %v24_v33, 0  ;;  %v32_v36 = vmul.bf16 1045249613, %v24_v33  ;;  %v25_v37 = vld [vmem:[%s673_s0 + $0x18] sm:$0xff] }
   0xb   :  { %v529_v26 = vld [vmem:[%s672_s1 + $0x8] sm:$0xff]   ;;  %v533_v30 = vld [vmem:[%s672_s1] sm:$0xff]   ;;  %vm29_vm3 = vcmp.ge.bf16.partialorder %v25_v37, 0  ;;  %v33_v41 = vmul.bf16 1045249613, %v25_v37 }
   0xc   :  { %464 = vmatpush3.bf16.msra.mxu0 %v513_v10  ;;  %v530_v27 = vld [vmem:[%s672_s1 + $0x88] sm:$0xff]   ;;  %v534_v31 = vld [vmem:[%s672_s1 + $0x80] sm:$0xff]   ;;  %v36_v40 = vsel %vm28_vm1, %v24_v33, %v32_v36 }
   0xd   :  { %486 = vmatpush3.bf16.msra.mxu1 %v514_v11  ;;  %465 = vmatprep.subr.bf16.mxu0 %v515_v12  ;;  %v22_v32 = vld [vmem:[%s673_s0] sm:$0xff]  ;;  %v23_v34 = vld [vmem:[%s673_s0 + $0x8] sm:$0xff]  ;;  %v37_v45 = vsel %vm29_vm3, %v25_v37, %v33_v41 }
   0xe   :  { %487 = vmatprep.subr.bf16.mxu1 %v516_v13  ;;  %vm26_vm0 = vcmp.ge.bf16.partialorder %v22_v32, 0  ;;  %v30_v35 = vmul.bf16 1045249613, %v22_v32  ;;  %vm27_vm2 = vcmp.ge.bf16.partialorder %v23_v34, 0  ;;  %v31_v38 = vmul.bf16 1045249613, %v23_v34 }
   0xf   :  { %v458_v55 = vld [vmem:[%s674_s2] ss:$0 sm:$0xff] }
  0x10   :  { %466 = vmatpush3.bf16.msra.mxu0 %v517_v14  ;;  %v34_v39 = vsel %vm26_vm0, %v22_v32, %v30_v35  ;;  %v35_v44 = vsel %vm27_vm2, %v23_v34, %v31_v38 }
  0x11   :  { %488 = vmatpush3.bf16.msra.mxu1 %v518_v15  ;;  %467 = vmatprep.subr.bf16.mxu0 %v519_v16  ;;  %v422_v42 = vcombine.low %v34_v39, %v36_v40  ;;  %v423_v43 = vcombine.high %v34_v39, %v36_v40  ;;  %v424_v46 = vcombine.low %v35_v44, %v37_v45 }
  0x12   :  { %489 = vmatprep.subr.bf16.mxu1 %v520_v17  ;;  %v425_v47 = vcombine.high %v35_v44, %v37_v45 }
  0x13   :  { %348 = vmatprep.mubr.bf16.mxu0 %v423_v43 }
  0x14   :  { %468 = vmatpush3.bf16.msra.mxu0 %v521_v18  ;;  %389 = vmatprep.mubr.bf16.mxu1 %v425_v47 }
  0x15   :  { %490 = vmatpush3.bf16.msra.mxu1 %v522_v19  ;;  %469 = vmatprep.subr.bf16.mxu0 %v523_v20 }
  0x16   :  { %491 = vmatprep.subr.bf16.mxu1 %v524_v21 }
  0x18   :  { %470 = vmatpush3.bf16.msra.mxu0 %v525_v22 }
  0x19   :  { %492 = vmatpush3.bf16.msra.mxu1 %v526_v23  ;;  %471 = vmatprep.subr.bf16.mxu0 %v527_v24 }
  0x1a   :  { %493 = vmatprep.subr.bf16.mxu1 %v528_v25 }
  0x1c   :  { %472 = vmatpush3.bf16.msra.mxu0 %v529_v26 }
  0x1d   :  { %494 = vmatpush3.bf16.msra.mxu1 %v530_v27  ;;  %473 = vmatprep.subr.bf16.mxu0 %v531_v28 }
  0x1e   :  { %495 = vmatprep.subr.bf16.mxu1 %v532_v29 }
  0x20   :  { %474 = vmatpush3.bf16.msra.mxu0 %v533_v30 }
  0x21   :  { %496 = vmatpush3.bf16.msra.mxu1 %v534_v31 }
  0x23   :  { %349 = vmatmul.mubr.bf16.vlgmr.msra.gmra.mxu0 %v422_v42 }
  0x24   :  { %390 = vmatmul.mubr.bf16.vlgmr.msra.gmra.mxu1 %v424_v46 }
  0xe3   :  { %v475_v48 = vpop.f32.mrf.mxu0 }
  0xe4   :  { %v497_v49 = vpop.f32.mrf.mxu1 }
  0xe5   :  { %v476_v50 = vpop.f32.mrf.mxu0 }
  0xe6   :  { %v477_v51 = vadd.f32 %v476_v50, %v475_v48  ;;  %v498_v52 = vpop.f32.mrf.mxu1 }
  0xe7   :  { %v478_v53 = vpop.f32.mrf.mxu0  ;;  %v499_v54 = vadd.f32 %v498_v52, %v497_v49 }
  0xe8   :  { %v500_v56 = vpop.f32.mrf.mxu1 }
  0xe9   :  { %v479_v57 = vpop.f32.mrf.mxu0  ;;  %v392_v58 = vadd.f32 %v499_v54, %v477_v51 }
  0xea   :  { %v480_v59 = vadd.f32 %v479_v57, %v478_v53  ;;  %v501_v60 = vpop.f32.mrf.mxu1 }
  0xeb   :  { %v414_v61 = vadd.f32 %v458_v55, %v392_v58  ;;  %v502_v62 = vadd.f32 %v501_v60, %v500_v56 }
  0xed   :  { %416 = vst [vmem:[%s675_s3] sm:$0xff] %v414_v61  ;;  %v395_v63 = vadd.f32 %v502_v62, %v480_v59 }
  0xef   :  { %v415_v0 = vadd.f32 %v458_v55, %v395_v63 }
  0xf1   :  { %417 = vst [vmem:[%s675_s3 + $0x8] sm:$0xff] %v415_v0 }

// kernel: _lambda_.47
= control target key start
LH: loop header
LB: loop body
LE: loop exit
PB: predicated region body
PF: predicated region fallthrough
CT: control target
= control target key end

     0   :  { %vm14_vm0 = vcmask 516096   ;;  %vm19_vm1 = vcmask 523264   ;;  %v50_v0 = vmov 0.0   ;;  %s91_s0 = inlined_call_operand.vmem [shape: f32[8,64], index: 0, kind: input, shape index: {}]   ;;  %s92_s1 = inlined_call_operand.vmem [shape: f32[1,64], index: 1, kind: output, shape index: {0}]   ;;  %s93_s2 = inlined_call_operand.vmem [shape: f32[1,64], index: 2, kind: output, shape index: {1}]  }
   0x1   :  { %15 = vst.msk [vmem:[%s92_s1] sm:$0x1] %vm14_vm0, %v50_v0  ;;  %v17_v1 = vld [vmem:[%s91_s0] sm:$0xff]  ;;  %16 = vst.msk [vmem:[%s93_s2] sm:$0x1] %vm14_vm0, %v50_v0 }
   0x2   :  { %v20_v2 = vsel %vm19_vm1, %v17_v1, 0.0  ;;  %v31_v3 = vmul.f32 %v17_v1, %v17_v1 }
   0x3   :  { %v21_v4 = vrot.slane %v20_v2, 4 }
   0x4   :  { %v32_v5 = vsel %vm19_vm1, %v31_v3, 0.0 }
   0x5   :  { %v22_v6 = vadd.f32 %v21_v4, %v20_v2  ;;  %v33_v7 = vrot.slane %v32_v5, 4 }
   0x7   :  { %v23_v8 = vrot.slane %v22_v6, 2  ;;  %v34_v9 = vadd.f32 %v33_v7, %v32_v5 }
   0x8   :  { %v18_v14 = vld [vmem:[%s92_s1] sm:$0x1] }
   0x9   :  { %v24_v10 = vadd.f32 %v23_v8, %v22_v6  ;;  %v35_v11 = vrot.slane %v34_v9, 2  ;;  %v30_v17 = vld [vmem:[%s93_s2] sm:$0x1] }
   0xb   :  { %v25_v12 = vrot.slane %v24_v10, 1  ;;  %v36_v13 = vadd.f32 %v35_v11, %v34_v9 }
   0xd   :  { %v26_v15 = vadd.f32 %v25_v12, %v24_v10  ;;  %v37_v16 = vrot.slane %v36_v13, 1 }
   0xf   :  { %v27_v18 = vadd.f32 %v26_v15, %v18_v14  ;;  %v38_v19 = vadd.f32 %v37_v16, %v36_v13 }
  0x11   :  { %29 = vst.msk [vmem:[%s92_s1] sm:$0x1] %vm14_vm0, %v27_v18  ;;  %v39_v20 = vadd.f32 %v38_v19, %v30_v17 }
  0x13   :  { %40 = vst.msk [vmem:[%s93_s2] sm:$0x1] %vm14_vm0, %v39_v20 }

// kernel: _lambda_.49
= control target key start
LH: loop header
LB: loop body
LE: loop exit
PB: predicated region body
PF: predicated region fallthrough
CT: control target
= control target key end

     0   :  { %s1028_s12 = smov 0   ;;  %s1030_s13 = smov 0   ;;  %s1144_s0 = inlined_call_operand.vmem [shape: bf16[16,1024], index: 0, kind: input, shape index: {}]   ;;  %s1145_s1 = inlined_call_operand.vmem [shape: bf16[1024,128], index: 1, kind: input, shape index: {}]   ;;  %s1146_s2 = inlined_call_operand.vmem [shape: f32[1,128], index: 2, kind: input, shape index: {}]   ;;  %s1147_s3 = inlined_call_operand.vmem [shape: f32[16,128], index: 3, kind: output, shape index: {}]  }
   0x1   :  { %s1032_s14 = smov 0   ;;  %s1034_s15 = smov 0  }
   0x2   :  { %s1036_s16 = smov 0  }
   0x3 LB: > { %s25_s17 = sadd.s32 1, %s1001_s15  ;;  %p48_p1 = scmp.ne.s32.totalorder %s993_s13, %s989_s12  ;;  %s1005_s16 = sphi %s1036_s16, %s13_s16   ;;  %s1001_s15 = sphi %s1034_s15, %s1151_s15   ;;  %s997_s14 = sphi %s1032_s14, %s1150_s14   ;;  %s993_s13 = sphi %s1030_s13, %s1149_s13   ;;  %s989_s12 = sphi %s1028_s12, %s1148_s12  }
   0x4   : > { %p26_p0 = scmp.ge.s32.totalorder %s25_s17, 2  ;;  %p49_p2 = scmp.eq.s32.totalorder %s1005_s16, 0 }
   0x5   : > { %s41_s19 = sadd.s32 1, %s993_s13  ;;  %p798_p5 = scmp.ge.s32.totalorder %s1005_s16, 2 }
   0x6   : > { %s1153_s17 = smov (%p26_p0, %s25_s17), 0  ;;  %p50_p3 = por %p49_p2, %p48_p1 }
   0x7   : > { %s37_s18 = ssub.s32 %s1001_s15, %s1153_s17  ;;  %162 = sbr.rel (%p798_p5) target bundleno = 18 (0x12), region = 20 }
   0x8   : > { %p39_p4 = scmp.eq.s32.totalorder %s37_s18, 0 }
   0xa   : > { %s1063_s20 = scalar_select %p39_p4, %s993_s13, %s41_s19  }
   0xc   : > { %165 = sbr.rel (!%p50_p3) target bundleno = 18 (0x12), region = 24  ;;  %s167_s21 = sand.u32 (%p50_p3), 1, %s993_s13  }
   0xd   : > { %s849_s22 = sshll.u32 (%p50_p3), %s1001_s15, 4  ;;  %s799_s23 = sshll.u32 (%p50_p3), %s167_s21, 5 }
   0xe   : > { %s175_s26 = scalar_lea.vmem (%p50_p3), %s1144_s0, %s849_s22  ;;  %s169_s27 = scalar_lea.vmem (%p50_p3), [#allocation3], %s799_s23 }
   0xf   : > { %v188_v0 = vld [vmem:[%s175_s26] sm:$0xff] (%p50_p3)  ;;  %v190_v1 = vld [vmem:[%s175_s26 + $0x8] sm:$0xff] (%p50_p3) }
  0x10   : > { %v192_v2 = vld [vmem:[%s175_s26 + $0x20] sm:$0xff] (%p50_p3)  ;;  %189 = vst [vmem:[%s169_s27] sm:$0xff] (%p50_p3), %v188_v0  ;;  %191 = vst [vmem:[%s169_s27 + $0x8] sm:$0xff] (%p50_p3), %v190_v1  ;;  %v194_v3 = vld [vmem:[%s175_s26 + $0x28] sm:$0xff] (%p50_p3) }
  0x11   : > { %193 = vst [vmem:[%s169_s27 + $0x10] sm:$0xff] %v192_v2  ;;  %195 = vst [vmem:[%s169_s27 + $0x18] sm:$0xff] %v194_v3 }
  0x12 PF: > { %p802_p6 = scmp.ge.s32.totalorder %s1005_s16, 1  ;;  %p212_p7 = scmp.lt.s32.totalorder %s1005_s16, 3 }
  0x14   : > { %p213_p8 = pnand %p802_p6, %p212_p7 }
  0x15   : > { %s219_s28 = sand.u32 (!%p213_p8), 1, %s989_s12   ;;  %s804_s29 = sshll.u32 (!%p213_p8), %s997_s14, 6 }
  0x16   : > { %216 = sbr.rel (%p213_p8) target bundleno = 285 (0x11d), region = 51  ;;  %s803_s30 = sshll.u32 (!%p213_p8), %s219_s28, 5 }
  0x17   : > { %p259_p9 = scmp.lt.s32.totalorder (!%p213_p8), %s804_s29, 127  ;;  %s1080_s8 = scalar_lea.vmem (!%p213_p8), [#allocation3], %s803_s30 }
  0x18   : > { %p806_p10 = scmp.ne.s32.totalorder (!%p213_p8), %s997_s14, 0 }
  0x1b   : > { %s1155_s29 = smov (!%p259_p9, %s804_s29), 127  ;;  %284 = sbr.rel (%p806_p10) target bundleno = 34 (0x22), region = 59 }
  0x1c   : > { %s805_s4 = sshll.u32 %s1155_s29, 2 }
  0x1d   : > { %s1078_s7 = scalar_lea.vmem %s1145_s1, %s805_s4 }
  0x20   : > { %v1007_v4 = vmov 0.0  }
  0x21   : > { %285 = vst [vmem:[#allocation2] sm:$0xff] %v1007_v4  ;;  %286 = vst [vmem:[#allocation2 + $0x8] sm:$0xff] %v1007_v4 }
  0x22 PF: > { %v935_v5 = vld [vmem:[%s1078_s7 + $0x78] sm:$0xff]   ;;  %v939_v9 = vld [vmem:[%s1078_s7 + $0x70] sm:$0xff]   ;;  %v943_v13 = vld [vmem:[%s1078_s7 + $0x68] sm:$0xff]   ;;  %p843_p11 = scmp.ne.s32.totalorder %s997_s14, 1 }
  0x23   : > { %v936_v6 = vld [vmem:[%s1078_s7 + $0xf8] sm:$0xff]   ;;  %850 = vmatprep.subr.bf16.mxu0 %v935_v5  ;;  %v940_v10 = vld [vmem:[%s1078_s7 + $0xf0] sm:$0xff]   ;;  %v944_v14 = vld [vmem:[%s1078_s7 + $0xe8] sm:$0xff]  }
  0x24   : > { %v937_v7 = vld [vmem:[%s1078_s7 + $0x38] sm:$0xff]   ;;  %872 = vmatprep.subr.bf16.mxu1 %v936_v6  ;;  %v941_v11 = vld [vmem:[%s1078_s7 + $0x30] sm:$0xff]   ;;  %v945_v15 = vld [vmem:[%s1078_s7 + $0x28] sm:$0xff]  }
  0x25   : > { %v938_v8 = vld [vmem:[%s1078_s7 + $0xb8] sm:$0xff]   ;;  %851 = vmatpush3.bf16.msra.mxu0 %v937_v7  ;;  %v942_v12 = vld [vmem:[%s1078_s7 + $0xb0] sm:$0xff]   ;;  %v946_v16 = vld [vmem:[%s1078_s7 + $0xa8] sm:$0xff]  }
  0x26   : > { %873 = vmatpush3.bf16.msra.mxu1 %v938_v8  ;;  %852 = vmatprep.subr.bf16.mxu0 %v939_v9  ;;  %v947_v17 = vld [vmem:[%s1078_s7 + $0x60] sm:$0xff]   ;;  %v951_v21 = vld [vmem:[%s1078_s7 + $0x58] sm:$0xff]   ;;  %v955_v25 = vld [vmem:[%s1078_s7 + $0x50] sm:$0xff]  }
  0x27   : > { %874 = vmatprep.subr.bf16.mxu1 %v940_v10  ;;  %v948_v18 = vld [vmem:[%s1078_s7 + $0xe0] sm:$0xff]   ;;  %v952_v22 = vld [vmem:[%s1078_s7 + $0xd8] sm:$0xff]   ;;  %v956_v26 = vld [vmem:[%s1078_s7 + $0xd0] sm:$0xff]  }
  0x28   : > { %v949_v19 = vld [vmem:[%s1078_s7 + $0x20] sm:$0xff]   ;;  %v953_v23 = vld [vmem:[%s1078_s7 + $0x18] sm:$0xff]   ;;  %v957_v27 = vld [vmem:[%s1078_s7 + $0x10] sm:$0xff]  }
  0x29   : > { %853 = vmatpush3.bf16.msra.mxu0 %v941_v11  ;;  %v950_v20 = vld [vmem:[%s1078_s7 + $0xa0] sm:$0xff]   ;;  %v954_v24 = vld [vmem:[%s1078_s7 + $0x98] sm:$0xff]   ;;  %v958_v28 = vld [vmem:[%s1078_s7 + $0x90] sm:$0xff]  }
  0x2a   : > { %875 = vmatpush3.bf16.msra.mxu1 %v942_v12  ;;  %854 = vmatprep.subr.bf16.mxu0 %v943_v13  ;;  %v959_v29 = vld [vmem:[%s1078_s7 + $0x48] sm:$0xff]   ;;  %v963_v33 = vld [vmem:[%s1078_s7 + $0x40] sm:$0xff]   ;;  %v287_v37 = vld [vmem:[%s1080_s8] sm:$0xff] }
  0x2b   : > { %876 = vmatprep.subr.bf16.mxu1 %v944_v14  ;;  %v960_v30 = vld [vmem:[%s1078_s7 + $0xc8] sm:$0xff]   ;;  %v964_v34 = vld [vmem:[%s1078_s7 + $0xc0] sm:$0xff]   ;;  %v288_v39 = vld [vmem:[%s1080_s8 + $0x8] sm:$0xff]  ;;  %vm291_vm0 = vcmp.ge.bf16.partialorder %v287_v37, 0  ;;  %v295_v40 = vmul.bf16 1045249613, %v287_v37 }
  0x2c   : > { %v961_v31 = vld [vmem:[%s1078_s7 + $0x8] sm:$0xff]   ;;  %v965_v35 = vld [vmem:[%s1078_s7] sm:$0xff]   ;;  %vm292_vm2 = vcmp.ge.bf16.partialorder %v288_v39, 0  ;;  %v296_v43 = vmul.bf16 1045249613, %v288_v39 }
  0x2d   : > { %855 = vmatpush3.bf16.msra.mxu0 %v945_v15  ;;  %v962_v32 = vld [vmem:[%s1078_s7 + $0x88] sm:$0xff]   ;;  %v966_v36 = vld [vmem:[%s1078_s7 + $0x80] sm:$0xff]   ;;  %v299_v44 = vsel %vm291_vm0, %v287_v37, %v295_v40 }
  0x2e   : > { %877 = vmatpush3.bf16.msra.mxu1 %v946_v16  ;;  %856 = vmatprep.subr.bf16.mxu0 %v947_v17  ;;  %v289_v38 = vld [vmem:[%s1080_s8 + $0x10] sm:$0xff]  ;;  %v290_v42 = vld [vmem:[%s1080_s8 + $0x18] sm:$0xff]  ;;  %v300_v49 = vsel %vm292_vm2, %v288_v39, %v296_v43 }
  0x2f   : > { %878 = vmatprep.subr.bf16.mxu1 %v948_v18  ;;  %vm293_vm1 = vcmp.ge.bf16.partialorder %v289_v38, 0  ;;  %v297_v41 = vmul.bf16 1045249613, %v289_v38  ;;  %vm294_vm3 = vcmp.ge.bf16.partialorder %v290_v42, 0  ;;  %v298_v46 = vmul.bf16 1045249613, %v290_v42 }
  0x30   : > { %v303_v60 = vld [vmem:[#allocation2] sm:$0xff]  ;;  %v304_v4 = vld [vmem:[#allocation2 + $0x8] sm:$0xff] }
  0x31   : > { %857 = vmatpush3.bf16.msra.mxu0 %v949_v19  ;;  %v301_v45 = vsel %vm293_vm1, %v289_v38, %v297_v41  ;;  %v302_v50 = vsel %vm294_vm3, %v290_v42, %v298_v46 }
  0x32   : > { %879 = vmatpush3.bf16.msra.mxu1 %v950_v20  ;;  %858 = vmatprep.subr.bf16.mxu0 %v951_v21  ;;  %v807_v47 = vcombine.low %v299_v44, %v301_v45  ;;  %v808_v48 = vcombine.high %v299_v44, %v301_v45  ;;  %v809_v51 = vcombine.low %v300_v49, %v302_v50 }
  0x33   : > { %880 = vmatprep.subr.bf16.mxu1 %v952_v22  ;;  %v810_v52 = vcombine.high %v300_v49, %v302_v50 }
  0x34   : > { %613 = vmatprep.mubr.bf16.mxu0 %v808_v48 }
  0x35   : > { %859 = vmatpush3.bf16.msra.mxu0 %v953_v23  ;;  %654 = vmatprep.mubr.bf16.mxu1 %v810_v52 }
  0x36   : > { %881 = vmatpush3.bf16.msra.mxu1 %v954_v24  ;;  %860 = vmatprep.subr.bf16.mxu0 %v955_v25 }
  0x37   : > { %882 = vmatprep.subr.bf16.mxu1 %v956_v26 }
  0x39   : > { %861 = vmatpush3.bf16.msra.mxu0 %v957_v27 }
  0x3a   : > { %883 = vmatpush3.bf16.msra.mxu1 %v958_v28  ;;  %862 = vmatprep.subr.bf16.mxu0 %v959_v29 }
  0x3b   : > { %884 = vmatprep.subr.bf16.mxu1 %v960_v30 }
  0x3d   : > { %863 = vmatpush3.bf16.msra.mxu0 %v961_v31 }
  0x3e   : > { %885 = vmatpush3.bf16.msra.mxu1 %v962_v32  ;;  %864 = vmatprep.subr.bf16.mxu0 %v963_v33 }
  0x3f   : > { %886 = vmatprep.subr.bf16.mxu1 %v964_v34 }
  0x41   : > { %865 = vmatpush3.bf16.msra.mxu0 %v965_v35 }
  0x42   : > { %887 = vmatpush3.bf16.msra.mxu1 %v966_v36 }
  0x44   : > { %614 = vmatmul.mubr.bf16.vlgmr.msra.gmra.mxu0 %v807_v47 }
  0x45   : > { %655 = vmatmul.mubr.bf16.vlgmr.msra.gmra.mxu1 %v809_v51 }
 0x104   : > { %v866_v53 = vpop.f32.mrf.mxu0 }
 0x105   : > { %v888_v54 = vpop.f32.mrf.mxu1 }
 0x106   : > { %v867_v55 = vpop.f32.mrf.mxu0 }
 0x107   : > { %v868_v56 = vadd.f32 %v867_v55, %v866_v53  ;;  %v889_v57 = vpop.f32.mrf.mxu1 }
 0x108   : > { %v869_v58 = vpop.f32.mrf.mxu0  ;;  %v890_v59 = vadd.f32 %v889_v57, %v888_v54 }
 0x109   : > { %v891_v61 = vpop.f32.mrf.mxu1 }
 0x10a   : > { %v870_v62 = vpop.f32.mrf.mxu0  ;;  %v657_v63 = vadd.f32 %v890_v59, %v868_v56 }
 0x10b   : > { %v871_v0 = vadd.f32 %v870_v62, %v869_v58  ;;  %v892_v1 = vpop.f32.mrf.mxu1 }
 0x10c   : > { %v663_v2 = vadd.f32 %v657_v63, %v303_v60  ;;  %v893_v3 = vadd.f32 %v892_v1, %v891_v61 }
 0x10e   : > { %665 = vst [vmem:[#allocation2] sm:$0xff] %v663_v2  ;;  %v660_v5 = vadd.f32 %v893_v3, %v871_v0  ;;  %670 = sbr.rel (%p843_p11) target bundleno = 285 (0x11d), region = 63 }
 0x110   : > { %v664_v6 = vadd.f32 %v660_v5, %v304_v4 }
 0x112   : > { %666 = vst [vmem:[#allocation2 + $0x8] sm:$0xff] %v664_v6 }
 0x113   : > { %v844_v8 = vld [vmem:[%s1146_s2] ss:$0 sm:$0xff] }
 0x115   : > { %v671_v7 = vld [vmem:[#allocation2] sm:$0xff] }
 0x116   : > { %v680_v10 = vadd.f32 %v844_v8, %v671_v7 }
 0x118   : > { %682 = vst [vmem:[%s1147_s3] sm:$0xff] %v680_v10 }
 0x119   : > { %v672_v9 = vld [vmem:[#allocation2 + $0x8] sm:$0xff] }
 0x11a   : > { %v681_v11 = vadd.f32 %v844_v8, %v672_v9 }
 0x11c   : > { %683 = vst [vmem:[%s1147_s3 + $0x8] sm:$0xff] %v681_v11 }
 0x11d PF: > { %s13_s16 = sadd.s32 1, %s1005_s16   ;;  %s1148_s12 = smov %s993_s13 }
 0x11e   : > { %p10_p12 = scmp.ge.s32.totalorder %s13_s16, 4   ;;  %s1149_s13 = smov %s1063_s20 }
 0x11f   : > { %s1150_s14 = smov %s1001_s15  ;;  %s1151_s15 = smov %s1153_s17 }
 0x120   :  { %12 = sbr.rel (!%p10_p12) target bundleno = 3 (0x3), region = 104 }

// kernel: _lambda_.50
= control target key start
LH: loop header
LB: loop body
LE: loop exit
PB: predicated region body
PF: predicated region fallthrough
CT: control target
= control target key end

     0   :  { %v288_v13 = vmov 0   ;;  %s372_s1 = inlined_call_operand.vmem [shape: bf16[256,128], index: 1, kind: input, shape index: {}]   ;;  %s373_s0 = inlined_call_operand.vmem [shape: bf16[16,256], index: 0, kind: input, shape index: {}]   ;;  %s374_s2 = inlined_call_operand.vmem [shape: f32[1,128], index: 2, kind: input, shape index: {}]   ;;  %s375_s3 = inlined_call_operand.vmem [shape: f32[16,128], index: 3, kind: output, shape index: {}]  }
   0x1   :  { %v272_v0 = vld [vmem:[%s372_s1 + $0x78] sm:$0xff]   ;;  %v274_v2 = vld [vmem:[%s372_s1 + $0x70] sm:$0xff]   ;;  %v276_v4 = vld [vmem:[%s372_s1 + $0x68] sm:$0xff]  }
   0x2   :  { %v273_v1 = vld [vmem:[%s372_s1 + $0x38] sm:$0xff]   ;;  %249 = vmatprep.subr.bf16.mxu0 %v272_v0  ;;  %v275_v3 = vld [vmem:[%s372_s1 + $0x30] sm:$0xff]   ;;  %v277_v5 = vld [vmem:[%s372_s1 + $0x28] sm:$0xff]  }
   0x3   :  { %250 = vmatpush3.bf16.msra.mxu0 %v273_v1  ;;  %v278_v6 = vld [vmem:[%s372_s1 + $0x60] sm:$0xff]   ;;  %v280_v8 = vld [vmem:[%s372_s1 + $0x58] sm:$0xff]   ;;  %v282_v10 = vld [vmem:[%s372_s1 + $0x50] sm:$0xff]  }
   0x4   :  { %251 = vmatprep.subr.bf16.mxu0 %v274_v2  ;;  %v279_v7 = vld [vmem:[%s372_s1 + $0x20] sm:$0xff]   ;;  %v281_v9 = vld [vmem:[%s372_s1 + $0x18] sm:$0xff]   ;;  %v22_v12 = vld [vmem:[%s373_s0 + $0x8] sm:$0xff] }
   0x5   :  { %v21_v11 = vld [vmem:[%s373_s0] sm:$0xff]  ;;  %v24_v15 = vmax.bf16 %v288_v13, %v22_v12  ;;  %v283_v16 = vld [vmem:[%s372_s1 + $0x10] sm:$0xff]   ;;  %v284_v18 = vld [vmem:[%s372_s1 + $0x48] sm:$0xff]  }
   0x6   :  { %v23_v14 = vmax.bf16 %v288_v13, %v21_v11  ;;  %v285_v19 = vld [vmem:[%s372_s1 + $0x8] sm:$0xff]   ;;  %v286_v20 = vld [vmem:[%s372_s1 + $0x40] sm:$0xff]  }
   0x7   :  { %252 = vmatpush3.bf16.msra.mxu0 %v275_v3  ;;  %v287_v21 = vld [vmem:[%s372_s1] sm:$0xff]  }
   0x8   :  { %253 = vmatprep.subr.bf16.mxu0 %v276_v4  ;;  %v231_v17 = vcombine.high %v23_v14, %v24_v15  ;;  %v230_v22 = vcombine.low %v23_v14, %v24_v15  ;;  %v248_v25 = vld [vmem:[%s374_s2] ss:$0 sm:$0xff] }
   0xa   :  { %197 = vmatprep.mubr.bf16.mxu0 %v231_v17 }
   0xb   :  { %254 = vmatpush3.bf16.msra.mxu0 %v277_v5 }
   0xc   :  { %255 = vmatprep.subr.bf16.mxu0 %v278_v6 }
   0xf   :  { %256 = vmatpush3.bf16.msra.mxu0 %v279_v7 }
  0x10   :  { %257 = vmatprep.subr.bf16.mxu0 %v280_v8 }
  0x13   :  { %258 = vmatpush3.bf16.msra.mxu0 %v281_v9 }
  0x14   :  { %259 = vmatprep.subr.bf16.mxu0 %v282_v10 }
  0x17   :  { %260 = vmatpush3.bf16.msra.mxu0 %v283_v16 }
  0x18   :  { %261 = vmatprep.subr.bf16.mxu0 %v284_v18 }
  0x1b   :  { %262 = vmatpush3.bf16.msra.mxu0 %v285_v19 }
  0x1c   :  { %263 = vmatprep.subr.bf16.mxu0 %v286_v20 }
  0x1f   :  { %264 = vmatpush3.bf16.msra.mxu0 %v287_v21 }
  0x22   :  { %198 = vmatmul.mubr.bf16.vlgmr.msra.gmra.mxu0 %v230_v22 }
  0xe2   :  { %v265_v23 = vpop.f32.mrf.mxu0 }
  0xe4   :  { %v266_v24 = vpop.f32.mrf.mxu0 }
  0xe5   :  { %v267_v26 = vadd.f32 %v266_v24, %v265_v23 }
  0xe6   :  { %v268_v27 = vpop.f32.mrf.mxu0 }
  0xe7   :  { %v222_v28 = vadd.f32 %v267_v26, %v248_v25 }
  0xe8   :  { %v269_v29 = vpop.f32.mrf.mxu0 }
  0xe9   :  { %224 = vst [vmem:[%s375_s3] sm:$0xff] %v222_v28  ;;  %v270_v30 = vadd.f32 %v269_v29, %v268_v27 }
  0xeb   :  { %v223_v31 = vadd.f32 %v270_v30, %v248_v25 }
  0xed   :  { %225 = vst [vmem:[%s375_s3 + $0x8] sm:$0xff] %v223_v31 }

// kernel: _lambda_.56
= control target key start
LH: loop header
LB: loop body
LE: loop exit
PB: predicated region body
PF: predicated region fallthrough
CT: control target
= control target key end

     0   :  { %v527_v35 = vmov 0   ;;  %s665_s1 = inlined_call_operand.vmem [shape: bf16[512,128], index: 1, kind: input, shape index: {}]   ;;  %s666_s0 = inlined_call_operand.vmem [shape: bf16[16,512], index: 0, kind: input, shape index: {}]   ;;  %s667_s2 = inlined_call_operand.vmem [shape: f32[1,128], index: 2, kind: input, shape index: {}]   ;;  %s668_s3 = inlined_call_operand.vmem [shape: f32[16,128], index: 3, kind: output, shape index: {}]  }
   0x1   :  { %v495_v0 = vld [vmem:[%s665_s1 + $0x78] sm:$0xff]   ;;  %v499_v4 = vld [vmem:[%s665_s1 + $0x70] sm:$0xff]   ;;  %v503_v8 = vld [vmem:[%s665_s1 + $0x68] sm:$0xff]  }
   0x2   :  { %v496_v1 = vld [vmem:[%s665_s1 + $0xf8] sm:$0xff]   ;;  %450 = vmatprep.subr.bf16.mxu0 %v495_v0  ;;  %v500_v5 = vld [vmem:[%s665_s1 + $0xf0] sm:$0xff]   ;;  %v504_v9 = vld [vmem:[%s665_s1 + $0xe8] sm:$0xff]  }
   0x3   :  { %v497_v2 = vld [vmem:[%s665_s1 + $0x38] sm:$0xff]   ;;  %472 = vmatprep.subr.bf16.mxu1 %v496_v1  ;;  %v501_v6 = vld [vmem:[%s665_s1 + $0x30] sm:$0xff]   ;;  %v505_v10 = vld [vmem:[%s665_s1 + $0x28] sm:$0xff]  }
   0x4   :  { %v498_v3 = vld [vmem:[%s665_s1 + $0xb8] sm:$0xff]   ;;  %451 = vmatpush3.bf16.msra.mxu0 %v497_v2  ;;  %v502_v7 = vld [vmem:[%s665_s1 + $0xb0] sm:$0xff]   ;;  %v506_v11 = vld [vmem:[%s665_s1 + $0xa8] sm:$0xff]  }
   0x5   :  { %473 = vmatpush3.bf16.msra.mxu1 %v498_v3  ;;  %452 = vmatprep.subr.bf16.mxu0 %v499_v4  ;;  %v507_v12 = vld [vmem:[%s665_s1 + $0x60] sm:$0xff]   ;;  %v511_v16 = vld [vmem:[%s665_s1 + $0x58] sm:$0xff]   ;;  %v515_v20 = vld [vmem:[%s665_s1 + $0x50] sm:$0xff]  }
   0x6   :  { %474 = vmatprep.subr.bf16.mxu1 %v500_v5  ;;  %v508_v13 = vld [vmem:[%s665_s1 + $0xe0] sm:$0xff]   ;;  %v512_v17 = vld [vmem:[%s665_s1 + $0xd8] sm:$0xff]   ;;  %v516_v21 = vld [vmem:[%s665_s1 + $0xd0] sm:$0xff]  }
   0x7   :  { %v509_v14 = vld [vmem:[%s665_s1 + $0x20] sm:$0xff]   ;;  %v513_v18 = vld [vmem:[%s665_s1 + $0x18] sm:$0xff]   ;;  %v517_v22 = vld [vmem:[%s665_s1 + $0x10] sm:$0xff]  }
   0x8   :  { %453 = vmatpush3.bf16.msra.mxu0 %v501_v6  ;;  %v510_v15 = vld [vmem:[%s665_s1 + $0xa0] sm:$0xff]   ;;  %v514_v19 = vld [vmem:[%s665_s1 + $0x98] sm:$0xff]   ;;  %v518_v23 = vld [vmem:[%s665_s1 + $0x90] sm:$0xff]  }
   0x9   :  { %475 = vmatpush3.bf16.msra.mxu1 %v502_v7  ;;  %454 = vmatprep.subr.bf16.mxu0 %v503_v8  ;;  %v519_v24 = vld [vmem:[%s665_s1 + $0x48] sm:$0xff]   ;;  %v523_v28 = vld [vmem:[%s665_s1 + $0x40] sm:$0xff]   ;;  %v23_v33 = vld [vmem:[%s666_s0 + $0x10] sm:$0xff] }
   0xa   :  { %476 = vmatprep.subr.bf16.mxu1 %v504_v9  ;;  %v520_v25 = vld [vmem:[%s665_s1 + $0xc8] sm:$0xff]   ;;  %v524_v29 = vld [vmem:[%s665_s1 + $0xc0] sm:$0xff]   ;;  %v27_v37 = vmax.bf16 %v527_v35, %v23_v33  ;;  %v24_v38 = vld [vmem:[%s666_s0 + $0x18] sm:$0xff] }
   0xb   :  { %v521_v26 = vld [vmem:[%s665_s1 + $0x8] sm:$0xff]   ;;  %v525_v30 = vld [vmem:[%s665_s1] sm:$0xff]   ;;  %v28_v40 = vmax.bf16 %v527_v35, %v24_v38 }
   0xc   :  { %455 = vmatpush3.bf16.msra.mxu0 %v505_v10  ;;  %v522_v27 = vld [vmem:[%s665_s1 + $0x88] sm:$0xff]   ;;  %v526_v31 = vld [vmem:[%s665_s1 + $0x80] sm:$0xff]  }
   0xd   :  { %477 = vmatpush3.bf16.msra.mxu1 %v506_v11  ;;  %456 = vmatprep.subr.bf16.mxu0 %v507_v12  ;;  %v21_v32 = vld [vmem:[%s666_s0] sm:$0xff]  ;;  %v22_v34 = vld [vmem:[%s666_s0 + $0x8] sm:$0xff] }
   0xe   :  { %478 = vmatprep.subr.bf16.mxu1 %v508_v13  ;;  %v25_v36 = vmax.bf16 %v527_v35, %v21_v32  ;;  %v26_v39 = vmax.bf16 %v527_v35, %v22_v34  ;;  %v449_v52 = vld [vmem:[%s667_s2] ss:$0 sm:$0xff] }
  0x10   :  { %457 = vmatpush3.bf16.msra.mxu0 %v509_v14  ;;  %v414_v41 = vcombine.high %v25_v36, %v27_v37  ;;  %v413_v42 = vcombine.low %v25_v36, %v27_v37  ;;  %v416_v43 = vcombine.high %v26_v39, %v28_v40  ;;  %v415_v44 = vcombine.low %v26_v39, %v28_v40 }
  0x11   :  { %479 = vmatpush3.bf16.msra.mxu1 %v510_v15  ;;  %458 = vmatprep.subr.bf16.mxu0 %v511_v16 }
  0x12   :  { %480 = vmatprep.subr.bf16.mxu1 %v512_v17  ;;  %339 = vmatprep.mubr.bf16.mxu0 %v414_v41 }
  0x13   :  { %380 = vmatprep.mubr.bf16.mxu1 %v416_v43 }
  0x14   :  { %459 = vmatpush3.bf16.msra.mxu0 %v513_v18 }
  0x15   :  { %481 = vmatpush3.bf16.msra.mxu1 %v514_v19  ;;  %460 = vmatprep.subr.bf16.mxu0 %v515_v20 }
  0x16   :  { %482 = vmatprep.subr.bf16.mxu1 %v516_v21 }
  0x18   :  { %461 = vmatpush3.bf16.msra.mxu0 %v517_v22 }
  0x19   :  { %483 = vmatpush3.bf16.msra.mxu1 %v518_v23  ;;  %462 = vmatprep.subr.bf16.mxu0 %v519_v24 }
  0x1a   :  { %484 = vmatprep.subr.bf16.mxu1 %v520_v25 }
  0x1c   :  { %463 = vmatpush3.bf16.msra.mxu0 %v521_v26 }
  0x1d   :  { %485 = vmatpush3.bf16.msra.mxu1 %v522_v27  ;;  %464 = vmatprep.subr.bf16.mxu0 %v523_v28 }
  0x1e   :  { %486 = vmatprep.subr.bf16.mxu1 %v524_v29 }
  0x20   :  { %465 = vmatpush3.bf16.msra.mxu0 %v525_v30 }
  0x21   :  { %487 = vmatpush3.bf16.msra.mxu1 %v526_v31 }
  0x23   :  { %340 = vmatmul.mubr.bf16.vlgmr.msra.gmra.mxu0 %v413_v42 }
  0x24   :  { %381 = vmatmul.mubr.bf16.vlgmr.msra.gmra.mxu1 %v415_v44 }
  0xe3   :  { %v466_v45 = vpop.f32.mrf.mxu0 }
  0xe4   :  { %v488_v46 = vpop.f32.mrf.mxu1 }
  0xe5   :  { %v467_v47 = vpop.f32.mrf.mxu0 }
  0xe6   :  { %v468_v48 = vadd.f32 %v467_v47, %v466_v45  ;;  %v489_v49 = vpop.f32.mrf.mxu1 }
  0xe7   :  { %v490_v50 = vadd.f32 %v489_v49, %v488_v46  ;;  %v469_v51 = vpop.f32.mrf.mxu0 }
  0xe8   :  { %v491_v53 = vpop.f32.mrf.mxu1 }
  0xe9   :  { %v383_v54 = vadd.f32 %v490_v50, %v468_v48  ;;  %v470_v55 = vpop.f32.mrf.mxu0 }
  0xea   :  { %v471_v56 = vadd.f32 %v470_v55, %v469_v51  ;;  %v492_v57 = vpop.f32.mrf.mxu1 }
  0xeb   :  { %v405_v58 = vadd.f32 %v449_v52, %v383_v54  ;;  %v493_v59 = vadd.f32 %v492_v57, %v491_v53 }
  0xed   :  { %407 = vst [vmem:[%s668_s3] sm:$0xff] %v405_v58  ;;  %v386_v60 = vadd.f32 %v493_v59, %v471_v56 }
  0xef   :  { %v406_v61 = vadd.f32 %v449_v52, %v386_v60 }
  0xf1   :  { %408 = vst [vmem:[%s668_s3 + $0x8] sm:$0xff] %v406_v61 }

// kernel: _lambda_.62
= control target key start
LH: loop header
LB: loop body
LE: loop exit
PB: predicated region body
PF: predicated region fallthrough
CT: control target
= control target key end

     0   :  { %v348_v14 = vmov 0   ;;  %s444_s1 = inlined_call_operand.vmem [shape: bf16[256,128], index: 1, kind: input, shape index: {}]   ;;  %s445_s0 = inlined_call_operand.vmem [shape: bf16[32,256], index: 0, kind: input, shape index: {}]   ;;  %s446_s2 = inlined_call_operand.vmem [shape: f32[1,128], index: 2, kind: input, shape index: {}]   ;;  %s447_s3 = inlined_call_operand.vmem [shape: f32[32,128], index: 3, kind: output, shape index: {}]  }
   0x1   :  { %v332_v0 = vld [vmem:[%s444_s1 + $0x78] sm:$0xff]   ;;  %v334_v2 = vld [vmem:[%s444_s1 + $0x70] sm:$0xff]   ;;  %v336_v4 = vld [vmem:[%s444_s1 + $0x68] sm:$0xff]  }
   0x2   :  { %v333_v1 = vld [vmem:[%s444_s1 + $0x38] sm:$0xff]   ;;  %287 = vmatprep.subr.bf16.mxu0 %v332_v0  ;;  %315 = vmatprep.subr.bf16.mxu1 %v332_v0  ;;  %v335_v3 = vld [vmem:[%s444_s1 + $0x30] sm:$0xff]   ;;  %v337_v5 = vld [vmem:[%s444_s1 + $0x28] sm:$0xff]  }
   0x3   :  { %288 = vmatpush3.bf16.msra.mxu0 %v333_v1  ;;  %323 = vmatpush3.bf16.msra.mxu1 %v333_v1  ;;  %v338_v6 = vld [vmem:[%s444_s1 + $0x60] sm:$0xff]   ;;  %v340_v8 = vld [vmem:[%s444_s1 + $0x58] sm:$0xff]   ;;  %v342_v10 = vld [vmem:[%s444_s1 + $0x50] sm:$0xff]  }
   0x4   :  { %289 = vmatprep.subr.bf16.mxu0 %v334_v2  ;;  %316 = vmatprep.subr.bf16.mxu1 %v334_v2  ;;  %v339_v7 = vld [vmem:[%s444_s1 + $0x20] sm:$0xff]   ;;  %v341_v9 = vld [vmem:[%s444_s1 + $0x18] sm:$0xff]   ;;  %v24_v12 = vld [vmem:[%s445_s0 + $0x8] sm:$0xff] }
   0x5   :  { %v23_v11 = vld [vmem:[%s445_s0] sm:$0xff]  ;;  %v25_v13 = vld [vmem:[%s445_s0 + $0x10] sm:$0xff]  ;;  %v28_v16 = vmax.bf16 %v348_v14, %v24_v12  ;;  %v26_v17 = vld [vmem:[%s445_s0 + $0x18] sm:$0xff] }
   0x6   :  { %v27_v15 = vmax.bf16 %v348_v14, %v23_v11  ;;  %v29_v18 = vmax.bf16 %v348_v14, %v25_v13  ;;  %v30_v19 = vmax.bf16 %v348_v14, %v26_v17  ;;  %v343_v20 = vld [vmem:[%s444_s1 + $0x10] sm:$0xff]   ;;  %v344_v22 = vld [vmem:[%s444_s1 + $0x48] sm:$0xff]   ;;  %v346_v25 = vld [vmem:[%s444_s1 + $0x40] sm:$0xff]  }
   0x7   :  { %290 = vmatpush3.bf16.msra.mxu0 %v335_v3  ;;  %324 = vmatpush3.bf16.msra.mxu1 %v335_v3  ;;  %v345_v24 = vld [vmem:[%s444_s1 + $0x8] sm:$0xff]   ;;  %v347_v26 = vld [vmem:[%s444_s1] sm:$0xff]  }
   0x8   :  { %291 = vmatprep.subr.bf16.mxu0 %v336_v4  ;;  %317 = vmatprep.subr.bf16.mxu1 %v336_v4  ;;  %v267_v21 = vcombine.high %v27_v15, %v28_v16  ;;  %v269_v23 = vcombine.high %v29_v18, %v30_v19  ;;  %v266_v27 = vcombine.low %v27_v15, %v28_v16  ;;  %v286_v32 = vld [vmem:[%s446_s2] ss:$0 sm:$0xff] }
   0x9   :  { %v268_v28 = vcombine.low %v29_v18, %v30_v19 }
   0xa   :  { %215 = vmatprep.mubr.bf16.mxu0 %v267_v21  ;;  %223 = vmatprep.mubr.bf16.mxu1 %v269_v23 }
   0xb   :  { %292 = vmatpush3.bf16.msra.mxu0 %v337_v5  ;;  %325 = vmatpush3.bf16.msra.mxu1 %v337_v5 }
   0xc   :  { %293 = vmatprep.subr.bf16.mxu0 %v338_v6  ;;  %318 = vmatprep.subr.bf16.mxu1 %v338_v6 }
   0xf   :  { %294 = vmatpush3.bf16.msra.mxu0 %v339_v7  ;;  %326 = vmatpush3.bf16.msra.mxu1 %v339_v7 }
  0x10   :  { %295 = vmatprep.subr.bf16.mxu0 %v340_v8  ;;  %319 = vmatprep.subr.bf16.mxu1 %v340_v8 }
  0x13   :  { %296 = vmatpush3.bf16.msra.mxu0 %v341_v9  ;;  %327 = vmatpush3.bf16.msra.mxu1 %v341_v9 }
  0x14   :  { %297 = vmatprep.subr.bf16.mxu0 %v342_v10  ;;  %320 = vmatprep.subr.bf16.mxu1 %v342_v10 }
  0x17   :  { %298 = vmatpush3.bf16.msra.mxu0 %v343_v20  ;;  %328 = vmatpush3.bf16.msra.mxu1 %v343_v20 }
  0x18   :  { %299 = vmatprep.subr.bf16.mxu0 %v344_v22  ;;  %321 = vmatprep.subr.bf16.mxu1 %v344_v22 }
  0x1b   :  { %300 = vmatpush3.bf16.msra.mxu0 %v345_v24  ;;  %329 = vmatpush3.bf16.msra.mxu1 %v345_v24 }
  0x1c   :  { %301 = vmatprep.subr.bf16.mxu0 %v346_v25  ;;  %322 = vmatprep.subr.bf16.mxu1 %v346_v25 }
  0x1f   :  { %302 = vmatpush3.bf16.msra.mxu0 %v347_v26  ;;  %330 = vmatpush3.bf16.msra.mxu1 %v347_v26 }
  0x22   :  { %216 = vmatmul.mubr.bf16.vlgmr.msra.gmra.mxu0 %v266_v27  ;;  %224 = vmatmul.mubr.bf16.vlgmr.msra.gmra.mxu1 %v268_v28 }
  0xe2   :  { %v303_v29 = vpop.f32.mrf.mxu0  ;;  %v309_v30 = vpop.f32.mrf.mxu1 }
  0xe4   :  { %v304_v31 = vpop.f32.mrf.mxu0  ;;  %v310_v33 = vpop.f32.mrf.mxu1 }
  0xe5   :  { %v305_v34 = vadd.f32 %v304_v31, %v303_v29  ;;  %v311_v35 = vadd.f32 %v310_v33, %v309_v30 }
  0xe6   :  { %v306_v36 = vpop.f32.mrf.mxu0  ;;  %v312_v37 = vpop.f32.mrf.mxu1 }
  0xe7   :  { %v254_v38 = vadd.f32 %v305_v34, %v286_v32  ;;  %v256_v39 = vadd.f32 %v311_v35, %v286_v32 }
  0xe8   :  { %v307_v40 = vpop.f32.mrf.mxu0  ;;  %v313_v41 = vpop.f32.mrf.mxu1 }
  0xe9   :  { %258 = vst [vmem:[%s447_s3] sm:$0xff] %v254_v38  ;;  %260 = vst [vmem:[%s447_s3 + $0x10] sm:$0xff] %v256_v39  ;;  %v308_v42 = vadd.f32 %v307_v40, %v306_v36  ;;  %v314_v43 = vadd.f32 %v313_v41, %v312_v37 }
  0xeb   :  { %v255_v44 = vadd.f32 %v308_v42, %v286_v32  ;;  %v257_v45 = vadd.f32 %v314_v43, %v286_v32 }
  0xed   :  { %259 = vst [vmem:[%s447_s3 + $0x8] sm:$0xff] %v255_v44  ;;  %261 = vst [vmem:[%s447_s3 + $0x18] sm:$0xff] %v257_v45 }

// kernel: _lambda_.68
= control target key start
LH: loop header
LB: loop body
LE: loop exit
PB: predicated region body
PF: predicated region fallthrough
CT: control target
= control target key end

     0   :  { %v476_v7 = vmov 0   ;;  %s636_s1 = inlined_call_operand.vmem [shape: bf16[128,128], index: 1, kind: input, shape index: {}]   ;;  %s637_s0 = inlined_call_operand.vmem [shape: bf16[128,128], index: 0, kind: input, shape index: {}]   ;;  %s638_s2 = inlined_call_operand.vmem [shape: f32[1,128], index: 2, kind: input, shape index: {}]   ;;  %s639_s3 = inlined_call_operand.vmem [shape: f32[128,128], index: 3, kind: output, shape index: {}]  }
   0x1   :  { %v468_v0 = vld [vmem:[%s636_s1 + $0x38] sm:$0xff]   ;;  %v469_v1 = vld [vmem:[%s636_s1 + $0x30] sm:$0xff]   ;;  %v470_v2 = vld [vmem:[%s636_s1 + $0x28] sm:$0xff]  }
   0x2   :  { %419 = vmatprep.subr.bf16.mxu0 %v468_v0  ;;  %451 = vmatprep.subr.bf16.mxu1 %v468_v0  ;;  %v471_v3 = vld [vmem:[%s636_s1 + $0x20] sm:$0xff]   ;;  %v472_v14 = vld [vmem:[%s636_s1 + $0x18] sm:$0xff]   ;;  %v473_v16 = vld [vmem:[%s636_s1 + $0x10] sm:$0xff]  }
   0x3   :  { %420 = vmatpush3.bf16.msra.mxu0 %v468_v0  ;;  %459 = vmatpush3.bf16.msra.mxu1 %v468_v0  ;;  %v35_v4 = vld [vmem:[%s637_s0] sm:$0xf]  ;;  %v36_v5 = vld [vmem:[%s637_s0 + $0x4] sm:$0xf]  ;;  %v474_v17 = vld [vmem:[%s636_s1 + $0x8] sm:$0xff]  }
   0x4   :  { %421 = vmatprep.subr.bf16.mxu0 %v469_v1  ;;  %452 = vmatprep.subr.bf16.mxu1 %v469_v1  ;;  %v43_v6 = vld [vmem:[%s637_s0 + $0x20] sm:$0xf]  ;;  %v51_v8 = vmax.bf16 %v476_v7, %v35_v4  ;;  %v52_v9 = vmax.bf16 %v476_v7, %v36_v5  ;;  %v44_v10 = vld [vmem:[%s637_s0 + $0x24] sm:$0xf]  ;;  %v37_v19 = vld [vmem:[%s637_s0 + $0x8] sm:$0xf] }
   0x5   :  { %v59_v11 = vmax.bf16 %v476_v7, %v43_v6  ;;  %v60_v12 = vmax.bf16 %v476_v7, %v44_v10  ;;  %v475_v18 = vld [vmem:[%s636_s1] sm:$0xff]   ;;  %v38_v20 = vld [vmem:[%s637_s0 + $0xc] sm:$0xf]  ;;  %v45_v21 = vld [vmem:[%s637_s0 + $0x28] sm:$0xf]  ;;  %v53_v27 = vmax.bf16 %v476_v7, %v37_v19 }
   0x6   :  { %v386_v13 = vcombine.low %v51_v8, %v52_v9  ;;  %v46_v22 = vld [vmem:[%s637_s0 + $0x2c] sm:$0xf]  ;;  %v39_v23 = vld [vmem:[%s637_s0 + $0x10] sm:$0xf]  ;;  %v40_v24 = vld [vmem:[%s637_s0 + $0x14] sm:$0xf]  ;;  %v54_v28 = vmax.bf16 %v476_v7, %v38_v20  ;;  %v61_v29 = vmax.bf16 %v476_v7, %v45_v21 }
   0x7   :  { %422 = vmatpush3.bf16.msra.mxu0 %v469_v1  ;;  %460 = vmatpush3.bf16.msra.mxu1 %v469_v1  ;;  %v390_v15 = vcombine.low %v59_v11, %v60_v12  ;;  %v47_v25 = vld [vmem:[%s637_s0 + $0x30] sm:$0xf]  ;;  %v48_v26 = vld [vmem:[%s637_s0 + $0x34] sm:$0xf]  ;;  %v62_v30 = vmax.bf16 %v476_v7, %v46_v22  ;;  %v55_v31 = vmax.bf16 %v476_v7, %v39_v23  ;;  %v41_v37 = vld [vmem:[%s637_s0 + $0x18] sm:$0xf] }
   0x8   :  { %423 = vmatprep.subr.bf16.mxu0 %v470_v2  ;;  %453 = vmatprep.subr.bf16.mxu1 %v470_v2  ;;  %v56_v32 = vmax.bf16 %v476_v7, %v40_v24  ;;  %v63_v33 = vmax.bf16 %v476_v7, %v47_v25  ;;  %v64_v34 = vmax.bf16 %v476_v7, %v48_v26  ;;  %v42_v40 = vld [vmem:[%s637_s0 + $0x1c] sm:$0xf]  ;;  %v49_v41 = vld [vmem:[%s637_s0 + $0x38] sm:$0xf]  ;;  %v402_v49 = vld [vmem:[%s638_s2] ss:$0 sm:$0xff] }
   0x9   :  { %435 = vmatprep.mubr.bf16.mxu0 %v386_v13  ;;  %443 = vmatprep.mubr.bf16.mxu1 %v390_v15  ;;  %v387_v35 = vcombine.low %v53_v27, %v54_v28  ;;  %v391_v36 = vcombine.low %v61_v29, %v62_v30  ;;  %v50_v42 = vld [vmem:[%s637_s0 + $0x3c] sm:$0xf]  ;;  %v57_v43 = vmax.bf16 %v476_v7, %v41_v37 }
   0xa   :  { %v388_v38 = vcombine.low %v55_v31, %v56_v32  ;;  %v392_v39 = vcombine.low %v63_v33, %v64_v34  ;;  %v58_v44 = vmax.bf16 %v476_v7, %v42_v40  ;;  %v65_v45 = vmax.bf16 %v476_v7, %v49_v41 }
   0xb   :  { %424 = vmatpush3.bf16.msra.mxu0 %v470_v2  ;;  %461 = vmatpush3.bf16.msra.mxu1 %v470_v2  ;;  %v66_v46 = vmax.bf16 %v476_v7, %v50_v42 }
   0xc   :  { %425 = vmatprep.subr.bf16.mxu0 %v471_v3  ;;  %454 = vmatprep.subr.bf16.mxu1 %v471_v3  ;;  %v389_v47 = vcombine.low %v57_v43, %v58_v44 }
   0xd   :  { %v393_v48 = vcombine.low %v65_v45, %v66_v46 }
   0xf   :  { %426 = vmatpush3.bf16.msra.mxu0 %v471_v3  ;;  %462 = vmatpush3.bf16.msra.mxu1 %v471_v3 }
  0x10   :  { %427 = vmatprep.subr.bf16.mxu0 %v472_v14  ;;  %455 = vmatprep.subr.bf16.mxu1 %v472_v14 }
  0x13   :  { %428 = vmatpush3.bf16.msra.mxu0 %v472_v14  ;;  %463 = vmatpush3.bf16.msra.mxu1 %v472_v14 }
  0x14   :  { %429 = vmatprep.subr.bf16.mxu0 %v473_v16  ;;  %456 = vmatprep.subr.bf16.mxu1 %v473_v16 }
  0x17   :  { %430 = vmatpush3.bf16.msra.mxu0 %v473_v16  ;;  %464 = vmatpush3.bf16.msra.mxu1 %v473_v16 }
  0x18   :  { %431 = vmatprep.subr.bf16.mxu0 %v474_v17  ;;  %457 = vmatprep.subr.bf16.mxu1 %v474_v17 }
  0x1b   :  { %432 = vmatpush3.bf16.msra.mxu0 %v474_v17  ;;  %465 = vmatpush3.bf16.msra.mxu1 %v474_v17 }
  0x1c   :  { %433 = vmatprep.subr.bf16.mxu0 %v475_v18  ;;  %458 = vmatprep.subr.bf16.mxu1 %v475_v18 }
  0x1f   :  { %434 = vmatpush3.bf16.msra.mxu0 %v475_v18  ;;  %466 = vmatpush3.bf16.msra.mxu1 %v475_v18 }
  0x22   :  { %436 = vmatmul.mubr.bf16.vlgmr.msra.gmra.mxu0 %v387_v35  ;;  %444 = vmatmul.mubr.bf16.vlgmr.msra.gmra.mxu1 %v391_v36 }
  0x23   :  { %439 = vmatprep.mubr.bf16.mxu0 %v388_v38  ;;  %447 = vmatprep.mubr.bf16.mxu1 %v392_v39 }
  0x2a   :  { %440 = vmatmul.mubr.bf16.gmra.mxu0 %v389_v47  ;;  %448 = vmatmul.mubr.bf16.gmra.mxu1 %v393_v48 }
  0xe2   :  { %v437_v50 = vpop.f32.mrf.mxu0  ;;  %v445_v51 = vpop.f32.mrf.mxu1 }
  0xe3   :  { %v352_v52 = vadd.f32 %v437_v50, %v402_v49  ;;  %v360_v53 = vadd.f32 %v445_v51, %v402_v49 }
  0xe4   :  { %v229_v54 = vpop.f32.mrf.mxu0  ;;  %v261_v55 = vpop.f32.mrf.mxu1 }
  0xe5   :  { %368 = vst [vmem:[%s639_s3 + $0x10] sm:$0xff] %v352_v52  ;;  %376 = vst [vmem:[%s639_s3 + $0x50] sm:$0xff] %v360_v53  ;;  %v350_v56 = vadd.f32 %v402_v49, %v229_v54  ;;  %v358_v57 = vadd.f32 %v402_v49, %v261_v55 }
  0xe6   :  { %v438_v58 = vpop.f32.mrf.mxu0  ;;  %v446_v59 = vpop.f32.mrf.mxu1 }
  0xe7   :  { %366 = vst [vmem:[%s639_s3] sm:$0xff] %v350_v56  ;;  %374 = vst [vmem:[%s639_s3 + $0x40] sm:$0xff] %v358_v57  ;;  %v353_v60 = vadd.f32 %v438_v58, %v402_v49  ;;  %v361_v61 = vadd.f32 %v446_v59, %v402_v49 }
  0xe8   :  { %v232_v62 = vpop.f32.mrf.mxu0  ;;  %v264_v63 = vpop.f32.mrf.mxu1 }
  0xe9   :  { %369 = vst [vmem:[%s639_s3 + $0x18] sm:$0xff] %v353_v60  ;;  %377 = vst [vmem:[%s639_s3 + $0x58] sm:$0xff] %v361_v61  ;;  %v351_v0 = vadd.f32 %v402_v49, %v232_v62  ;;  %v359_v1 = vadd.f32 %v402_v49, %v264_v63 }
  0xea   :  { %v441_v2 = vpop.f32.mrf.mxu0  ;;  %v449_v3 = vpop.f32.mrf.mxu1 }
  0xeb   :  { %367 = vst [vmem:[%s639_s3 + $0x8] sm:$0xff] %v351_v0  ;;  %375 = vst [vmem:[%s639_s3 + $0x48] sm:$0xff] %v359_v1  ;;  %v356_v4 = vadd.f32 %v441_v2, %v402_v49  ;;  %v364_v5 = vadd.f32 %v449_v3, %v402_v49 }
  0xec   :  { %v245_v6 = vpop.f32.mrf.mxu0  ;;  %v277_v7 = vpop.f32.mrf.mxu1 }
  0xed   :  { %372 = vst [vmem:[%s639_s3 + $0x30] sm:$0xff] %v356_v4  ;;  %380 = vst [vmem:[%s639_s3 + $0x70] sm:$0xff] %v364_v5  ;;  %v354_v8 = vadd.f32 %v402_v49, %v245_v6  ;;  %v362_v9 = vadd.f32 %v402_v49, %v277_v7 }
  0xee   :  { %v442_v10 = vpop.f32.mrf.mxu0  ;;  %v450_v11 = vpop.f32.mrf.mxu1 }
  0xef   :  { %370 = vst [vmem:[%s639_s3 + $0x20] sm:$0xff] %v354_v8  ;;  %378 = vst [vmem:[%s639_s3 + $0x60] sm:$0xff] %v362_v9  ;;  %v357_v12 = vadd.f32 %v442_v10, %v402_v49  ;;  %v365_v13 = vadd.f32 %v450_v11, %v402_v49 }
  0xf0   :  { %v248_v14 = vpop.f32.mrf.mxu0  ;;  %v280_v15 = vpop.f32.mrf.mxu1 }
  0xf1   :  { %373 = vst [vmem:[%s639_s3 + $0x38] sm:$0xff] %v357_v12  ;;  %381 = vst [vmem:[%s639_s3 + $0x78] sm:$0xff] %v365_v13  ;;  %v355_v16 = vadd.f32 %v402_v49, %v248_v14  ;;  %v363_v17 = vadd.f32 %v402_v49, %v280_v15 }
  0xf3   :  { %371 = vst [vmem:[%s639_s3 + $0x28] sm:$0xff] %v355_v16  ;;  %379 = vst [vmem:[%s639_s3 + $0x68] sm:$0xff] %v363_v17 }

// kernel: _lambda_.72
= control target key start
LH: loop header
LB: loop body
LE: loop exit
PB: predicated region body
PF: predicated region fallthrough
CT: control target
= control target key end

     0   :  { %s422_s9 = smov 0   ;;  %s554_s0 = inlined_call_operand.vmem [shape: f32[512,8], index: 0, kind: input, shape index: {}]   ;;  %s555_s1 = inlined_call_operand.vmem [shape: f32[1,8], index: 1, kind: output, shape index: {0}]   ;;  %s556_s2 = inlined_call_operand.vmem [shape: f32[1,8], index: 2, kind: output, shape index: {1}]  }
   0x1 LB: > { %s380_s10 = sadd.s32 4294967295, %s404_s9   ;;  %p383_p0 = scmp.ge.s32.totalorder %s404_s9, 1  ;;  %s404_s9 = sphi %s422_s9, %s13_s9  }
   0x2   : > { %p106_p1 = scmp.lt.s32.totalorder %s404_s9, 3 }
   0x4   : > { %p107_p2 = pnand %p383_p0, %p106_p1 }
   0x5   : > { %s384_s11 = sshll.u32 (!%p107_p2), %s380_s10, 5  ;;  %p386_p4 = scmp.ne.s32.totalorder (!%p107_p2), %s380_s10, 0 }
   0x6   : > { %110 = sbr.rel (%p107_p2) target bundleno = 102 (0x66), region = 24  ;;  %p124_p3 = scmp.lt.s32.totalorder (!%p107_p2), %s384_s11, 63 }
   0xb   : > { %s558_s11 = smov (!%p124_p3, %s384_s11), 63  ;;  %132 = sbr.rel (%p386_p4) target bundleno = 18 (0x12), region = 28 }
   0xc   : > { %s385_s12 = sshll.u32 %s558_s11, 3 }
   0xd   : > { %s433_s15 = scalar_lea.vmem %s554_s0, %s385_s12 }
  0x10   : > { %vm133_vm0 = vcmask 57344   ;;  %v406_v0 = vmov 0.0  }
  0x11   : > { %134 = vst.msk [vmem:[%s555_s1] sm:$0x1] %vm133_vm0, %v406_v0  ;;  %135 = vst.msk [vmem:[%s556_s2] sm:$0x1] %vm133_vm0, %v406_v0 }
  0x12 PF: > { %v136_v1 = vld [vmem:[%s433_s15] sm:$0xff]  ;;  %v137_v2 = vld [vmem:[%s433_s15 + $0x8] sm:$0xff]  ;;  %v138_v3 = vld [vmem:[%s433_s15 + $0x10] sm:$0xff]  ;;  %vm169_vm1 = vcmask 64512   ;;  %vm240_vm2 = vcmask 57344  }
  0x13   : > { %v170_v4 = vsel %vm169_vm1, %v136_v1, 0.0  ;;  %v171_v5 = vsel %vm169_vm1, %v137_v2, 0.0  ;;  %v173_v6 = vsel %vm169_vm1, %v138_v3, 0.0  ;;  %v139_v7 = vld [vmem:[%s433_s15 + $0x18] sm:$0xff]  ;;  %v140_v10 = vld [vmem:[%s433_s15 + $0x20] sm:$0xff]  ;;  %v141_v13 = vld [vmem:[%s433_s15 + $0x28] sm:$0xff]  ;;  %v243_v28 = vmul.f32 %v136_v1, %v136_v1 }
  0x14   : > { %v172_v8 = vadd.f32 %v171_v5, %v170_v4  ;;  %v175_v9 = vsel %vm169_vm1, %v139_v7, 0.0  ;;  %v177_v12 = vsel %vm169_vm1, %v140_v10, 0.0  ;;  %v179_v15 = vsel %vm169_vm1, %v141_v13, 0.0  ;;  %v142_v16 = vld [vmem:[%s433_s15 + $0x30] sm:$0xff]  ;;  %v143_v19 = vld [vmem:[%s433_s15 + $0x38] sm:$0xff]  ;;  %v144_v22 = vld [vmem:[%s433_s15 + $0x40] sm:$0xff] }
  0x15   : > { %v181_v18 = vsel %vm169_vm1, %v142_v16, 0.0  ;;  %v183_v21 = vsel %vm169_vm1, %v143_v19, 0.0  ;;  %v185_v24 = vsel %vm169_vm1, %v144_v22, 0.0  ;;  %v145_v25 = vld [vmem:[%s433_s15 + $0x48] sm:$0xff]  ;;  %v244_v29 = vmul.f32 %v137_v2, %v137_v2  ;;  %v146_v31 = vld [vmem:[%s433_s15 + $0x50] sm:$0xff]  ;;  %v147_v33 = vld [vmem:[%s433_s15 + $0x58] sm:$0xff] }
  0x16   : > { %v174_v11 = vadd.f32 %v173_v6, %v172_v8  ;;  %v187_v27 = vsel %vm169_vm1, %v145_v25, 0.0  ;;  %v245_v30 = vmul.f32 %v138_v3, %v138_v3  ;;  %v189_v34 = vsel %vm169_vm1, %v146_v31, 0.0  ;;  %v148_v42 = vld [vmem:[%s433_s15 + $0x60] sm:$0xff]  ;;  %v149_v48 = vld [vmem:[%s433_s15 + $0x68] sm:$0xff]  ;;  %v150_v54 = vld [vmem:[%s433_s15 + $0x70] sm:$0xff] }
  0x17   : > { %v246_v35 = vmul.f32 %v139_v7, %v139_v7  ;;  %v191_v37 = vsel %vm169_vm1, %v147_v33, 0.0  ;;  %v247_v38 = vmul.f32 %v140_v10, %v140_v10  ;;  %v275_v39 = vsel %vm169_vm1, %v243_v28, 0.0  ;;  %v151_v60 = vld [vmem:[%s433_s15 + $0x78] sm:$0xff]  ;;  %v152_v2 = vld [vmem:[%s433_s15 + $0x80] sm:$0xff]  ;;  %v153_v8 = vld [vmem:[%s433_s15 + $0x88] sm:$0xff] }
  0x18   : > { %v176_v14 = vadd.f32 %v175_v9, %v174_v11  ;;  %v276_v40 = vsel %vm169_vm1, %v244_v29, 0.0  ;;  %v278_v41 = vsel %vm169_vm1, %v245_v30, 0.0  ;;  %v193_v45 = vsel %vm169_vm1, %v148_v42, 0.0 }
  0x19   : > { %v277_v44 = vadd.f32 %v276_v40, %v275_v39  ;;  %v248_v46 = vmul.f32 %v141_v13, %v141_v13  ;;  %v280_v47 = vsel %vm169_vm1, %v246_v35, 0.0  ;;  %v195_v51 = vsel %vm169_vm1, %v149_v48, 0.0 }
  0x1a   : > { %v178_v17 = vadd.f32 %v177_v12, %v176_v14  ;;  %v249_v52 = vmul.f32 %v142_v16, %v142_v16  ;;  %v282_v53 = vsel %vm169_vm1, %v247_v38, 0.0  ;;  %v197_v57 = vsel %vm169_vm1, %v150_v54, 0.0  ;;  %v154_v14 = vld [vmem:[%s433_s15 + $0x90] sm:$0xff] }
  0x1b   : > { %v279_v50 = vadd.f32 %v278_v41, %v277_v44  ;;  %v250_v58 = vmul.f32 %v143_v19, %v143_v19  ;;  %v284_v59 = vsel %vm169_vm1, %v248_v46, 0.0  ;;  %v199_v63 = vsel %vm169_vm1, %v151_v60, 0.0  ;;  %v158_v38 = vld [vmem:[%s433_s15 + $0xb0] sm:$0xff]  ;;  %v159_v44 = vld [vmem:[%s433_s15 + $0xb8] sm:$0xff] }
  0x1c   : > { %v180_v20 = vadd.f32 %v179_v15, %v178_v17  ;;  %v251_v0 = vmul.f32 %v144_v22, %v144_v22  ;;  %v286_v1 = vsel %vm169_vm1, %v249_v52, 0.0  ;;  %v201_v5 = vsel %vm169_vm1, %v152_v2, 0.0 }
  0x1d   : > { %v281_v56 = vadd.f32 %v280_v47, %v279_v50  ;;  %v252_v6 = vmul.f32 %v145_v25, %v145_v25  ;;  %v288_v7 = vsel %vm169_vm1, %v250_v58, 0.0  ;;  %v203_v11 = vsel %vm169_vm1, %v153_v8, 0.0  ;;  %v160_v50 = vld [vmem:[%s433_s15 + $0xc0] sm:$0xff] }
  0x1e   : > { %v182_v23 = vadd.f32 %v181_v18, %v180_v20  ;;  %v253_v12 = vmul.f32 %v146_v31, %v146_v31  ;;  %v290_v13 = vsel %vm169_vm1, %v251_v0, 0.0  ;;  %v205_v17 = vsel %vm169_vm1, %v154_v14, 0.0  ;;  %v155_v20 = vld [vmem:[%s433_s15 + $0x98] sm:$0xff] }
  0x1f   : > { %v283_v62 = vadd.f32 %v282_v53, %v281_v56  ;;  %v254_v18 = vmul.f32 %v147_v33, %v147_v33  ;;  %v292_v19 = vsel %vm169_vm1, %v252_v6, 0.0  ;;  %v256_v30 = vmul.f32 %v149_v48, %v149_v48  ;;  %v161_v56 = vld [vmem:[%s433_s15 + $0xc8] sm:$0xff] }
  0x20   : > { %v184_v26 = vadd.f32 %v183_v21, %v182_v23  ;;  %v207_v23 = vsel %vm169_vm1, %v155_v20, 0.0  ;;  %v294_v25 = vsel %vm169_vm1, %v253_v12, 0.0  ;;  %v213_v41 = vsel %vm169_vm1, %v158_v38, 0.0 }
  0x21   : > { %v285_v4 = vadd.f32 %v284_v59, %v283_v62  ;;  %v296_v31 = vsel %vm169_vm1, %v254_v18, 0.0  ;;  %v215_v47 = vsel %vm169_vm1, %v159_v44, 0.0  ;;  %v259_v48 = vmul.f32 %v152_v2, %v152_v2  ;;  %v162_v62 = vld [vmem:[%s433_s15 + $0xd0] sm:$0xff] }
  0x22   : > { %v186_v32 = vadd.f32 %v185_v24, %v184_v26  ;;  %v255_v24 = vmul.f32 %v148_v42, %v148_v42  ;;  %v156_v26 = vld [vmem:[%s433_s15 + $0xa0] sm:$0xff]  ;;  %v258_v42 = vmul.f32 %v151_v60, %v151_v60  ;;  %v217_v53 = vsel %vm169_vm1, %v160_v50, 0.0 }
  0x23   : > { %v287_v10 = vadd.f32 %v286_v1, %v285_v4  ;;  %v209_v29 = vsel %vm169_vm1, %v156_v26, 0.0  ;;  %v219_v59 = vsel %vm169_vm1, %v161_v56, 0.0  ;;  %v261_v60 = vmul.f32 %v154_v14, %v154_v14  ;;  %v163_v4 = vld [vmem:[%s433_s15 + $0xd8] sm:$0xff] }
  0x24   : > { %v188_v36 = vadd.f32 %v187_v27, %v186_v32  ;;  %v157_v32 = vld [vmem:[%s433_s15 + $0xa8] sm:$0xff]  ;;  %v221_v1 = vsel %vm169_vm1, %v162_v62, 0.0  ;;  %v262_v2 = vmul.f32 %v155_v20, %v155_v20  ;;  %v265_v20 = vmul.f32 %v158_v38, %v158_v38 }
  0x25   : > { %v289_v16 = vadd.f32 %v288_v7, %v287_v10  ;;  %v211_v35 = vsel %vm169_vm1, %v157_v32, 0.0  ;;  %v223_v7 = vsel %vm169_vm1, %v163_v4, 0.0  ;;  %v164_v10 = vld [vmem:[%s433_s15 + $0xe0] sm:$0xff]  ;;  %v264_v14 = vmul.f32 %v157_v32, %v157_v32 }
  0x26   : > { %v190_v43 = vadd.f32 %v189_v34, %v188_v36  ;;  %v257_v36 = vmul.f32 %v150_v54, %v150_v54  ;;  %v260_v54 = vmul.f32 %v153_v8, %v153_v8  ;;  %v263_v8 = vmul.f32 %v156_v26, %v156_v26 }
  0x27   : > { %v291_v22 = vadd.f32 %v290_v13, %v289_v16  ;;  %v225_v13 = vsel %vm169_vm1, %v164_v10, 0.0  ;;  %v165_v16 = vld [vmem:[%s433_s15 + $0xe8] sm:$0xff]  ;;  %v266_v26 = vmul.f32 %v159_v44, %v159_v44  ;;  %v267_v32 = vmul.f32 %v160_v50, %v160_v50 }
  0x28   : > { %v192_v49 = vadd.f32 %v191_v37, %v190_v43  ;;  %v298_v37 = vsel %vm169_vm1, %v255_v24, 0.0  ;;  %v300_v43 = vsel %vm169_vm1, %v256_v30, 0.0  ;;  %v270_v44 = vmul.f32 %v163_v4, %v163_v4 }
  0x29   : > { %v293_v28 = vadd.f32 %v292_v19, %v291_v22  ;;  %v227_v19 = vsel %vm169_vm1, %v165_v16, 0.0  ;;  %v166_v22 = vld [vmem:[%s433_s15 + $0xf0] sm:$0xff] }
  0x2a   : > { %v194_v55 = vadd.f32 %v193_v45, %v192_v49  ;;  %v302_v49 = vsel %vm169_vm1, %v257_v36, 0.0  ;;  %v268_v36 = vmul.f32 %v161_v56, %v161_v56  ;;  %v273_v56 = vmul.f32 %v166_v22, %v166_v22 }
  0x2b   : > { %v295_v34 = vadd.f32 %v294_v25, %v293_v28  ;;  %v229_v25 = vsel %vm169_vm1, %v166_v22, 0.0  ;;  %v167_v28 = vld [vmem:[%s433_s15 + $0xf8] sm:$0xff] }
  0x2c   : > { %v196_v61 = vadd.f32 %v195_v51, %v194_v55  ;;  %v304_v55 = vsel %vm169_vm1, %v258_v42, 0.0 }
  0x2d   : > { %v297_v40 = vadd.f32 %v296_v31, %v295_v34  ;;  %v231_v31 = vsel %vm169_vm1, %v167_v28, 0.0 }
  0x2e   : > { %v198_v3 = vadd.f32 %v197_v57, %v196_v61  ;;  %v306_v61 = vsel %vm169_vm1, %v259_v48, 0.0  ;;  %v271_v48 = vmul.f32 %v164_v10, %v164_v10 }
  0x2f   : > { %v299_v46 = vadd.f32 %v298_v37, %v297_v40  ;;  %v320_v37 = vsel %vm169_vm1, %v266_v26, 0.0  ;;  %v269_v40 = vmul.f32 %v162_v62, %v162_v62 }
  0x30   : > { %v200_v9 = vadd.f32 %v199_v63, %v198_v3  ;;  %v308_v3 = vsel %vm169_vm1, %v260_v54, 0.0 }
  0x31   : > { %v301_v52 = vadd.f32 %v300_v43, %v299_v46 }
  0x32   : > { %v202_v15 = vadd.f32 %v201_v5, %v200_v9  ;;  %v310_v9 = vsel %vm169_vm1, %v261_v60, 0.0  ;;  %v168_v60 = vld [vmem:[%s555_s1] sm:$0x1] }
  0x33   : > { %v303_v58 = vadd.f32 %v302_v49, %v301_v52  ;;  %v326_v49 = vsel %vm169_vm1, %v269_v40, 0.0  ;;  %v272_v52 = vmul.f32 %v165_v16, %v165_v16 }
  0x34   : > { %v204_v21 = vadd.f32 %v203_v11, %v202_v15  ;;  %v312_v15 = vsel %vm169_vm1, %v262_v2, 0.0 }
  0x35   : > { %v305_v0 = vadd.f32 %v304_v55, %v303_v58  ;;  %v332_v62 = vsel %vm169_vm1, %v272_v52, 0.0 }
  0x36   : > { %v206_v27 = vadd.f32 %v205_v17, %v204_v21  ;;  %v314_v21 = vsel %vm169_vm1, %v263_v8, 0.0 }
  0x37   : > { %v307_v6 = vadd.f32 %v306_v61, %v305_v0  ;;  %v274_v61 = vmul.f32 %v167_v28, %v167_v28 }
  0x38   : > { %v208_v33 = vadd.f32 %v207_v23, %v206_v27  ;;  %v316_v27 = vsel %vm169_vm1, %v264_v14, 0.0 }
  0x39   : > { %v309_v12 = vadd.f32 %v308_v3, %v307_v6  ;;  %v336_v4 = vsel %vm169_vm1, %v274_v61, 0.0 }
  0x3a   : > { %v210_v39 = vadd.f32 %v209_v29, %v208_v33  ;;  %v318_v33 = vsel %vm169_vm1, %v265_v20, 0.0 }
  0x3b   : > { %v311_v18 = vadd.f32 %v310_v9, %v309_v12  ;;  %v242_v12 = vld [vmem:[%s556_s2] sm:$0x1] }
  0x3c   : > { %v212_v45 = vadd.f32 %v211_v35, %v210_v39 }
  0x3d   : > { %v313_v24 = vadd.f32 %v312_v15, %v311_v18 }
  0x3e   : > { %v214_v51 = vadd.f32 %v213_v41, %v212_v45  ;;  %v322_v41 = vsel %vm169_vm1, %v267_v32, 0.0  ;;  %v324_v45 = vsel %vm169_vm1, %v268_v36, 0.0 }
  0x3f   : > { %v315_v30 = vadd.f32 %v314_v21, %v313_v24 }
  0x40   : > { %v216_v57 = vadd.f32 %v215_v47, %v214_v51 }
  0x41   : > { %v317_v35 = vadd.f32 %v316_v27, %v315_v30 }
  0x42   : > { %v218_v63 = vadd.f32 %v217_v53, %v216_v57  ;;  %v328_v53 = vsel %vm169_vm1, %v270_v44, 0.0  ;;  %v330_v57 = vsel %vm169_vm1, %v271_v48, 0.0 }
  0x43   : > { %v319_v39 = vadd.f32 %v318_v33, %v317_v35 }
  0x44   : > { %v220_v5 = vadd.f32 %v219_v59, %v218_v63 }
  0x45   : > { %v321_v43 = vadd.f32 %v320_v37, %v319_v39 }
  0x46   : > { %v222_v11 = vadd.f32 %v221_v1, %v220_v5  ;;  %v334_v1 = vsel %vm169_vm1, %v273_v56, 0.0 }
  0x47   : > { %v323_v47 = vadd.f32 %v322_v41, %v321_v43 }
  0x48   : > { %v224_v17 = vadd.f32 %v223_v7, %v222_v11 }
  0x49   : > { %v325_v51 = vadd.f32 %v324_v45, %v323_v47 }
  0x4a   : > { %v226_v23 = vadd.f32 %v225_v13, %v224_v17 }
  0x4b   : > { %v327_v55 = vadd.f32 %v326_v49, %v325_v51 }
  0x4c   : > { %v228_v29 = vadd.f32 %v227_v19, %v226_v23 }
  0x4d   : > { %v329_v59 = vadd.f32 %v328_v53, %v327_v55 }
  0x4e   : > { %v230_v34 = vadd.f32 %v229_v25, %v228_v29 }
  0x4f   : > { %v331_v0 = vadd.f32 %v330_v57, %v329_v59 }
  0x50   : > { %v232_v38 = vadd.f32 %v231_v31, %v230_v34 }
  0x51   : > { %v333_v3 = vadd.f32 %v332_v62, %v331_v0 }
  0x52   : > { %v233_v42 = vrot.slane %v232_v38, 4 }
  0x53   : > { %v335_v5 = vadd.f32 %v334_v1, %v333_v3 }
  0x54   : > { %v234_v46 = vadd.f32 %v233_v42, %v232_v38 }
  0x55   : > { %v337_v6 = vadd.f32 %v336_v4, %v335_v5 }
  0x56   : > { %v235_v50 = vrot.slane %v234_v46, 2 }
  0x57   : > { %v338_v7 = vrot.slane %v337_v6, 4 }
  0x58   : > { %v236_v54 = vadd.f32 %v235_v50, %v234_v46 }
  0x59   : > { %v339_v8 = vadd.f32 %v338_v7, %v337_v6 }
  0x5a   : > { %v237_v58 = vrot.slane %v236_v54, 1 }
  0x5b   : > { %v340_v9 = vrot.slane %v339_v8, 2 }
  0x5c   : > { %v238_v63 = vadd.f32 %v237_v58, %v236_v54 }
  0x5d   : > { %v341_v10 = vadd.f32 %v340_v9, %v339_v8 }
  0x5e   : > { %v239_v2 = vadd.f32 %v238_v63, %v168_v60 }
  0x5f   : > { %v342_v11 = vrot.slane %v341_v10, 1 }
  0x60   : > { %241 = vst.msk [vmem:[%s555_s1] sm:$0x1] %vm240_vm2, %v239_v2 }
  0x61   : > { %v343_v13 = vadd.f32 %v342_v11, %v341_v10 }
  0x63   : > { %v344_v14 = vadd.f32 %v343_v13, %v242_v12 }
  0x65   : > { %345 = vst.msk [vmem:[%s556_s2] sm:$0x1] %vm240_vm2, %v344_v14 }
  0x66 PF: > { %s13_s9 = sadd.s32 1, %s404_s9  }
  0x67   : > { %p10_p5 = scmp.ge.s32.totalorder %s13_s9, 4  }
  0x69   :  { %12 = sbr.rel (!%p10_p5) target bundleno = 1 (0x1), region = 62 }

// kernel: _lambda_.73
= control target key start
LH: loop header
LB: loop body
LE: loop exit
PB: predicated region body
PF: predicated region fallthrough
CT: control target
= control target key end

     0   :  { %s422_s12 = smov 0   ;;  %s613_s0 = inlined_call_operand.vmem [shape: f32[512,8], index: 0, kind: input, shape index: {}]   ;;  %s614_s1 = inlined_call_operand.vmem [shape: f32[1,8], index: 1, kind: input, shape index: {}]   ;;  %s615_s2 = inlined_call_operand.vmem [shape: f32[1,8], index: 2, kind: input, shape index: {}]   ;;  %s616_s3 = inlined_call_operand.vmem [shape: f32[512,8], index: 3, kind: output, shape index: {}]  }
   0x1 LB: > { %s373_s13 = sadd.s32 4294967295, %s400_s12   ;;  %p377_p0 = scmp.ge.s32.totalorder %s400_s12, 1  ;;  %s400_s12 = sphi %s422_s12, %s13_s12  }
   0x2   : > { %p138_p1 = scmp.lt.s32.totalorder %s400_s12, 3 }
   0x4   : > { %p139_p2 = pnand %p377_p0, %p138_p1 }
   0x5   : > { %s378_s14 = sshll.u32 (!%p139_p2), %s373_s13, 5 }
   0x6   : > { %142 = sbr.rel (%p139_p2) target bundleno = 38 (0x26), region = 32  ;;  %p163_p3 = scmp.lt.s32.totalorder (!%p139_p2), %s378_s14, 63 }
   0xb   : > { %s618_s14 = smov (!%p163_p3, %s378_s14), 63  ;;  %v433_v0 = vld [vmem:[%s614_s1] ss:$0 sm:$0xff]  ;;  %vm284_vm0 = vcmask 64512  }
   0xc   : > { %s379_s15 = sshll.u32 %s618_s14, 3  ;;  %v443_v1 = vld [vmem:[%s615_s2] ss:$0 sm:$0xff] }
   0xd   : > { %s438_s20 = scalar_lea.vmem %s613_s0, %s379_s15  ;;  %s457_s25 = scalar_lea.vmem %s616_s3, %s379_s15 }
   0xe   : > { %v174_v2 = vld [vmem:[%s438_s20] sm:$0xff]  ;;  %v175_v3 = vld [vmem:[%s438_s20 + $0x8] sm:$0xff]  ;;  %v176_v4 = vld [vmem:[%s438_s20 + $0x10] sm:$0xff] }
   0xf   : > { %v213_v5 = vmul.f32 %v433_v0, %v174_v2  ;;  %v214_v6 = vmul.f32 %v433_v0, %v175_v3  ;;  %v215_v7 = vmul.f32 %v433_v0, %v176_v4  ;;  %v177_v8 = vld [vmem:[%s438_s20 + $0x18] sm:$0xff]  ;;  %v178_v9 = vld [vmem:[%s438_s20 + $0x20] sm:$0xff]  ;;  %v179_v10 = vld [vmem:[%s438_s20 + $0x28] sm:$0xff] }
  0x10   : > { %v216_v11 = vmul.f32 %v433_v0, %v177_v8  ;;  %v217_v12 = vmul.f32 %v433_v0, %v178_v9  ;;  %v218_v13 = vmul.f32 %v433_v0, %v179_v10  ;;  %v180_v14 = vld [vmem:[%s438_s20 + $0x30] sm:$0xff]  ;;  %v181_v15 = vld [vmem:[%s438_s20 + $0x38] sm:$0xff]  ;;  %v182_v16 = vld [vmem:[%s438_s20 + $0x40] sm:$0xff] }
  0x11   : > { %v252_v17 = vadd.f32 %v443_v1, %v213_v5  ;;  %v253_v18 = vadd.f32 %v443_v1, %v214_v6  ;;  %v254_v19 = vadd.f32 %v443_v1, %v215_v7  ;;  %v219_v20 = vmul.f32 %v433_v0, %v180_v14  ;;  %v183_v21 = vld [vmem:[%s438_s20 + $0x48] sm:$0xff]  ;;  %v184_v22 = vld [vmem:[%s438_s20 + $0x50] sm:$0xff]  ;;  %v185_v23 = vld [vmem:[%s438_s20 + $0x58] sm:$0xff] }
  0x12   : > { %v255_v24 = vadd.f32 %v443_v1, %v216_v11  ;;  %v256_v25 = vadd.f32 %v443_v1, %v217_v12  ;;  %v257_v26 = vadd.f32 %v443_v1, %v218_v13  ;;  %v220_v27 = vmul.f32 %v433_v0, %v181_v15  ;;  %v186_v28 = vld [vmem:[%s438_s20 + $0x60] sm:$0xff]  ;;  %v187_v29 = vld [vmem:[%s438_s20 + $0x68] sm:$0xff]  ;;  %v188_v30 = vld [vmem:[%s438_s20 + $0x70] sm:$0xff] }
  0x13   : > { %285 = vst.msk [vmem:[%s457_s25] sm:$0xff] %vm284_vm0, %v252_v17  ;;  %286 = vst.msk [vmem:[%s457_s25 + $0x8] sm:$0xff] %vm284_vm0, %v253_v18  ;;  %v258_v31 = vadd.f32 %v443_v1, %v219_v20  ;;  %v221_v32 = vmul.f32 %v433_v0, %v182_v16  ;;  %v222_v33 = vmul.f32 %v433_v0, %v183_v21  ;;  %v189_v35 = vld [vmem:[%s438_s20 + $0x78] sm:$0xff]  ;;  %v190_v40 = vld [vmem:[%s438_s20 + $0x80] sm:$0xff] }
  0x14   : > { %287 = vst.msk [vmem:[%s457_s25 + $0x10] sm:$0xff] %vm284_vm0, %v254_v19  ;;  %v223_v34 = vmul.f32 %v433_v0, %v184_v22  ;;  %288 = vst.msk [vmem:[%s457_s25 + $0x18] sm:$0xff] %vm284_vm0, %v255_v24  ;;  %v259_v36 = vadd.f32 %v443_v1, %v220_v27  ;;  %v224_v37 = vmul.f32 %v433_v0, %v185_v23  ;;  %v191_v41 = vld [vmem:[%s438_s20 + $0x88] sm:$0xff]  ;;  %v192_v42 = vld [vmem:[%s438_s20 + $0x90] sm:$0xff] }
  0x15   : > { %289 = vst.msk [vmem:[%s457_s25 + $0x20] sm:$0xff] %vm284_vm0, %v256_v25  ;;  %290 = vst.msk [vmem:[%s457_s25 + $0x28] sm:$0xff] %vm284_vm0, %v257_v26  ;;  %v225_v38 = vmul.f32 %v433_v0, %v186_v28  ;;  %v226_v39 = vmul.f32 %v433_v0, %v187_v29  ;;  %v260_v43 = vadd.f32 %v443_v1, %v221_v32  ;;  %v193_v47 = vld [vmem:[%s438_s20 + $0x98] sm:$0xff]  ;;  %v194_v48 = vld [vmem:[%s438_s20 + $0xa0] sm:$0xff] }
  0x16   : > { %291 = vst.msk [vmem:[%s457_s25 + $0x30] sm:$0xff] %vm284_vm0, %v258_v31  ;;  %v261_v44 = vadd.f32 %v443_v1, %v222_v33  ;;  %v262_v45 = vadd.f32 %v443_v1, %v223_v34  ;;  %v227_v46 = vmul.f32 %v433_v0, %v188_v30  ;;  %v195_v49 = vld [vmem:[%s438_s20 + $0xa8] sm:$0xff]  ;;  %292 = vst.msk [vmem:[%s457_s25 + $0x38] sm:$0xff] %vm284_vm0, %v259_v36  ;;  %v196_v54 = vld [vmem:[%s438_s20 + $0xb0] sm:$0xff] }
  0x17   : > { %v263_v50 = vadd.f32 %v443_v1, %v224_v37  ;;  %v264_v51 = vadd.f32 %v443_v1, %v225_v38  ;;  %v265_v52 = vadd.f32 %v443_v1, %v226_v39  ;;  %v228_v53 = vmul.f32 %v433_v0, %v189_v35  ;;  %293 = vst.msk [vmem:[%s457_s25 + $0x40] sm:$0xff] %vm284_vm0, %v260_v43  ;;  %v197_v59 = vld [vmem:[%s438_s20 + $0xb8] sm:$0xff]  ;;  %v198_v2 = vld [vmem:[%s438_s20 + $0xc0] sm:$0xff]  ;;  %v199_v3 = vld [vmem:[%s438_s20 + $0xc8] sm:$0xff] }
  0x18   : > { %294 = vst.msk [vmem:[%s457_s25 + $0x48] sm:$0xff] %vm284_vm0, %v261_v44  ;;  %295 = vst.msk [vmem:[%s457_s25 + $0x50] sm:$0xff] %vm284_vm0, %v262_v45  ;;  %v266_v55 = vadd.f32 %v443_v1, %v227_v46  ;;  %v229_v56 = vmul.f32 %v433_v0, %v190_v40  ;;  %v230_v57 = vmul.f32 %v433_v0, %v191_v41  ;;  %v200_v4 = vld [vmem:[%s438_s20 + $0xd0] sm:$0xff]  ;;  %v201_v9 = vld [vmem:[%s438_s20 + $0xd8] sm:$0xff] }
  0x19   : > { %v231_v58 = vmul.f32 %v433_v0, %v192_v42  ;;  %296 = vst.msk [vmem:[%s457_s25 + $0x58] sm:$0xff] %vm284_vm0, %v263_v50  ;;  %297 = vst.msk [vmem:[%s457_s25 + $0x60] sm:$0xff] %vm284_vm0, %v264_v51  ;;  %v267_v60 = vadd.f32 %v443_v1, %v228_v53  ;;  %v232_v61 = vmul.f32 %v433_v0, %v193_v47  ;;  %v202_v10 = vld [vmem:[%s438_s20 + $0xe0] sm:$0xff]  ;;  %v203_v11 = vld [vmem:[%s438_s20 + $0xe8] sm:$0xff] }
  0x1a   : > { %298 = vst.msk [vmem:[%s457_s25 + $0x68] sm:$0xff] %vm284_vm0, %v265_v52  ;;  %v233_v62 = vmul.f32 %v433_v0, %v194_v48  ;;  %v234_v63 = vmul.f32 %v433_v0, %v195_v49  ;;  %299 = vst.msk [vmem:[%s457_s25 + $0x70] sm:$0xff] %vm284_vm0, %v266_v55  ;;  %v268_v5 = vadd.f32 %v443_v1, %v229_v56  ;;  %v204_v16 = vld [vmem:[%s438_s20 + $0xf0] sm:$0xff]  ;;  %v205_v21 = vld [vmem:[%s438_s20 + $0xf8] sm:$0xff] }
  0x1b   : > { %v269_v6 = vadd.f32 %v443_v1, %v230_v57  ;;  %v270_v7 = vadd.f32 %v443_v1, %v231_v58  ;;  %v235_v8 = vmul.f32 %v433_v0, %v196_v54  ;;  %300 = vst.msk [vmem:[%s457_s25 + $0x78] sm:$0xff] %vm284_vm0, %v267_v60  ;;  %v271_v12 = vadd.f32 %v443_v1, %v232_v61 }
  0x1c   : > { %v272_v13 = vadd.f32 %v443_v1, %v233_v62  ;;  %v273_v14 = vadd.f32 %v443_v1, %v234_v63  ;;  %v236_v15 = vmul.f32 %v433_v0, %v197_v59  ;;  %301 = vst.msk [vmem:[%s457_s25 + $0x80] sm:$0xff] %vm284_vm0, %v268_v5  ;;  %v237_v18 = vmul.f32 %v433_v0, %v198_v2 }
  0x1d   : > { %302 = vst.msk [vmem:[%s457_s25 + $0x88] sm:$0xff] %vm284_vm0, %v269_v6  ;;  %303 = vst.msk [vmem:[%s457_s25 + $0x90] sm:$0xff] %vm284_vm0, %v270_v7  ;;  %v274_v17 = vadd.f32 %v443_v1, %v235_v8  ;;  %v238_v19 = vmul.f32 %v433_v0, %v199_v3  ;;  %v239_v20 = vmul.f32 %v433_v0, %v200_v4 }
  0x1e   : > { %304 = vst.msk [vmem:[%s457_s25 + $0x98] sm:$0xff] %vm284_vm0, %v271_v12  ;;  %305 = vst.msk [vmem:[%s457_s25 + $0xa0] sm:$0xff] %vm284_vm0, %v272_v13  ;;  %v275_v22 = vadd.f32 %v443_v1, %v236_v15  ;;  %v240_v23 = vmul.f32 %v433_v0, %v201_v9  ;;  %v241_v24 = vmul.f32 %v433_v0, %v202_v10 }
  0x1f   : > { %306 = vst.msk [vmem:[%s457_s25 + $0xa8] sm:$0xff] %vm284_vm0, %v273_v14  ;;  %v242_v25 = vmul.f32 %v433_v0, %v203_v11  ;;  %307 = vst.msk [vmem:[%s457_s25 + $0xb0] sm:$0xff] %vm284_vm0, %v274_v17  ;;  %v276_v26 = vadd.f32 %v443_v1, %v237_v18  ;;  %v277_v27 = vadd.f32 %v443_v1, %v238_v19 }
  0x20   : > { %v278_v28 = vadd.f32 %v443_v1, %v239_v20  ;;  %v243_v29 = vmul.f32 %v433_v0, %v204_v16  ;;  %308 = vst.msk [vmem:[%s457_s25 + $0xb8] sm:$0xff] %vm284_vm0, %v275_v22  ;;  %v279_v30 = vadd.f32 %v443_v1, %v240_v23  ;;  %v280_v31 = vadd.f32 %v443_v1, %v241_v24 }
  0x21   : > { %v281_v32 = vadd.f32 %v443_v1, %v242_v25  ;;  %v244_v33 = vmul.f32 %v433_v0, %v205_v21  ;;  %309 = vst.msk [vmem:[%s457_s25 + $0xc0] sm:$0xff] %vm284_vm0, %v276_v26  ;;  %310 = vst.msk [vmem:[%s457_s25 + $0xc8] sm:$0xff] %vm284_vm0, %v277_v27 }
  0x22   : > { %311 = vst.msk [vmem:[%s457_s25 + $0xd0] sm:$0xff] %vm284_vm0, %v278_v28  ;;  %v282_v34 = vadd.f32 %v443_v1, %v243_v29  ;;  %312 = vst.msk [vmem:[%s457_s25 + $0xd8] sm:$0xff] %vm284_vm0, %v279_v30 }
  0x23   : > { %313 = vst.msk [vmem:[%s457_s25 + $0xe0] sm:$0xff] %vm284_vm0, %v280_v31  ;;  %314 = vst.msk [vmem:[%s457_s25 + $0xe8] sm:$0xff] %vm284_vm0, %v281_v32  ;;  %v283_v35 = vadd.f32 %v443_v1, %v244_v33 }
  0x24   : > { %315 = vst.msk [vmem:[%s457_s25 + $0xf0] sm:$0xff] %vm284_vm0, %v282_v34 }
  0x25   : > { %316 = vst.msk [vmem:[%s457_s25 + $0xf8] sm:$0xff] %vm284_vm0, %v283_v35 }
  0x26 PF: > { %s13_s12 = sadd.s32 1, %s400_s12  }
  0x27   : > { %p10_p4 = scmp.ge.s32.totalorder %s13_s12, 4  }
  0x29   :  { %12 = sbr.rel (!%p10_p4) target bundleno = 1 (0x1), region = 62 }

// kernel: _lambda_.74
= control target key start
LH: loop header
LB: loop body
LE: loop exit
PB: predicated region body
PF: predicated region fallthrough
CT: control target
= control target key end

     0   :  { %s1518_s12 = smov 0   ;;  %s1520_s13 = smov 0   ;;  %s1716_s0 = inlined_call_operand.vmem [shape: bf16[512,128], index: 0, kind: input, shape index: {}]   ;;  %s1717_s1 = inlined_call_operand.vmem [shape: bf16[128,128], index: 1, kind: input, shape index: {}]   ;;  %s1718_s2 = inlined_call_operand.vmem [shape: f32[1,128], index: 2, kind: input, shape index: {}]   ;;  %s1719_s3 = inlined_call_operand.vmem [shape: f32[512,128], index: 3, kind: output, shape index: {}]  }
   0x1   :  { %s1522_s14 = smov 0  }
   0x2 LB: > { %s32_s15 = sadd.s32 1, %s1491_s13  ;;  %p1192_p0 = scmp.ge.s32.totalorder %s1495_s14, 1  ;;  %s1495_s14 = sphi %s1522_s14, %s13_s14   ;;  %s1491_s13 = sphi %s1520_s13, %s1721_s13   ;;  %s1487_s12 = sphi %s1518_s12, %s1720_s12  }
   0x3   : > { %p34_p1 = scmp.ge.s32.totalorder %s32_s15, 2  ;;  %p188_p2 = scmp.lt.s32.totalorder %s1495_s14, 3 }
   0x5   : > { %s1723_s15 = smov (%p34_p1, %s32_s15), 0  ;;  %p189_p3 = pnand %p1192_p0, %p188_p2 }
   0x6   : > { %s1193_s18 = sshll.u32 (!%p189_p3), %s1487_s12, 5 }
   0x7   : > { %192 = sbr.rel (%p189_p3) target bundleno = 327 (0x147), region = 32  ;;  %p230_p4 = scmp.lt.s32.totalorder (!%p189_p3), %s1193_s18, 63 }
   0xc   : > { %v1337_v0 = vld [vmem:[%s1717_s1 + $0x38] sm:$0xff]   ;;  %v1338_v1 = vld [vmem:[%s1717_s1 + $0x30] sm:$0xff]   ;;  %s1725_s18 = smov (!%p230_p4, %s1193_s18), 63  ;;  %v1339_v2 = vld [vmem:[%s1717_s1 + $0x28] sm:$0xff]   ;;  %v1497_v7 = vmov 0  }
   0xd   : > { %1248 = vmatprep.subr.bf16.mxu0 %v1337_v0  ;;  %1296 = vmatprep.subr.bf16.mxu1 %v1337_v0  ;;  %s1194_s23 = sshll.u32 %s1725_s18, 2  ;;  %v1340_v3 = vld [vmem:[%s1717_s1 + $0x20] sm:$0xff]   ;;  %v1341_v14 = vld [vmem:[%s1717_s1 + $0x18] sm:$0xff]   ;;  %v1342_v16 = vld [vmem:[%s1717_s1 + $0x10] sm:$0xff]   ;;  %s1196_s12 = sshll.u32 %s1725_s18, 3 }
   0xe   : > { %1249 = vmatpush3.bf16.msra.mxu0 %v1337_v0  ;;  %1304 = vmatpush3.bf16.msra.mxu1 %v1337_v0  ;;  %s1551_s26 = scalar_lea.vmem %s1716_s0, %s1194_s23  ;;  %v1343_v17 = vld [vmem:[%s1717_s1 + $0x8] sm:$0xff]   ;;  %v1344_v18 = vld [vmem:[%s1717_s1] sm:$0xff]   ;;  %s1663_s18 = scalar_lea.vmem %s1719_s3, %s1196_s12 }
   0xf   : > { %1250 = vmatprep.subr.bf16.mxu0 %v1338_v1  ;;  %1297 = vmatprep.subr.bf16.mxu1 %v1338_v1  ;;  %v296_v4 = vld [vmem:[%s1551_s26] sm:$0xf]  ;;  %v297_v5 = vld [vmem:[%s1551_s26 + $0x4] sm:$0xf]  ;;  %v298_v19 = vld [vmem:[%s1551_s26 + $0x8] sm:$0xf] }
  0x10   : > { %v312_v6 = vld [vmem:[%s1551_s26 + $0x40] sm:$0xf]  ;;  %v328_v8 = vmax.bf16 %v1497_v7, %v296_v4  ;;  %v329_v9 = vmax.bf16 %v1497_v7, %v297_v5  ;;  %v313_v10 = vld [vmem:[%s1551_s26 + $0x44] sm:$0xf]  ;;  %v299_v20 = vld [vmem:[%s1551_s26 + $0xc] sm:$0xf]  ;;  %v330_v27 = vmax.bf16 %v1497_v7, %v298_v19 }
  0x11   : > { %v344_v11 = vmax.bf16 %v1497_v7, %v312_v6  ;;  %v345_v12 = vmax.bf16 %v1497_v7, %v313_v10  ;;  %v314_v21 = vld [vmem:[%s1551_s26 + $0x48] sm:$0xf]  ;;  %v315_v22 = vld [vmem:[%s1551_s26 + $0x4c] sm:$0xf]  ;;  %v300_v23 = vld [vmem:[%s1551_s26 + $0x10] sm:$0xf]  ;;  %v331_v28 = vmax.bf16 %v1497_v7, %v299_v20 }
  0x12   : > { %1251 = vmatpush3.bf16.msra.mxu0 %v1338_v1  ;;  %1305 = vmatpush3.bf16.msra.mxu1 %v1338_v1  ;;  %v1197_v13 = vcombine.low %v328_v8, %v329_v9  ;;  %v301_v24 = vld [vmem:[%s1551_s26 + $0x14] sm:$0xf]  ;;  %v316_v25 = vld [vmem:[%s1551_s26 + $0x50] sm:$0xf]  ;;  %v346_v29 = vmax.bf16 %v1497_v7, %v314_v21  ;;  %v347_v30 = vmax.bf16 %v1497_v7, %v315_v22  ;;  %v302_v37 = vld [vmem:[%s1551_s26 + $0x18] sm:$0xf] }
  0x13   : > { %1252 = vmatprep.subr.bf16.mxu0 %v1339_v2  ;;  %1298 = vmatprep.subr.bf16.mxu1 %v1339_v2  ;;  %v1205_v15 = vcombine.low %v344_v11, %v345_v12  ;;  %v317_v26 = vld [vmem:[%s1551_s26 + $0x54] sm:$0xf]  ;;  %v332_v31 = vmax.bf16 %v1497_v7, %v300_v23  ;;  %v333_v32 = vmax.bf16 %v1497_v7, %v301_v24  ;;  %v303_v38 = vld [vmem:[%s1551_s26 + $0x1c] sm:$0xf]  ;;  %v318_v41 = vld [vmem:[%s1551_s26 + $0x58] sm:$0xf] }
  0x14   : > { %1264 = vmatprep.mubr.bf16.mxu0 %v1197_v13  ;;  %v348_v33 = vmax.bf16 %v1497_v7, %v316_v25  ;;  %v349_v34 = vmax.bf16 %v1497_v7, %v317_v26  ;;  %v1198_v35 = vcombine.low %v330_v27, %v331_v28  ;;  %v1206_v36 = vcombine.low %v346_v29, %v347_v30  ;;  %v319_v42 = vld [vmem:[%s1551_s26 + $0x5c] sm:$0xf]  ;;  %v304_v43 = vld [vmem:[%s1551_s26 + $0x20] sm:$0xf]  ;;  %v305_v44 = vld [vmem:[%s1551_s26 + $0x24] sm:$0xf] }
  0x15   : > { %1280 = vmatprep.mubr.bf16.mxu1 %v1205_v15  ;;  %v1199_v39 = vcombine.low %v332_v31, %v333_v32  ;;  %v320_v45 = vld [vmem:[%s1551_s26 + $0x60] sm:$0xf]  ;;  %v321_v46 = vld [vmem:[%s1551_s26 + $0x64] sm:$0xf]  ;;  %v334_v47 = vmax.bf16 %v1497_v7, %v302_v37  ;;  %v335_v48 = vmax.bf16 %v1497_v7, %v303_v38  ;;  %v350_v49 = vmax.bf16 %v1497_v7, %v318_v41  ;;  %v306_v57 = vld [vmem:[%s1551_s26 + $0x28] sm:$0xf] }
  0x16   : > { %1253 = vmatpush3.bf16.msra.mxu0 %v1339_v2  ;;  %1306 = vmatpush3.bf16.msra.mxu1 %v1339_v2  ;;  %v1207_v40 = vcombine.low %v348_v33, %v349_v34  ;;  %v351_v50 = vmax.bf16 %v1497_v7, %v319_v42  ;;  %v336_v51 = vmax.bf16 %v1497_v7, %v304_v43  ;;  %v307_v58 = vld [vmem:[%s1551_s26 + $0x2c] sm:$0xf]  ;;  %v322_v61 = vld [vmem:[%s1551_s26 + $0x68] sm:$0xf]  ;;  %v308_v63 = vld [vmem:[%s1551_s26 + $0x30] sm:$0xf] }
  0x17   : > { %1254 = vmatprep.subr.bf16.mxu0 %v1340_v3  ;;  %1299 = vmatprep.subr.bf16.mxu1 %v1340_v3  ;;  %v337_v52 = vmax.bf16 %v1497_v7, %v305_v44  ;;  %v352_v53 = vmax.bf16 %v1497_v7, %v320_v45  ;;  %v353_v54 = vmax.bf16 %v1497_v7, %v321_v46  ;;  %v323_v62 = vld [vmem:[%s1551_s26 + $0x6c] sm:$0xf]  ;;  %v309_v0 = vld [vmem:[%s1551_s26 + $0x34] sm:$0xf]  ;;  %v324_v1 = vld [vmem:[%s1551_s26 + $0x70] sm:$0xf] }
  0x18   : > { %v1200_v55 = vcombine.low %v334_v47, %v335_v48  ;;  %v1208_v56 = vcombine.low %v350_v49, %v351_v50  ;;  %v325_v2 = vld [vmem:[%s1551_s26 + $0x74] sm:$0xf]  ;;  %v339_v4 = vmax.bf16 %v1497_v7, %v307_v58  ;;  %v354_v5 = vmax.bf16 %v1497_v7, %v322_v61  ;;  %v327_v19 = vld [vmem:[%s1551_s26 + $0x7c] sm:$0xf]  ;;  %v1635_v26 = vld [vmem:[%s1718_s2] ss:$0 sm:$0xff] }
  0x19   : > { %v1201_v59 = vcombine.low %v336_v51, %v337_v52  ;;  %v1209_v60 = vcombine.low %v352_v53, %v353_v54  ;;  %v355_v6 = vmax.bf16 %v1497_v7, %v323_v62  ;;  %v340_v8 = vmax.bf16 %v1497_v7, %v308_v63 }
  0x1a   : > { %1255 = vmatpush3.bf16.msra.mxu0 %v1340_v3  ;;  %1307 = vmatpush3.bf16.msra.mxu1 %v1340_v3  ;;  %v338_v3 = vmax.bf16 %v1497_v7, %v306_v57  ;;  %v341_v9 = vmax.bf16 %v1497_v7, %v309_v0  ;;  %v356_v10 = vmax.bf16 %v1497_v7, %v324_v1 }
  0x1b   : > { %1256 = vmatprep.subr.bf16.mxu0 %v1341_v14  ;;  %1300 = vmatprep.subr.bf16.mxu1 %v1341_v14  ;;  %v357_v11 = vmax.bf16 %v1497_v7, %v325_v2  ;;  %v1210_v13 = vcombine.low %v354_v5, %v355_v6  ;;  %v359_v23 = vmax.bf16 %v1497_v7, %v327_v19 }
  0x1c   : > { %v1202_v12 = vcombine.low %v338_v3, %v339_v4  ;;  %v1203_v15 = vcombine.low %v340_v8, %v341_v9 }
  0x1e   : > { %1257 = vmatpush3.bf16.msra.mxu0 %v1341_v14  ;;  %1308 = vmatpush3.bf16.msra.mxu1 %v1341_v14  ;;  %v310_v14 = vld [vmem:[%s1551_s26 + $0x38] sm:$0xf] }
  0x1f   : > { %1258 = vmatprep.subr.bf16.mxu0 %v1342_v16  ;;  %1301 = vmatprep.subr.bf16.mxu1 %v1342_v16  ;;  %v342_v20 = vmax.bf16 %v1497_v7, %v310_v14 }
  0x22   : > { %1259 = vmatpush3.bf16.msra.mxu0 %v1342_v16  ;;  %1309 = vmatpush3.bf16.msra.mxu1 %v1342_v16  ;;  %v1211_v16 = vcombine.low %v356_v10, %v357_v11 }
  0x23   : > { %1260 = vmatprep.subr.bf16.mxu0 %v1343_v17  ;;  %1302 = vmatprep.subr.bf16.mxu1 %v1343_v17 }
  0x26   : > { %1261 = vmatpush3.bf16.msra.mxu0 %v1343_v17  ;;  %1310 = vmatpush3.bf16.msra.mxu1 %v1343_v17  ;;  %v311_v17 = vld [vmem:[%s1551_s26 + $0x3c] sm:$0xf] }
  0x27   : > { %1262 = vmatprep.subr.bf16.mxu0 %v1344_v18  ;;  %1303 = vmatprep.subr.bf16.mxu1 %v1344_v18  ;;  %v343_v21 = vmax.bf16 %v1497_v7, %v311_v17 }
  0x29   : > { %v1204_v24 = vcombine.low %v342_v20, %v343_v21 }
  0x2a   : > { %1263 = vmatpush3.bf16.msra.mxu0 %v1344_v18  ;;  %1311 = vmatpush3.bf16.msra.mxu1 %v1344_v18  ;;  %v326_v18 = vld [vmem:[%s1551_s26 + $0x78] sm:$0xf] }
  0x2b   : > { %v358_v22 = vmax.bf16 %v1497_v7, %v326_v18 }
  0x2d   : > { %1265 = vmatmul.mubr.bf16.vlgmr.msra.gmra.mxu0 %v1198_v35  ;;  %1281 = vmatmul.mubr.bf16.vlgmr.msra.gmra.mxu1 %v1206_v36  ;;  %v1212_v25 = vcombine.low %v358_v22, %v359_v23 }
  0x2e   : > { %1268 = vmatprep.mubr.bf16.mxu0 %v1199_v39  ;;  %1284 = vmatprep.mubr.bf16.mxu1 %v1207_v40 }
  0x35   : > { %1269 = vmatmul.mubr.bf16.gmra.mxu0 %v1200_v55  ;;  %1285 = vmatmul.mubr.bf16.gmra.mxu1 %v1208_v56 }
  0x36   : > { %1272 = vmatprep.mubr.bf16.mxu0 %v1201_v59  ;;  %1288 = vmatprep.mubr.bf16.mxu1 %v1209_v60 }
  0x3d   : > { %1273 = vmatmul.mubr.bf16.gmra.mxu0 %v1202_v12  ;;  %1289 = vmatmul.mubr.bf16.gmra.mxu1 %v1210_v13 }
  0x3e   : > { %1276 = vmatprep.mubr.bf16.mxu0 %v1203_v15  ;;  %1292 = vmatprep.mubr.bf16.mxu1 %v1211_v16 }
  0x45   : > { %1277 = vmatmul.mubr.bf16.gmra.mxu0 %v1204_v24  ;;  %1293 = vmatmul.mubr.bf16.gmra.mxu1 %v1212_v25 }
  0xed   : > { %v1266_v27 = vpop.f32.mrf.mxu0  ;;  %v1282_v28 = vpop.f32.mrf.mxu1 }
  0xee   : > { %v821_v29 = vadd.f32 %v1266_v27, %v1635_v26  ;;  %v837_v30 = vadd.f32 %v1282_v28, %v1635_v26 }
  0xef   : > { %v586_v31 = vpop.f32.mrf.mxu0  ;;  %v650_v32 = vpop.f32.mrf.mxu1 }
  0xf0   : > { %v853_v7 = vsub.f32 0.0, %v821_v29  ;;  %v869_v33 = vsub.f32 0.0, %v837_v30  ;;  %v819_v34 = vadd.f32 %v1635_v26, %v586_v31  ;;  %v835_v35 = vadd.f32 %v1635_v26, %v650_v32 }
  0xf1   : > { %v1267_v36 = vpop.f32.mrf.mxu0  ;;  %v1283_v37 = vpop.f32.mrf.mxu1 }
  0xf2   : > { %v887_v38 = vmul.f32 1.442695, %v853_v7  ;;  %v919_v39 = vmul.f32 1.442695, %v869_v33  ;;  %v851_v40 = vsub.f32 0.0, %v819_v34  ;;  %v867_v41 = vsub.f32 0.0, %v835_v35 }
  0xf3   : > { %v822_v42 = vadd.f32 %v1267_v36, %v1635_v26  ;;  %v838_v43 = vadd.f32 %v1283_v37, %v1635_v26  ;;  %v589_v44 = vpop.f32.mrf.mxu0  ;;  %v653_v45 = vpop.f32.mrf.mxu1 }
  0xf4   : > { %1345 = vpow2.f32 %v887_v38  ;;  %v883_v46 = vmul.f32 1.442695, %v851_v40  ;;  %v915_v47 = vmul.f32 1.442695, %v867_v41  ;;  %v820_v48 = vadd.f32 %v1635_v26, %v589_v44 }
  0xf5   : > { %1347 = vpow2.f32 %v919_v39  ;;  %v854_v49 = vsub.f32 0.0, %v822_v42  ;;  %v870_v50 = vsub.f32 0.0, %v838_v43  ;;  %v836_v51 = vadd.f32 %v1635_v26, %v653_v45  ;;  %v1270_v52 = vpop.f32.mrf.mxu0  ;;  %v1286_v53 = vpop.f32.mrf.mxu1 }
  0xf6   : > { %1349 = vpow2.f32 %v883_v46  ;;  %v852_v54 = vsub.f32 0.0, %v820_v48  ;;  %v825_v55 = vadd.f32 %v1270_v52, %v1635_v26  ;;  %v841_v56 = vadd.f32 %v1286_v53, %v1635_v26 }
  0xf7   : > { %1351 = vpow2.f32 %v915_v47  ;;  %v889_v57 = vmul.f32 1.442695, %v854_v49  ;;  %v921_v58 = vmul.f32 1.442695, %v870_v50  ;;  %v868_v59 = vsub.f32 0.0, %v836_v51  ;;  %v602_v60 = vpop.f32.mrf.mxu0  ;;  %v666_v61 = vpop.f32.mrf.mxu1 }
  0xf8   : > { %v885_v62 = vmul.f32 1.442695, %v852_v54  ;;  %v857_v63 = vsub.f32 0.0, %v825_v55  ;;  %v873_v0 = vsub.f32 0.0, %v841_v56  ;;  %v823_v1 = vadd.f32 %v1635_v26, %v602_v60 }
  0xf9   : > { %1353 = vpow2.f32 %v889_v57  ;;  %v917_v2 = vmul.f32 1.442695, %v868_v59  ;;  %v839_v3 = vadd.f32 %v1635_v26, %v666_v61  ;;  %v1271_v4 = vpop.f32.mrf.mxu0  ;;  %v1287_v5 = vpop.f32.mrf.mxu1 }
  0xfa   : > { %1355 = vpow2.f32 %v921_v58  ;;  %v895_v6 = vmul.f32 1.442695, %v857_v63  ;;  %v927_v8 = vmul.f32 1.442695, %v873_v0  ;;  %v855_v9 = vsub.f32 0.0, %v823_v1 }
  0xfb   : > { %1357 = vpow2.f32 %v885_v62  ;;  %v871_v10 = vsub.f32 0.0, %v839_v3  ;;  %v826_v11 = vadd.f32 %v1271_v4, %v1635_v26  ;;  %v842_v12 = vadd.f32 %v1287_v5, %v1635_v26  ;;  %v605_v13 = vpop.f32.mrf.mxu0  ;;  %v669_v14 = vpop.f32.mrf.mxu1 }
  0xfc   : > { %1359 = vpow2.f32 %v917_v2  ;;  %v891_v15 = vmul.f32 1.442695, %v855_v9  ;;  %v824_v16 = vadd.f32 %v1635_v26, %v605_v13  ;;  %v840_v17 = vadd.f32 %v1635_v26, %v669_v14 }
  0xfd   : > { %1361 = vpow2.f32 %v895_v6  ;;  %v923_v18 = vmul.f32 1.442695, %v871_v10  ;;  %v858_v19 = vsub.f32 0.0, %v826_v11  ;;  %v874_v20 = vsub.f32 0.0, %v842_v12  ;;  %v1274_v21 = vpop.f32.mrf.mxu0  ;;  %v1290_v22 = vpop.f32.mrf.mxu1 }
  0xfe   : > { %1363 = vpow2.f32 %v927_v8  ;;  %v856_v23 = vsub.f32 0.0, %v824_v16  ;;  %v872_v30 = vsub.f32 0.0, %v840_v17  ;;  %v829_v42 = vadd.f32 %v1274_v21, %v1635_v26 }
  0xff   : > { %1365 = vpow2.f32 %v891_v15  ;;  %v897_v24 = vmul.f32 1.442695, %v858_v19  ;;  %v929_v25 = vmul.f32 1.442695, %v874_v20  ;;  %v618_v27 = vpop.f32.mrf.mxu0  ;;  %v682_v28 = vpop.f32.mrf.mxu1  ;;  %v845_v44 = vadd.f32 %v1290_v22, %v1635_v26 }
 0x100   : > { %1367 = vpow2.f32 %v923_v18  ;;  %v893_v29 = vmul.f32 1.442695, %v856_v23  ;;  %v925_v39 = vmul.f32 1.442695, %v872_v30  ;;  %v861_v53 = vsub.f32 0.0, %v829_v42 }
 0x101   : > { %v1346_v31 = vpop.eup %1345  ;;  %1369 = vpow2.f32 %v897_v24  ;;  %v1275_v32 = vpop.f32.mrf.mxu0  ;;  %v877_v56 = vsub.f32 0.0, %v845_v44  ;;  %v827_v57 = vadd.f32 %v1635_v26, %v618_v27  ;;  %v843_v60 = vadd.f32 %v1635_v26, %v682_v28 }
 0x102   : > { %v1348_v7 = vpop.eup %1347  ;;  %v949_v33 = vadd.f32 1.0, %v1346_v31  ;;  %1371 = vpow2.f32 %v929_v25  ;;  %v1291_v36 = vpop.f32.mrf.mxu1  ;;  %v830_v0 = vadd.f32 %v1275_v32, %v1635_v26  ;;  %v903_v4 = vmul.f32 1.442695, %v861_v53 }
 0x103   : > { %v1350_v34 = vpop.eup %1349  ;;  %v965_v35 = vadd.f32 1.0, %v1348_v7  ;;  %1373 = vpow2.f32 %v893_v29  ;;  %v621_v40 = vpop.f32.mrf.mxu0  ;;  %v846_v5 = vadd.f32 %v1291_v36, %v1635_v26  ;;  %v935_v9 = vmul.f32 1.442695, %v877_v56 }
 0x104   : > { %v1352_v37 = vpop.eup %1351  ;;  %1375 = vrcp.f32 %v949_v33  ;;  %v947_v38 = vadd.f32 1.0, %v1350_v34  ;;  %v685_v47 = vpop.f32.mrf.mxu1  ;;  %v859_v10 = vsub.f32 0.0, %v827_v57  ;;  %v875_v13 = vsub.f32 0.0, %v843_v60 }
 0x105   : > { %1377 = vrcp.f32 %v965_v35  ;;  %v963_v41 = vadd.f32 1.0, %v1352_v37  ;;  %v1278_v50 = vpop.f32.mrf.mxu0  ;;  %v828_v14 = vadd.f32 %v1635_v26, %v621_v40  ;;  %v862_v18 = vsub.f32 0.0, %v830_v0 }
 0x106   : > { %v1354_v43 = vpop.eup %1353  ;;  %1379 = vrcp.f32 %v947_v38  ;;  %v1294_v61 = vpop.f32.mrf.mxu1  ;;  %v844_v19 = vadd.f32 %v1635_v26, %v685_v47  ;;  %v878_v23 = vsub.f32 0.0, %v846_v5  ;;  %v833_v24 = vadd.f32 %v1278_v50, %v1635_v26 }
 0x107   : > { %v1356_v45 = vpop.eup %1355  ;;  %1381 = vrcp.f32 %v963_v41  ;;  %v950_v46 = vadd.f32 1.0, %v1354_v43  ;;  %v634_v1 = vpop.f32.mrf.mxu0  ;;  %v899_v27 = vmul.f32 1.442695, %v859_v10  ;;  %v849_v28 = vadd.f32 %v1294_v61, %v1635_v26 }
 0x108   : > { %v1358_v48 = vpop.eup %1357  ;;  %v966_v49 = vadd.f32 1.0, %v1356_v45  ;;  %1383 = vpow2.f32 %v925_v39  ;;  %v698_v15 = vpop.f32.mrf.mxu1  ;;  %v931_v30 = vmul.f32 1.442695, %v875_v13  ;;  %v860_v31 = vsub.f32 0.0, %v828_v14 }
 0x109   : > { %v1360_v51 = vpop.eup %1359  ;;  %1385 = vrcp.f32 %v950_v46  ;;  %v948_v52 = vadd.f32 1.0, %v1358_v48  ;;  %v1279_v20 = vpop.f32.mrf.mxu0  ;;  %v831_v32 = vadd.f32 %v1635_v26, %v634_v1  ;;  %v905_v34 = vmul.f32 1.442695, %v862_v18 }
 0x10a   : > { %v1362_v54 = vpop.eup %1361  ;;  %1387 = vrcp.f32 %v966_v49  ;;  %v964_v55 = vadd.f32 1.0, %v1360_v51  ;;  %v1295_v7 = vpop.f32.mrf.mxu1  ;;  %v876_v35 = vsub.f32 0.0, %v844_v19  ;;  %v847_v36 = vadd.f32 %v1635_v26, %v698_v15 }
 0x10b   : > { %v1364_v58 = vpop.eup %1363  ;;  %1389 = vrcp.f32 %v948_v52  ;;  %v953_v59 = vadd.f32 1.0, %v1362_v54  ;;  %v637_v37 = vpop.f32.mrf.mxu0  ;;  %v937_v39 = vmul.f32 1.442695, %v878_v23  ;;  %v865_v40 = vsub.f32 0.0, %v833_v24 }
 0x10c   : > { %v1366_v62 = vpop.eup %1365  ;;  %1391 = vrcp.f32 %v964_v55  ;;  %v969_v63 = vadd.f32 1.0, %v1364_v58  ;;  %v834_v41 = vadd.f32 %v1279_v20, %v1635_v26  ;;  %v881_v44 = vsub.f32 0.0, %v849_v28  ;;  %v701_v56 = vpop.f32.mrf.mxu1 }
 0x10d   : > { %v1368_v2 = vpop.eup %1367  ;;  %1393 = vrcp.f32 %v953_v59  ;;  %v951_v3 = vadd.f32 1.0, %v1366_v62  ;;  %v850_v45 = vadd.f32 %v1295_v7, %v1635_v26  ;;  %v901_v47 = vmul.f32 1.442695, %v860_v31 }
 0x10e   : > { %v1370_v6 = vpop.eup %1369  ;;  %1395 = vrcp.f32 %v969_v63  ;;  %v967_v8 = vadd.f32 1.0, %v1368_v2  ;;  %v863_v48 = vsub.f32 0.0, %v831_v32  ;;  %v832_v49 = vadd.f32 %v1635_v26, %v637_v37 }
 0x10f   : > { %v1372_v11 = vpop.eup %1371  ;;  %1397 = vrcp.f32 %v951_v3  ;;  %v954_v12 = vadd.f32 1.0, %v1370_v6  ;;  %v933_v51 = vmul.f32 1.442695, %v876_v35  ;;  %v879_v52 = vsub.f32 0.0, %v847_v36 }
 0x110   : > { %v1374_v16 = vpop.eup %1373  ;;  %1399 = vrcp.f32 %v967_v8  ;;  %v970_v17 = vadd.f32 1.0, %v1372_v11  ;;  %v911_v54 = vmul.f32 1.442695, %v865_v40  ;;  %v866_v55 = vsub.f32 0.0, %v834_v41 }
 0x111   : > { %v1376_v21 = vpop.eup %1375  ;;  %1401 = vrcp.f32 %v954_v12  ;;  %v952_v22 = vadd.f32 1.0, %v1374_v16  ;;  %v943_v58 = vmul.f32 1.442695, %v881_v44  ;;  %v882_v59 = vsub.f32 0.0, %v850_v45 }
 0x112   : > { %v1378_v25 = vpop.eup %1377  ;;  %1045 = vst [vmem:[%s1663_s18 + $0x10] sm:$0xff] %v1376_v21  ;;  %1403 = vrcp.f32 %v970_v17  ;;  %v907_v61 = vmul.f32 1.442695, %v863_v48  ;;  %v864_v62 = vsub.f32 0.0, %v832_v49  ;;  %v939_v0 = vmul.f32 1.442695, %v879_v52 }
 0x113   : > { %v1380_v29 = vpop.eup %1379  ;;  %1061 = vst [vmem:[%s1663_s18 + $0x90] sm:$0xff] %v1378_v25  ;;  %1405 = vrcp.f32 %v952_v22  ;;  %v848_v1 = vadd.f32 %v1635_v26, %v701_v56  ;;  %v913_v3 = vmul.f32 1.442695, %v866_v55  ;;  %v945_v5 = vmul.f32 1.442695, %v882_v59 }
 0x114   : > { %v1382_v33 = vpop.eup %1381  ;;  %1043 = vst [vmem:[%s1663_s18] sm:$0xff] %v1380_v29  ;;  %1407 = vpow2.f32 %v903_v4  ;;  %v909_v8 = vmul.f32 1.442695, %v864_v62 }
 0x115   : > { %v1384_v38 = vpop.eup %1383  ;;  %1059 = vst [vmem:[%s1663_s18 + $0x80] sm:$0xff] %v1382_v33  ;;  %1409 = vpow2.f32 %v935_v9  ;;  %v880_v10 = vsub.f32 0.0, %v848_v1 }
 0x116   : > { %v1386_v42 = vpop.eup %1385  ;;  %v968_v43 = vadd.f32 1.0, %v1384_v38  ;;  %1411 = vpow2.f32 %v899_v27 }
 0x117   : > { %v1388_v46 = vpop.eup %1387  ;;  %1046 = vst [vmem:[%s1663_s18 + $0x18] sm:$0xff] %v1386_v42  ;;  %1413 = vpow2.f32 %v931_v30  ;;  %v941_v17 = vmul.f32 1.442695, %v880_v10 }
 0x118   : > { %v1390_v50 = vpop.eup %1389  ;;  %1062 = vst [vmem:[%s1663_s18 + $0x98] sm:$0xff] %v1388_v46  ;;  %1415 = vrcp.f32 %v968_v43 }
 0x119   : > { %v1392_v53 = vpop.eup %1391  ;;  %1044 = vst [vmem:[%s1663_s18 + $0x8] sm:$0xff] %v1390_v50  ;;  %1417 = vpow2.f32 %v905_v34 }
 0x11a   : > { %v1394_v57 = vpop.eup %1393  ;;  %1060 = vst [vmem:[%s1663_s18 + $0x88] sm:$0xff] %v1392_v53  ;;  %1419 = vpow2.f32 %v937_v39 }
 0x11b   : > { %v1396_v60 = vpop.eup %1395  ;;  %1049 = vst [vmem:[%s1663_s18 + $0x30] sm:$0xff] %v1394_v57  ;;  %1421 = vpow2.f32 %v901_v47 }
 0x11c   : > { %v1398_v63 = vpop.eup %1397  ;;  %1065 = vst [vmem:[%s1663_s18 + $0xb0] sm:$0xff] %v1396_v60  ;;  %1423 = vpow2.f32 %v933_v51 }
 0x11d   : > { %v1400_v2 = vpop.eup %1399  ;;  %1047 = vst [vmem:[%s1663_s18 + $0x20] sm:$0xff] %v1398_v63  ;;  %1425 = vpow2.f32 %v911_v54 }
 0x11e   : > { %v1402_v4 = vpop.eup %1401  ;;  %1063 = vst [vmem:[%s1663_s18 + $0xa0] sm:$0xff] %v1400_v2  ;;  %1427 = vpow2.f32 %v943_v58 }
 0x11f   : > { %v1404_v6 = vpop.eup %1403  ;;  %1050 = vst [vmem:[%s1663_s18 + $0x38] sm:$0xff] %v1402_v4  ;;  %1429 = vpow2.f32 %v907_v61 }
 0x120   : > { %v1406_v9 = vpop.eup %1405  ;;  %1066 = vst [vmem:[%s1663_s18 + $0xb8] sm:$0xff] %v1404_v6  ;;  %1431 = vpow2.f32 %v939_v0 }
 0x121   : > { %v1408_v11 = vpop.eup %1407  ;;  %1048 = vst [vmem:[%s1663_s18 + $0x28] sm:$0xff] %v1406_v9  ;;  %1433 = vpow2.f32 %v913_v3 }
 0x122   : > { %v1410_v26 = vpop.eup %1409  ;;  %v957_v12 = vadd.f32 1.0, %v1408_v11  ;;  %1435 = vpow2.f32 %v945_v5 }
 0x123   : > { %v1412_v13 = vpop.eup %1411  ;;  %v973_v14 = vadd.f32 1.0, %v1410_v26  ;;  %1437 = vpow2.f32 %v909_v8 }
 0x124   : > { %v1414_v15 = vpop.eup %1413  ;;  %1439 = vrcp.f32 %v957_v12  ;;  %v955_v16 = vadd.f32 1.0, %v1412_v13 }
 0x125   : > { %v1416_v18 = vpop.eup %1415  ;;  %1441 = vrcp.f32 %v973_v14  ;;  %v971_v19 = vadd.f32 1.0, %v1414_v15 }
 0x126   : > { %v1418_v20 = vpop.eup %1417  ;;  %1064 = vst [vmem:[%s1663_s18 + $0xa8] sm:$0xff] %v1416_v18  ;;  %1443 = vrcp.f32 %v955_v16 }
 0x127   : > { %v1420_v21 = vpop.eup %1419  ;;  %1445 = vrcp.f32 %v971_v19  ;;  %v958_v22 = vadd.f32 1.0, %v1418_v20 }
 0x128   : > { %v1422_v23 = vpop.eup %1421  ;;  %v974_v24 = vadd.f32 1.0, %v1420_v21  ;;  %1447 = vpow2.f32 %v941_v17 }
 0x129   : > { %v1424_v25 = vpop.eup %1423  ;;  %1449 = vrcp.f32 %v958_v22  ;;  %v956_v27 = vadd.f32 1.0, %v1422_v23 }
 0x12a   : > { %v1426_v28 = vpop.eup %1425  ;;  %1451 = vrcp.f32 %v974_v24  ;;  %v972_v29 = vadd.f32 1.0, %v1424_v25 }
 0x12b   : > { %v1428_v30 = vpop.eup %1427  ;;  %1453 = vrcp.f32 %v956_v27  ;;  %v961_v31 = vadd.f32 1.0, %v1426_v28 }
 0x12c   : > { %v1430_v32 = vpop.eup %1429  ;;  %1455 = vrcp.f32 %v972_v29  ;;  %v977_v7 = vadd.f32 1.0, %v1428_v30 }
 0x12d   : > { %v1432_v33 = vpop.eup %1431  ;;  %1457 = vrcp.f32 %v961_v31  ;;  %v959_v34 = vadd.f32 1.0, %v1430_v32 }
 0x12e   : > { %v1434_v35 = vpop.eup %1433  ;;  %1459 = vrcp.f32 %v977_v7  ;;  %v975_v36 = vadd.f32 1.0, %v1432_v33 }
 0x12f   : > { %v1436_v37 = vpop.eup %1435  ;;  %1461 = vrcp.f32 %v959_v34  ;;  %v962_v38 = vadd.f32 1.0, %v1434_v35 }
 0x130   : > { %v1438_v39 = vpop.eup %1437  ;;  %1463 = vrcp.f32 %v975_v36  ;;  %v978_v40 = vadd.f32 1.0, %v1436_v37 }
 0x131   : > { %v1440_v41 = vpop.eup %1439  ;;  %1465 = vrcp.f32 %v962_v38  ;;  %v960_v42 = vadd.f32 1.0, %v1438_v39 }
 0x132   : > { %v1442_v43 = vpop.eup %1441  ;;  %1053 = vst [vmem:[%s1663_s18 + $0x50] sm:$0xff] %v1440_v41  ;;  %1467 = vrcp.f32 %v978_v40 }
 0x133   : > { %v1444_v44 = vpop.eup %1443  ;;  %1069 = vst [vmem:[%s1663_s18 + $0xd0] sm:$0xff] %v1442_v43  ;;  %1469 = vrcp.f32 %v960_v42 }
 0x134   : > { %v1446_v45 = vpop.eup %1445  ;;  %1051 = vst [vmem:[%s1663_s18 + $0x40] sm:$0xff] %v1444_v44 }
 0x135   : > { %v1448_v46 = vpop.eup %1447  ;;  %1067 = vst [vmem:[%s1663_s18 + $0xc0] sm:$0xff] %v1446_v45 }
 0x136   : > { %v1450_v47 = vpop.eup %1449  ;;  %v976_v48 = vadd.f32 1.0, %v1448_v46 }
 0x137   : > { %v1452_v49 = vpop.eup %1451  ;;  %1054 = vst [vmem:[%s1663_s18 + $0x58] sm:$0xff] %v1450_v47 }
 0x138   : > { %v1454_v50 = vpop.eup %1453  ;;  %1070 = vst [vmem:[%s1663_s18 + $0xd8] sm:$0xff] %v1452_v49  ;;  %1471 = vrcp.f32 %v976_v48 }
 0x139   : > { %v1456_v51 = vpop.eup %1455  ;;  %1052 = vst [vmem:[%s1663_s18 + $0x48] sm:$0xff] %v1454_v50 }
 0x13a   : > { %v1458_v52 = vpop.eup %1457  ;;  %1068 = vst [vmem:[%s1663_s18 + $0xc8] sm:$0xff] %v1456_v51 }
 0x13b   : > { %v1460_v53 = vpop.eup %1459  ;;  %1057 = vst [vmem:[%s1663_s18 + $0x70] sm:$0xff] %v1458_v52 }
 0x13c   : > { %v1462_v54 = vpop.eup %1461  ;;  %1073 = vst [vmem:[%s1663_s18 + $0xf0] sm:$0xff] %v1460_v53 }
 0x13d   : > { %v1464_v55 = vpop.eup %1463  ;;  %1055 = vst [vmem:[%s1663_s18 + $0x60] sm:$0xff] %v1462_v54 }
 0x13e   : > { %v1466_v56 = vpop.eup %1465  ;;  %1071 = vst [vmem:[%s1663_s18 + $0xe0] sm:$0xff] %v1464_v55 }
 0x13f   : > { %v1468_v57 = vpop.eup %1467  ;;  %1058 = vst [vmem:[%s1663_s18 + $0x78] sm:$0xff] %v1466_v56 }
 0x140   : > { %v1470_v58 = vpop.eup %1469  ;;  %1074 = vst [vmem:[%s1663_s18 + $0xf8] sm:$0xff] %v1468_v57 }
 0x141   : > { %1056 = vst [vmem:[%s1663_s18 + $0x68] sm:$0xff] %v1470_v58 }
 0x145   : > { %v1472_v59 = vpop.eup %1471 }
 0x146   : > { %1072 = vst [vmem:[%s1663_s18 + $0xe8] sm:$0xff] %v1472_v59 }
 0x147 PF: > { %s13_s14 = sadd.s32 1, %s1495_s14   ;;  %s1720_s12 = smov %s1491_s13 }
 0x148   : > { %p10_p5 = scmp.ge.s32.totalorder %s13_s14, 4   ;;  %s1721_s13 = smov %s1723_s15 }
 0x14a   :  { %12 = sbr.rel (!%p10_p5) target bundleno = 2 (0x2), region = 76 }

</bundles_post_ra>
